<compile_context>
chip_gen: v5e
topology: v5e:2x2
jax: 0.10.0
libtpu: 0.0.40
codegen_flags: <defaults>
</compile_context>

<pallas_src>
import jax
import jax.numpy as jnp
from jax.experimental import pallas as pl
from jax.experimental.pallas import tpu as pltpu

HAND_LENGTH = 14
HISTORY_LENGTH = 3
N_POS = HISTORY_LENGTH + HAND_LENGTH      # 17 embedded positions
EMB = 16                                  # both embedding widths
HIDDEN = 512
N_OUT = 55
N_PAD = 128                               # output lanes padded to 128 (lane-dense stores)
PLAY_VOCAB = 56
HAND_VOCAB = 55                           # padding_idx = 54 (zero row)
VOCAB_PAD = 128                           # combined embedding-table rows, padded to 128
HAND_OFFSET = PLAY_VOCAB                  # hand ids live at rows [56, 111)
K_FOLDED = N_POS * VOCAB_PAD              # 2176: contraction dim of the folded matmul
TM_MAX = 512                              # batch tile (VMEM-safe on v5e/v6e/v7x)


def _fused_forward_kernel(ids_ref, w1f_ref, b1_ref, w2_ref, b2_ref, o_ref):
    tm = o_ref.shape[0]
    ids = ids_ref[...]                                            # (tm, 17) int32, hand offset applied

    # Vectorized one-hot build for all 17 positions at once.
    iota = jax.lax.broadcasted_iota(jnp.int32, (tm, N_POS, VOCAB_PAD), 2)
    onehot = (iota == ids[:, :, None]).astype(jnp.bfloat16)       # (tm, 17, 128)
    onehot = onehot.reshape(tm, K_FOLDED)                         # (tm, 2176), lane-contiguous

    # Embedding gather + concat + first Linear as ONE bf16 MXU matmul (f32 accumulate).
    acc = jnp.dot(onehot, w1f_ref[...],
                  preferred_element_type=jnp.float32)             # (tm, 512)

    # f32 bias + ReLU epilogue (keep f32: v5e has no bf16 VPU/EUP).
    h = jnp.maximum(acc + b1_ref[...], 0.0)
    # dropout: identity in inference mode.

    out = jnp.dot(h.astype(jnp.bfloat16), w2_ref[...],
                  preferred_element_type=jnp.float32)             # (tm, 128)
    o_ref[...] = (out + b2_ref[...]).astype(o_ref.dtype)


def _round_up(n, m):
    return ((n + m - 1) // m) * m


def _choose_tile(batch):
    """Pick a batch tile: multiple of 8, <= TM_MAX, even tile count for v7x's 2 TCs."""
    if batch <= 8:
        return batch
    n_tiles = max(2, -(-batch // TM_MAX))
    n_tiles = _round_up(n_tiles, 2)            # even grid -> balanced across v7x TensorCores
    tm = _round_up(-(-batch // n_tiles), 8)
    return min(tm, batch)


def prepare_params(params):
    """One-time parameter packing: fold the embedding table into W1, bf16 weights, padded output."""
    tbl = jnp.zeros((VOCAB_PAD, EMB), jnp.float32)
    tbl = tbl.at[:PLAY_VOCAB].set(params["play_emb"])
    tbl = tbl.at[HAND_OFFSET:HAND_OFFSET + HAND_VOCAB].set(params["hand_emb"])

    # W1_folded[p*128:(p+1)*128, :] = tbl @ W1[p*16:(p+1)*16, :]  ->  (2176, 512)
    w1 = params["w1"].reshape(N_POS, EMB, HIDDEN)
    w1_folded = jnp.einsum("ve,peh->pvh", tbl, w1).reshape(K_FOLDED, HIDDEN)

    w2 = jnp.zeros((HIDDEN, N_PAD), jnp.float32).at[:, :N_OUT].set(params["w2"])
    b2 = jnp.zeros((1, N_PAD), jnp.float32).at[:, :N_OUT].set(params["b2"])
    return dict(
        w1_folded=w1_folded.astype(jnp.bfloat16),
        b1=params["b1"].reshape(1, HIDDEN).astype(jnp.float32),
        w2=w2.astype(jnp.bfloat16),
        b2=b2,
    )


@jax.jit
def simple_model_forward(hist, hand, prepped):
    """hist: (B, 3) int32, hand: (B, 14) int32 -> (B, 55) float32 logits."""
    B = hist.shape[0]
    # Merge hist/hand into one (B, 17) id tensor (hand rows live at table offset 56).
    ids = jnp.concatenate([hist, hand + HAND_OFFSET], axis=1).astype(jnp.int32)

    tm = _choose_tile(B)
    grid = (pl.cdiv(B, tm),)

    resident = lambda shape: pl.BlockSpec(shape, lambda i: (0, 0))   # VMEM-resident weights
    batched = lambda shape: pl.BlockSpec(shape, lambda i: (i, 0))    # tiled over batch

    flops = 2 * B * (K_FOLDED * HIDDEN + HIDDEN * N_PAD)
    bytes_accessed = (
        (K_FOLDED * HIDDEN + HIDDEN * N_PAD) * 2     # bf16 weights
        + (HIDDEN + N_PAD) * 4                       # f32 biases
        + B * (N_POS * 4 + N_PAD * 4)                # ids + padded output
    )

    out = pl.pallas_call(
        _fused_forward_kernel,
        out_shape=jax.ShapeDtypeStruct((B, N_PAD), jnp.float32),
        grid=grid,
        in_specs=[
            batched((tm, N_POS)),                    # merged ids
            resident((K_FOLDED, HIDDEN)),            # folded W1 (2176, 512) bf16
            resident((1, HIDDEN)),                   # b1 (f32)
            resident((HIDDEN, N_PAD)),               # W2 padded to 128 lanes (bf16)
            resident((1, N_PAD)),                    # b2 padded (f32)
        ],
        out_specs=batched((tm, N_PAD)),
        compiler_params=pltpu.CompilerParams(
            dimension_semantics=("parallel",),
            vmem_limit_bytes=32 * 1024 * 1024,       # conservative vs v7x's 64 MiB physical VMEM
        ),
        cost_estimate=pl.CostEstimate(
            flops=flops, transcendentals=0, bytes_accessed=bytes_accessed),
    )(ids, prepped["w1_folded"], prepped["b1"], prepped["w2"], prepped["b2"])

    # Semantic (B, 55) output. (Downstream users wanting max throughput can consume the
    # padded (B, 128) buffer directly and mask instead of paying this slice copy.)
    return out[:, :N_OUT]


def init_params():
    """Deterministic parameter init mirroring nn.Embedding / nn.Linear shapes."""
    keys = jax.random.split(jax.random.PRNGKey(42), 6)

    play_emb = jax.random.normal(keys[0], (PLAY_VOCAB, EMB), dtype=jnp.float32)
    hand_emb = jax.random.normal(keys[1], (HAND_VOCAB, EMB), dtype=jnp.float32)
    hand_emb = hand_emb.at[54].set(0.0)   # padding_idx=54 -> zero embedding row

    embedded = N_POS * EMB
    lim1 = 1.0 / (embedded ** 0.5)
    w1 = jax.random.uniform(keys[2], (embedded, HIDDEN), jnp.float32, -lim1, lim1)
    b1 = jax.random.uniform(keys[3], (HIDDEN,), jnp.float32, -lim1, lim1)

    lim2 = 1.0 / (HIDDEN ** 0.5)
    w2 = jax.random.uniform(keys[4], (HIDDEN, N_OUT), jnp.float32, -lim2, lim2)
    b2 = jax.random.uniform(keys[5], (N_OUT,), jnp.float32, -lim2, lim2)

    return {"play_emb": play_emb, "hand_emb": hand_emb,
            "w1": w1, "b1": b1, "w2": w2, "b2": b2}


def _reference_forward(hist, hand, prepped):
    """Pure-JAX reference using the same folded bf16 parameters the kernel consumes."""
    B = hist.shape[0]
    ids = jnp.concatenate([hist, hand + HAND_OFFSET], axis=1)
    onehot = jax.nn.one_hot(ids, VOCAB_PAD, dtype=jnp.float32).reshape(B, K_FOLDED)
    h = onehot @ prepped["w1_folded"].astype(jnp.float32) + prepped["b1"]
    h = jnp.maximum(h, 0.0)
    h = h.astype(jnp.bfloat16).astype(jnp.float32)   # mirror the kernel's bf16 feed into W2
    out = h @ prepped["w2"].astype(jnp.float32) + prepped["b2"]
    return out[:, :N_OUT]


if __name__ == "__main__":
    params = init_params()
    prepped = prepare_params(params)

    # B=8: tiny single tile. B=300: 2 balanced tiles (152+148). B=777: 2 large tiles w/ partial.
    for B in (8, 300, 777):
        key = jax.random.PRNGKey(0)
        k_hist, k_hand = jax.random.split(key)
        hist = jax.random.randint(k_hist, (B, HISTORY_LENGTH), 0, PLAY_VOCAB, dtype=jnp.int32)
        hand = jax.random.randint(k_hand, (B, HAND_LENGTH), 0, HAND_VOCAB, dtype=jnp.int32)

        logits = simple_model_forward(hist, hand, prepped)
        jax.block_until_ready(logits)
        assert logits.shape == (B, N_OUT) and logits.dtype == jnp.float32

        ref = _reference_forward(hist, hand, prepped)
        max_err = float(jnp.max(jnp.abs(logits - ref)))
        assert jnp.allclose(logits, ref, atol=2e-3, rtol=2e-3), max_err

    print("KERNEL_OK")
</pallas_src>

<mosaic_0001>
module attributes {stable_mosaic.version = 11 : i64} {
  func.func @_fused_forward_kernel(%arg0: i32, %arg1: memref<8x17xi32, #tpu.memory_space<vmem>>, %arg2: memref<2176x512xbf16, #tpu.memory_space<vmem>>, %arg3: memref<1x512xf32, #tpu.memory_space<vmem>>, %arg4: memref<512x128xbf16, #tpu.memory_space<vmem>>, %arg5: memref<1x128xf32, #tpu.memory_space<vmem>>, %arg6: memref<8x128xf32, #tpu.memory_space<vmem>>) attributes {dimension_semantics = [#tpu.dimension_semantics<parallel>], iteration_bounds = array<i64: 1>, scalar_prefetch = 0 : i64, scratch_operands = 0 : i64, tpu.core_type = #tpu.core_type<tc>, window_params = [{transform_indices = @transform_0, window_bounds = array<i64: 8, 17>}, {pipeline_mode = #tpu.pipeline_mode<synchronous>, transform_indices = @transform_1, window_bounds = array<i64: 2176, 512>}, {pipeline_mode = #tpu.pipeline_mode<synchronous>, transform_indices = @transform_2, window_bounds = array<i64: 1, 512>}, {pipeline_mode = #tpu.pipeline_mode<synchronous>, transform_indices = @transform_3, window_bounds = array<i64: 512, 128>}, {pipeline_mode = #tpu.pipeline_mode<synchronous>, transform_indices = @transform_4, window_bounds = array<i64: 1, 128>}, {transform_indices = @transform_5, window_bounds = array<i64: 8, 128>}]} {
    %c0 = arith.constant 0 : index
    %c0_0 = arith.constant 0 : index
    %0 = vector.load %arg1[%c0, %c0_0] : memref<8x17xi32, #tpu.memory_space<vmem>>, vector<8x17xi32>
    %1 = tpu.iota {dimensions = array<i32: 2>} : vector<8x17x128xi32>
    %2 = vector.shape_cast %0 : vector<8x17xi32> to vector<8x17x1xi32>
    %3 = vector.broadcast %2 : vector<8x17x1xi32> to vector<8x17x128xi32>
    %4 = arith.cmpi eq, %1, %3 : vector<8x17x128xi32>
    %5 = arith.extui %4 : vector<8x17x128xi1> to vector<8x17x128xi32>
    %6 = arith.sitofp %5 : vector<8x17x128xi32> to vector<8x17x128xf32>
    %7 = arith.truncf %6 : vector<8x17x128xf32> to vector<8x17x128xbf16>
    %8 = vector.shape_cast %7 : vector<8x17x128xbf16> to vector<8x2176xbf16>
    %c0_1 = arith.constant 0 : index
    %c0_2 = arith.constant 0 : index
    %9 = vector.load %arg2[%c0_1, %c0_2] : memref<2176x512xbf16, #tpu.memory_space<vmem>>, vector<2176x512xbf16>
    %cst = arith.constant dense<0.000000e+00> : vector<8x512xf32>
    %10 = tpu.matmul %8, %9, %cst {dimension_numbers = #tpu.dot_dimension_numbers<[1], [0], [0], [1], [0, 0, 1, 1], [], []>} : vector<8x2176xbf16>, vector<2176x512xbf16>, vector<8x512xf32> -> vector<8x512xf32>
    %c0_3 = arith.constant 0 : index
    %c0_4 = arith.constant 0 : index
    %11 = vector.load %arg3[%c0_3, %c0_4] : memref<1x512xf32, #tpu.memory_space<vmem>>, vector<1x512xf32>
    %12 = vector.broadcast %11 : vector<1x512xf32> to vector<8x512xf32>
    %13 = arith.addf %10, %12 : vector<8x512xf32>
    %cst_5 = arith.constant 0.000000e+00 : f32
    %14 = vector.broadcast %cst_5 : f32 to vector<8x512xf32>
    %15 = arith.maximumf %13, %14 : vector<8x512xf32>
    %16 = arith.truncf %15 : vector<8x512xf32> to vector<8x512xbf16>
    %c0_6 = arith.constant 0 : index
    %c0_7 = arith.constant 0 : index
    %17 = vector.load %arg4[%c0_6, %c0_7] : memref<512x128xbf16, #tpu.memory_space<vmem>>, vector<512x128xbf16>
    %cst_8 = arith.constant dense<0.000000e+00> : vector<8x128xf32>
    %18 = tpu.matmul %16, %17, %cst_8 {dimension_numbers = #tpu.dot_dimension_numbers<[1], [0], [0], [1], [0, 0, 1, 1], [], []>} : vector<8x512xbf16>, vector<512x128xbf16>, vector<8x128xf32> -> vector<8x128xf32>
    %c0_9 = arith.constant 0 : index
    %c0_10 = arith.constant 0 : index
    %19 = vector.load %arg5[%c0_9, %c0_10] : memref<1x128xf32, #tpu.memory_space<vmem>>, vector<1x128xf32>
    %20 = vector.broadcast %19 : vector<1x128xf32> to vector<8x128xf32>
    %21 = arith.addf %18, %20 : vector<8x128xf32>
    %c0_11 = arith.constant 0 : index
    %c0_12 = arith.constant 0 : index
    %22 = vector.load %arg6[%c0_11, %c0_12] : memref<8x128xf32, #tpu.memory_space<vmem>>, vector<8x128xf32>
    tpu.vector_store %arg6[%c0_11, %c0_12], %21 {strides = array<i32>} : memref<8x128xf32, #tpu.memory_space<vmem>>, vector<8x128xf32>,
    return
  }
  func.func @transform_0(%arg0: i32) -> (i32, i32) {
    %c0_i32 = arith.constant 0 : i32
    %c0_i32_0 = arith.constant 0 : i32
    return %arg0, %c0_i32 : i32, i32
  }
  func.func @transform_1(%arg0: i32) -> (i32, i32) {
    %c0_i32 = arith.constant 0 : i32
    %c0_i32_0 = arith.constant 0 : i32
    %c0_i32_1 = arith.constant 0 : i32
    return %c0_i32, %c0_i32_0 : i32, i32
  }
  func.func @transform_2(%arg0: i32) -> (i32, i32) {
    %c0_i32 = arith.constant 0 : i32
    %c0_i32_0 = arith.constant 0 : i32
    %c0_i32_1 = arith.constant 0 : i32
    return %c0_i32, %c0_i32_0 : i32, i32
  }
  func.func @transform_3(%arg0: i32) -> (i32, i32) {
    %c0_i32 = arith.constant 0 : i32
    %c0_i32_0 = arith.constant 0 : i32
    %c0_i32_1 = arith.constant 0 : i32
    return %c0_i32, %c0_i32_0 : i32, i32
  }
  func.func @transform_4(%arg0: i32) -> (i32, i32) {
    %c0_i32 = arith.constant 0 : i32
    %c0_i32_0 = arith.constant 0 : i32
    %c0_i32_1 = arith.constant 0 : i32
    return %c0_i32, %c0_i32_0 : i32, i32
  }
  func.func @transform_5(%arg0: i32) -> (i32, i32) {
    %c0_i32 = arith.constant 0 : i32
    %c0_i32_0 = arith.constant 0 : i32
    return %arg0, %c0_i32 : i32, i32
  }
}

</mosaic_0001>

<bundles_post_ra>
// kernel: simple_model_forward.1
= control target key start
LH: loop header
LB: loop body
LE: loop exit
PB: predicated region body
PF: predicated region fallthrough
CT: control target
= control target key end

     0   :  { %10 = vsyncpa [#allocation3], 0  ;;  %s8561_s0 = inlined_call_operand.vmem [shape: s32[8,17], index: 0, kind: input, shape index: {}]   ;;  %s8562_s1 = inlined_call_operand.hbm [shape: bf16[2176,512], index: 1, kind: input, shape index: {}]   ;;  %s8563_s2 = inlined_call_operand.hbm [shape: f32[1,512], index: 2, kind: input, shape index: {}]   ;;  %s8564_s3 = inlined_call_operand.hbm [shape: bf16[512,128], index: 3, kind: input, shape index: {}]   ;;  %s8565_s4 = inlined_call_operand.hbm [shape: f32[1,128], index: 4, kind: input, shape index: {}]   ;;  %s8566_s5 = inlined_call_operand.hbm [shape: f32[8,128], index: 5, kind: output, shape index: {}]  }
   0x1   :  { %11 = vsyncpa [#allocation6], 0 }
   0x2   :  { %12 = vsyncpa [#allocation9], 0  ;;  %s34_s20 = sshll.u32 %s8563_s2, 4  ;;  %s35_s20 = int_to_ptr.hbm [resolvable:$true] %s34_s20 }
   0x3   :  { %13 = vsyncpa [#allocation4], 0  ;;  %s8103_s21 = smov [#allocation5]   ;;  %s20_s25 = sshll.u32 %s8562_s1, 4  ;;  %s21_s25 = int_to_ptr.hbm [resolvable:$true] %s20_s25 }
   0x4   :  { %s36_s22 = sshll.u32 %s8103_s21, 4  ;;  %s8104_s26 = smov [#allocation2]   ;;  %s37_s22 = int_to_ptr.vmem [resolvable:$true] %s36_s22 }
   0x5   :  { %39 = dma.hbm_to_vmem [thread:$0]  %s35_s20, 64, %s37_s22, [#allocation6]  }
   0x6   :  { %s22_s27 = sshll.u32 %s8104_s26, 4  ;;  %s8105_s28 = smov 256   ;;  %s23_s27 = int_to_ptr.vmem [resolvable:$true] %s22_s27 }
   0x7   :  { %s8106_s29 = smov 16   ;;  %s44_s2 = sshll.u32 %s8564_s3, 4  ;;  %s45_s2 = int_to_ptr.hbm [resolvable:$true] %s44_s2 }
   0x8   :  { %28 = dma.hbm_to_vmem [thread:$0]  %s21_s25, 69632, %s23_s27, [#allocation3], %s8105_s28, %s8105_s28, %s8106_s29  }
   0x9   :  { %s8107_s7 = smov [#allocation7]   ;;  %s58_s1 = sshll.u32 %s8565_s4, 4  ;;  %s59_s1 = int_to_ptr.hbm [resolvable:$true] %s58_s1 }
   0xa   :  { %s46_s8 = sshll.u32 %s8107_s7, 4  ;;  %s8108_s11 = smov 64   ;;  %s47_s8 = int_to_ptr.vmem [resolvable:$true] %s46_s8 }
   0xb   :  { %s8109_s12 = smov 4   ;;  %s8110_s13 = smov [#allocation8]  }
   0xc   :  { %52 = dma.hbm_to_vmem [thread:$0]  %s45_s2, 4096, %s47_s8, [#allocation6], %s8108_s11, %s8108_s11, %s8109_s12  }
   0xd   :  { %s60_s14 = sshll.u32 %s8110_s13, 4  ;;  %s61_s14 = int_to_ptr.vmem [resolvable:$true] %s60_s14 }
   0xe   :  { %63 = dma.hbm_to_vmem [thread:$0]  %s59_s1, 16, %s61_s14, [#allocation9]  }
   0xf   :  { %8095 = dma.done.wait [#allocation3], 69632  }
  0x10   :  { %8096 = vsyncadd [#allocation3], 4294897664 }
  0x11   :  { %8097 = dma.done.wait [#allocation6], 4160  }
  0x12   :  { %8098 = vsyncadd [#allocation6], 4294963136 }
  0x13   :  { %8099 = dma.done.wait [#allocation9], 16  }
  0x14   :  { %8100 = vsyncadd [#allocation9], 4294967280  ;;  %v82_v0 = vlaneseq  ;;  %v81_v2 = vld [vmem:[%s8561_s0] sm:$0xff]  ;;  %v7405_v13 = vld [vmem:[#allocation2 + $0xec] sm:$0xf0]  ;;  %vm333_vm6 = vcmask 1047556  }
  0x15   :  { %v8166_v3 = vperm.slane %v81_v2, 6  ;;  %v8168_v4 = vperm.slane %v81_v2, 2  ;;  %v8170_v5 = vperm.slane %v81_v2, 4  ;;  %v8175_v6 = vperm.slane %v81_v2, 7  ;;  %v5185_v12 = vld [vmem:[#allocation2 + $0xe0] sm:$0xf] }
  0x16   :  { %v8158_v1 = vshrl.u32 %v82_v0, 7  ;;  %v8177_v7 = vperm.slane %v81_v2, 3  ;;  %v8179_v8 = vperm.slane %v81_v2, 5  ;;  %v8184_v9 = vperm.slane %v81_v2, 1  ;;  %v5313_v14 = vld [vmem:[#allocation2 + $0x1e0] sm:$0xf] }
  0x17   :  { %v8186_v10 = vperm.slane %v81_v2, 0  ;;  %v5186_v15 = vor.u32 %v7405_v13, %v5185_v12  ;;  %v7437_v16 = vld [vmem:[#allocation2 + $0x1ec] sm:$0xf0]  ;;  %v5441_v17 = vld [vmem:[#allocation2 + $0x2e0] sm:$0xf]  ;;  %s8114_s0 = smov [#allocation10]  }
  0x18   :  { %7964 = vset.pattern.permute.xlu1 %v8158_v1  ;;  %7963 = vset.pattern.permute.xlu0 %v8158_v1  ;;  %v93_v11 = vadd.s32 8, %v8158_v1  ;;  %v7469_v18 = vld [vmem:[#allocation2 + $0x2ec] sm:$0xf0]  ;;  %v5314_v19 = vor.u32 %v7437_v16, %v5313_v14  ;;  %v5169_v21 = vld [vmem:[#allocation2 + $0xc0] sm:$0xf]  ;;  %v99_v16 = vadd.s32 16, %v8158_v1 }
  0x19   :  { %7965 = vset.pattern.permute.xlu2 %v8158_v1  ;;  %v5442_v20 = vor.u32 %v7469_v18, %v5441_v17  ;;  %v7401_v22 = vld [vmem:[#allocation2 + $0xcc] sm:$0xf0]  ;;  %3823 = vmatpush.bf16.msra.mxu0 %v5186_v15  ;;  %v5569_v24 = vld [vmem:[#allocation2 + $0x3e0] sm:$0xf]  ;;  %s5033_s15 = sshll.u32 %s8114_s0, 4  ;;  %s5035_s18 = sshll.u32 %s8566_s5, 4  ;;  %s5034_s15 = int_to_ptr.vmem [resolvable:$true] %s5033_s15  ;;  %s5036_s18 = int_to_ptr.hbm [resolvable:$true] %s5035_s18 }
  0x1a   :  { %v5170_v23 = vor.u32 %v7401_v22, %v5169_v21  ;;  %3836 = vmatpush.bf16.msra.mxu1 %v5314_v19  ;;  %v7501_v25 = vld [vmem:[#allocation2 + $0x3ec] sm:$0xf0]  ;;  %v5297_v26 = vld [vmem:[#allocation2 + $0x1c0] sm:$0xf] }
  0x1b   :  { %3849 = vmatpush.bf16.msra.mxu2 %v5442_v20  ;;  %v5570_v27 = vor.u32 %v7501_v25, %v5569_v24  ;;  %v7433_v28 = vld [vmem:[#allocation2 + $0x1cc] sm:$0xf0]  ;;  %v5425_v29 = vld [vmem:[#allocation2 + $0x2c0] sm:$0xf] }
  0x1c   :  { %v7465_v30 = vld [vmem:[#allocation2 + $0x2cc] sm:$0xf0]  ;;  %v5298_v31 = vor.u32 %v7433_v28, %v5297_v26  ;;  %v5153_v33 = vld [vmem:[#allocation2 + $0xa0] sm:$0xf] }
  0x1d   :  { %3824 = vmatpush.bf16.msra.mxu0 %v5170_v23  ;;  %v5426_v32 = vor.u32 %v7465_v30, %v5425_v29  ;;  %v7397_v34 = vld [vmem:[#allocation2 + $0xac] sm:$0xf0]  ;;  %v5553_v35 = vld [vmem:[#allocation2 + $0x3c0] sm:$0xf]  ;;  %3862 = vmatpush.bf16.msra.mxu3 %v5570_v27 }
  0x1e   :  { %v5154_v36 = vor.u32 %v7397_v34, %v5153_v33  ;;  %v7497_v37 = vld [vmem:[#allocation2 + $0x3cc] sm:$0xf0]  ;;  %v5281_v38 = vld [vmem:[#allocation2 + $0x1a0] sm:$0xf]  ;;  %3837 = vmatpush.bf16.msra.mxu1 %v5298_v31 }
  0x1f   :  { %v7429_v39 = vld [vmem:[#allocation2 + $0x1ac] sm:$0xf0]  ;;  %3850 = vmatpush.bf16.msra.mxu2 %v5426_v32  ;;  %v5554_v40 = vor.u32 %v7497_v37, %v5553_v35  ;;  %v5409_v41 = vld [vmem:[#allocation2 + $0x2a0] sm:$0xf] }
  0x20   :  { %203 = vperm.xlu0 %7963, %v8166_v3   ;;  %127 = vperm.xlu1 %7964, %v8168_v4   ;;  %v7461_v42 = vld [vmem:[#allocation2 + $0x2ac] sm:$0xf0]  ;;  %v5137_v43 = vld [vmem:[#allocation2 + $0x80] sm:$0xf]  ;;  %v5282_v44 = vor.u32 %v7429_v39, %v5281_v38 }
  0x21   :  { %165 = vperm.xlu2 %7965, %v8170_v5   ;;  %3825 = vmatpush.bf16.msra.mxu0 %v5154_v36  ;;  %v7393_v45 = vld [vmem:[#allocation2 + $0x8c] sm:$0xf0]  ;;  %v5410_v46 = vor.u32 %v7461_v42, %v5409_v41  ;;  %v5537_v48 = vld [vmem:[#allocation2 + $0x3a0] sm:$0xf] }
  0x22   :  { %v5138_v47 = vor.u32 %v7393_v45, %v5137_v43  ;;  %3863 = vmatpush.bf16.msra.mxu3 %v5554_v40  ;;  %v7493_v49 = vld [vmem:[#allocation2 + $0x3ac] sm:$0xf0]  ;;  %v5265_v50 = vld [vmem:[#allocation2 + $0x180] sm:$0xf]  ;;  %3838 = vmatpush.bf16.msra.mxu1 %v5282_v44 }
  0x23   :  { %v5538_v51 = vor.u32 %v7493_v49, %v5537_v48  ;;  %v7425_v52 = vld [vmem:[#allocation2 + $0x18c] sm:$0xf0]  ;;  %v5393_v53 = vld [vmem:[#allocation2 + $0x280] sm:$0xf]  ;;  %3851 = vmatpush.bf16.msra.mxu2 %v5410_v46 }
  0x24   :  { %v7457_v54 = vld [vmem:[#allocation2 + $0x28c] sm:$0xf0]  ;;  %v5266_v55 = vor.u32 %v7425_v52, %v5265_v50  ;;  %v5121_v57 = vld [vmem:[#allocation2 + $0x60] sm:$0xf] }
  0x25   :  { %3826 = vmatpush.bf16.msra.mxu0 %v5138_v47  ;;  %v5394_v56 = vor.u32 %v7457_v54, %v5393_v53  ;;  %v7389_v58 = vld [vmem:[#allocation2 + $0x6c] sm:$0xf0]  ;;  %v5521_v59 = vld [vmem:[#allocation2 + $0x380] sm:$0xf] }
  0x26   :  { %3864 = vmatpush.bf16.msra.mxu3 %v5538_v51  ;;  %v5122_v60 = vor.u32 %v7389_v58, %v5121_v57  ;;  %v7489_v61 = vld [vmem:[#allocation2 + $0x38c] sm:$0xf0]  ;;  %v5249_v62 = vld [vmem:[#allocation2 + $0x160] sm:$0xf]  ;;  %3839 = vmatpush.bf16.msra.mxu1 %v5266_v55 }
  0x27   :  { %v7421_v63 = vld [vmem:[#allocation2 + $0x16c] sm:$0xf0]  ;;  %v5522_v2 = vor.u32 %v7489_v61, %v5521_v59  ;;  %v5105_v13 = vld [vmem:[#allocation2 + $0x40] sm:$0xf]  ;;  %3852 = vmatpush.bf16.msra.mxu2 %v5394_v56 }
  0x28   :  { %222 = vperm.xlu0 %7963, %v8175_v6   ;;  %146 = vperm.xlu1 %7964, %v8177_v7   ;;  %v7453_v12 = vld [vmem:[#allocation2 + $0x26c] sm:$0xf0]  ;;  %v5250_v14 = vor.u32 %v7421_v63, %v5249_v62  ;;  %v5505_v19 = vld [vmem:[#allocation2 + $0x360] sm:$0xf] }
  0x29   :  { %184 = vperm.xlu2 %7965, %v8179_v8   ;;  %v7385_v15 = vld [vmem:[#allocation2 + $0x4c] sm:$0xf0]  ;;  %3827 = vmatpush.bf16.msra.mxu0 %v5122_v60  ;;  %v5233_v21 = vld [vmem:[#allocation2 + $0x140] sm:$0xf] }
  0x2a   :  { %v5106_v18 = vor.u32 %v7385_v15, %v5105_v13  ;;  %3865 = vmatpush.bf16.msra.mxu3 %v5522_v2  ;;  %v7485_v20 = vld [vmem:[#allocation2 + $0x36c] sm:$0xf0]  ;;  %3840 = vmatpush.bf16.msra.mxu1 %v5250_v14  ;;  %v5361_v24 = vld [vmem:[#allocation2 + $0x240] sm:$0xf] }
  0x2b   :  { %v5506_v22 = vor.u32 %v7485_v20, %v5505_v19  ;;  %v7417_v23 = vld [vmem:[#allocation2 + $0x14c] sm:$0xf0]  ;;  %v5089_v27 = vld [vmem:[#allocation2 + $0x20] sm:$0xf] }
  0x2c   :  { %v7449_v25 = vld [vmem:[#allocation2 + $0x24c] sm:$0xf0]  ;;  %v5234_v1 = vor.u32 %v7417_v23, %v5233_v21  ;;  %v5489_v29 = vld [vmem:[#allocation2 + $0x340] sm:$0xf] }
  0x2d   :  { %3828 = vmatpush.bf16.msra.mxu0 %v5106_v18  ;;  %v5362_v26 = vor.u32 %v7449_v25, %v5361_v24  ;;  %v7381_v28 = vld [vmem:[#allocation2 + $0x2c] sm:$0xf0]  ;;  %v5217_v32 = vld [vmem:[#allocation2 + $0x120] sm:$0xf] }
  0x2e   :  { %3866 = vmatpush.bf16.msra.mxu3 %v5506_v22  ;;  %v5090_v30 = vor.u32 %v7381_v28, %v5089_v27  ;;  %v7481_v31 = vld [vmem:[#allocation2 + $0x34c] sm:$0xf0]  ;;  %v5345_v35 = vld [vmem:[#allocation2 + $0x220] sm:$0xf]  ;;  %3841 = vmatpush.bf16.msra.mxu1 %v5234_v1 }
  0x2f   :  { %v7413_v33 = vld [vmem:[#allocation2 + $0x12c] sm:$0xf0]  ;;  %v5490_v34 = vor.u32 %v7481_v31, %v5489_v29  ;;  %v5073_v39 = vld [vmem:[#allocation2] sm:$0xf] }
  0x30   :  { %108 = vperm.xlu1 %7964, %v8184_v9   ;;  %89 = vperm.xlu0 %7963, %v8186_v10   ;;  %v7445_v36 = vld [vmem:[#allocation2 + $0x22c] sm:$0xf0]  ;;  %v5218_v37 = vor.u32 %v7413_v33, %v5217_v32  ;;  %v5473_v41 = vld [vmem:[#allocation2 + $0x320] sm:$0xf] }
  0x31   :  { %7966 = vset.pattern.permute.xlu2 %v93_v11  ;;  %3829 = vmatpush.bf16.msra.mxu0 %v5090_v30  ;;  %v5346_v38 = vor.u32 %v7445_v36, %v5345_v35  ;;  %v7377_v40 = vld [vmem:[#allocation2 + $0xc] sm:$0xf0]  ;;  %v5697_v44 = vld [vmem:[#allocation2 + $0x4e0] sm:$0xf] }
  0x32   :  { %3867 = vmatpush.bf16.msra.mxu3 %v5490_v34  ;;  %3842 = vmatpush.bf16.msra.mxu1 %v5218_v37  ;;  %v5074_v42 = vor.u32 %v7377_v40, %v5073_v39  ;;  %v7477_v43 = vld [vmem:[#allocation2 + $0x32c] sm:$0xf0]  ;;  %v5825_v49 = vld [vmem:[#allocation2 + $0x5e0] sm:$0xf] }
  0x33   :  { %v7533_v45 = vld [vmem:[#allocation2 + $0x4ec] sm:$0xf0]  ;;  %v5474_v46 = vor.u32 %v7477_v43, %v5473_v41  ;;  %v5457_v55 = vld [vmem:[#allocation2 + $0x300] sm:$0xf] }
  0x34   :  { %v5698_v47 = vor.u32 %v7533_v45, %v5697_v44  ;;  %v7441_v48 = vld [vmem:[#allocation2 + $0x20c] sm:$0xf0]  ;;  %v5809_v61 = vld [vmem:[#allocation2 + $0x5c0] sm:$0xf] }
  0x35   :  { %3830 = vmatpush.bf16.msra.mxu0 %v5074_v42  ;;  %v7565_v51 = vld [vmem:[#allocation2 + $0x5ec] sm:$0xf0]  ;;  %v5937_v2 = vld [vmem:[#allocation2 + $0x6c0] sm:$0xf] }
  0x36   :  { %3868 = vmatpush.bf16.msra.mxu3 %v5474_v46  ;;  %v7597_v52 = vld [vmem:[#allocation2 + $0x6ec] sm:$0xf0]  ;;  %v5826_v53 = vor.u32 %v7565_v51, %v5825_v49  ;;  %v5665_v13 = vld [vmem:[#allocation2 + $0x4a0] sm:$0xf] }
  0x37   :  { %v7473_v56 = vld [vmem:[#allocation2 + $0x30c] sm:$0xf0]  ;;  %v5793_v19 = vld [vmem:[#allocation2 + $0x5a0] sm:$0xf] }
  0x38   :  { %7968 = vset.pattern.permute.xlu1 %v93_v11  ;;  %7967 = vset.pattern.permute.xlu0 %v93_v11  ;;  %v5377_v11 = vld [vmem:[#allocation2 + $0x260] sm:$0xf]  ;;  %v7529_v57 = vld [vmem:[#allocation2 + $0x4cc] sm:$0xf0] }
  0x39   :  { %209 = vperm.xlu2 %7966, %v8166_v3   ;;  %v5378_v17 = vor.u32 %v7453_v12, %v5377_v11  ;;  %3875 = vmatpush.bf16.msrb.mxu0 %v5698_v47  ;;  %v7629_v58 = vld [vmem:[#allocation2 + $0x7ec] sm:$0xf0]  ;;  %v5921_v22 = vld [vmem:[#allocation2 + $0x6a0] sm:$0xf] }
  0x3a   :  { %v7561_v62 = vld [vmem:[#allocation2 + $0x5cc] sm:$0xf0]  ;;  %v5649_v25 = vld [vmem:[#allocation2 + $0x480] sm:$0xf] }
  0x3b   :  { %3853 = vmatpush.bf16.msra.mxu2 %v5378_v17  ;;  %v5810_v63 = vor.u32 %v7561_v62, %v5809_v61  ;;  %v7593_v11 = vld [vmem:[#allocation2 + $0x6cc] sm:$0xf0]  ;;  %v6049_v27 = vld [vmem:[#allocation2 + $0x7a0] sm:$0xf] }
  0x3c   :  { %v5938_v12 = vor.u32 %v7593_v11, %v5937_v2  ;;  %v7525_v14 = vld [vmem:[#allocation2 + $0x4ac] sm:$0xf0]  ;;  %v5777_v30 = vld [vmem:[#allocation2 + $0x580] sm:$0xf] }
  0x3d   :  { %v5666_v15 = vor.u32 %v7525_v14, %v5665_v13  ;;  %v7625_v17 = vld [vmem:[#allocation2 + $0x7cc] sm:$0xf0]  ;;  %v5905_v33 = vld [vmem:[#allocation2 + $0x680] sm:$0xf] }
  0x3e   :  { %v7557_v20 = vld [vmem:[#allocation2 + $0x5ac] sm:$0xf0]  ;;  %v5633_v36 = vld [vmem:[#allocation2 + $0x460] sm:$0xf] }
  0x3f   :  { %3854 = vmatpush.bf16.msra.mxu2 %v5362_v26  ;;  %v5794_v21 = vor.u32 %v7557_v20, %v5793_v19  ;;  %v7589_v23 = vld [vmem:[#allocation2 + $0x6ac] sm:$0xf0]  ;;  %v6033_v39 = vld [vmem:[#allocation2 + $0x780] sm:$0xf]  ;;  %v8209_v19 = vand.u32 127, %v82_v0 }
  0x40   :  { %133 = vperm.xlu1 %7968, %v8168_v4   ;;  %228 = vperm.xlu0 %7967, %v8175_v6   ;;  %v5922_v24 = vor.u32 %v7589_v23, %v5921_v22  ;;  %v7521_v1 = vld [vmem:[#allocation2 + $0x48c] sm:$0xf0]  ;;  %v5761_v42 = vld [vmem:[#allocation2 + $0x560] sm:$0xf] }
  0x41   :  { %152 = vperm.xlu2 %7966, %v8177_v7   ;;  %v5650_v26 = vor.u32 %v7521_v1, %v5649_v25  ;;  %v7621_v28 = vld [vmem:[#allocation2 + $0x7ac] sm:$0xf0]  ;;  %v5889_v45 = vld [vmem:[#allocation2 + $0x660] sm:$0xf] }
  0x42   :  { %v6050_v29 = vor.u32 %v7621_v28, %v6049_v27  ;;  %v7553_v31 = vld [vmem:[#allocation2 + $0x58c] sm:$0xf0]  ;;  %v5857_v61 = vld [vmem:[#allocation2 + $0x620] sm:$0xf]  ;;  %v8111_v28 = vmov 0.0  }
  0x43   :  { %3855 = vmatpush.bf16.msra.mxu2 %v5346_v38  ;;  %v5778_v32 = vor.u32 %v7553_v31, %v5777_v30  ;;  %v7585_v34 = vld [vmem:[#allocation2 + $0x68c] sm:$0xf0]  ;;  %v5985_v13 = vld [vmem:[#allocation2 + $0x720] sm:$0xf] }
  0x44   :  { %v5906_v35 = vor.u32 %v7585_v34, %v5905_v33  ;;  %v7517_v37 = vld [vmem:[#allocation2 + $0x46c] sm:$0xf0]  ;;  %v5969_v1 = vld [vmem:[#allocation2 + $0x700] sm:$0xf]  ;;  %v8112_v33 = vmov 1983009808  }
  0x45   :  { %v5634_v38 = vor.u32 %v7517_v37, %v5633_v36  ;;  %v7617_v40 = vld [vmem:[#allocation2 + $0x78c] sm:$0xf0]  ;;  %v336_v34 = vunpack.c.l.s4 %v8112_v33  ;;  %v6321_v33 = vld [vmem:[#allocation2 + $0x9c0] sm:$0xf] }
  0x46   :  { %v6034_v41 = vor.u32 %v7617_v40, %v6033_v39  ;;  %v7549_v43 = vld [vmem:[#allocation2 + $0x56c] sm:$0xf0] }
  0x47   :  { %v5762_v44 = vor.u32 %v7549_v43, %v5761_v42  ;;  %v7581_v46 = vld [vmem:[#allocation2 + $0x66c] sm:$0xf0] }
  0x48   :  { %171 = vperm.xlu1 %7968, %v8170_v5   ;;  %95 = vperm.xlu0 %7967, %v8186_v10   ;;  %v5890_v47 = vor.u32 %v7581_v46, %v5889_v45  ;;  %v7545_v51 = vld [vmem:[#allocation2 + $0x54c] sm:$0xf0]  ;;  %v8223_v45 = vunpack.c.0.s8 %v336_v34 }
  0x49   :  { %190 = vperm.xlu2 %7966, %v8179_v8   ;;  %v7573_v62 = vld [vmem:[#allocation2 + $0x62c] sm:$0xf0] }
  0x4a   :  { %v5858_v2 = vor.u32 %v7573_v62, %v5857_v61  ;;  %v7505_v11 = vld [vmem:[#allocation2 + $0x40c] sm:$0xf0]  ;;  %v6209_v62 = vld [vmem:[#allocation2 + $0x8e0] sm:$0xf] }
  0x4b   :  { %v7605_v14 = vld [vmem:[#allocation2 + $0x72c] sm:$0xf0] }
  0x4c   :  { %v7569_v22 = vld [vmem:[#allocation2 + $0x60c] sm:$0xf0] }
  0x4d   :  { %v7689_v34 = vld [vmem:[#allocation2 + $0x9cc] sm:$0xf0] }
  0x50   :  { %114 = vperm.xlu1 %7968, %v8184_v9   ;;  %7970 = vset.pattern.permute.xlu0 %v99_v16 }
  0x51   :  { %7969 = vset.pattern.permute.xlu2 %v99_v16 }
  0x58   :  { %7971 = vset.pattern.permute.xlu1 %v99_v16  ;;  %234 = vperm.xlu0 %7970, %v8175_v6   ;;  %v6065_v16 = vld [vmem:[#allocation2 + $0x7c0] sm:$0xf] }
  0x59   :  { %215 = vperm.xlu2 %7969, %v8166_v3   ;;  %v5201_v3 = vld [vmem:[#allocation2 + $0x100] sm:$0xf]  ;;  %v6066_v18 = vor.u32 %v7625_v17, %v6065_v16 }
  0x5a   :  { %v5713_v17 = vld [vmem:[#allocation2 + $0x500] sm:$0xf] }
  0x60   :  { %139 = vperm.xlu1 %7971, %v8168_v4   ;;  %101 = vperm.xlu0 %7970, %v8186_v10   ;;  %v7409_v4 = vld [vmem:[#allocation2 + $0x10c] sm:$0xf0]  ;;  %v5329_v10 = vld [vmem:[#allocation2 + $0x200] sm:$0xf] }
  0x61   :  { %158 = vperm.xlu2 %7969, %v8177_v7   ;;  %v5202_v6 = vor.u32 %v7409_v4, %v5201_v3  ;;  %v5330_v50 = vor.u32 %v7441_v48, %v5329_v10  ;;  %v5953_v7 = vld [vmem:[#allocation2 + $0x6e0] sm:$0xf]  ;;  %v7513_v4 = vld [vmem:[#allocation2 + $0x44c] sm:$0xf0] }
  0x62   :  { %v5954_v54 = vor.u32 %v7597_v52, %v5953_v7  ;;  %v5617_v3 = vld [vmem:[#allocation2 + $0x440] sm:$0xf]  ;;  %v7613_v48 = vld [vmem:[#allocation2 + $0x76c] sm:$0xf0] }
  0x63   :  { %3843 = vmatpush.bf16.msra.mxu1 %v5202_v6  ;;  %3856 = vmatpush.bf16.msra.mxu2 %v5330_v50  ;;  %v5618_v6 = vor.u32 %v7513_v4, %v5617_v3  ;;  %v6017_v10 = vld [vmem:[#allocation2 + $0x760] sm:$0xf] }
  0x64   :  { %v6018_v49 = vor.u32 %v7613_v48, %v6017_v10  ;;  %v5745_v50 = vld [vmem:[#allocation2 + $0x540] sm:$0xf] }
  0x65   :  { %v5746_v7 = vor.u32 %v7545_v51, %v5745_v50  ;;  %v5873_v52 = vld [vmem:[#allocation2 + $0x640] sm:$0xf] }
  0x67   :  { %3888 = vmatpush.bf16.msrb.mxu1 %v5826_v53  ;;  %3901 = vmatpush.bf16.msrb.mxu2 %v5954_v54  ;;  %v7577_v53 = vld [vmem:[#allocation2 + $0x64c] sm:$0xf0] }
  0x68   :  { %177 = vperm.xlu1 %7971, %v8170_v5   ;;  %v5681_v5 = vld [vmem:[#allocation2 + $0x4c0] sm:$0xf]  ;;  %v5874_v54 = vor.u32 %v7577_v53, %v5873_v52 }
  0x69   :  { %196 = vperm.xlu2 %7969, %v8179_v8   ;;  %v5458_v8 = vor.u32 %v7473_v56, %v5457_v55  ;;  %v5682_v59 = vor.u32 %v7529_v57, %v5681_v5  ;;  %v5601_v55 = vld [vmem:[#allocation2 + $0x420] sm:$0xf]  ;;  %v7509_v56 = vld [vmem:[#allocation2 + $0x42c] sm:$0xf0] }
  0x6a   :  { %v5602_v5 = vor.u32 %v7509_v56, %v5601_v55  ;;  %v7609_v57 = vld [vmem:[#allocation2 + $0x74c] sm:$0xf0] }
  0x6b   :  { %3869 = vmatpush.bf16.msra.mxu3 %v5458_v8  ;;  %3876 = vmatpush.bf16.msrb.mxu0 %v5682_v59  ;;  %v6001_v8 = vld [vmem:[#allocation2 + $0x740] sm:$0xf]  ;;  %v7541_v59 = vld [vmem:[#allocation2 + $0x52c] sm:$0xf0] }
  0x6c   :  { %3889 = vmatpush.bf16.msrb.mxu1 %v5810_v63  ;;  %3902 = vmatpush.bf16.msrb.mxu2 %v5938_v12  ;;  %v5585_v63 = vld [vmem:[#allocation2 + $0x400] sm:$0xf] }
  0x6d   :  { %v5586_v12 = vor.u32 %v7505_v11, %v5585_v63  ;;  %v7661_v63 = vld [vmem:[#allocation2 + $0x8ec] sm:$0xf0] }
  0x6f   :  { %3877 = vmatpush.bf16.msrb.mxu0 %v5666_v15  ;;  %v5986_v15 = vor.u32 %v7605_v14, %v5985_v13 }
  0x70   :  { %120 = vperm.xlu1 %7971, %v8184_v9   ;;  %v6081_v9 = vld [vmem:[#allocation2 + $0x7e0] sm:$0xf]  ;;  %3890 = vmatpush.bf16.msrb.mxu1 %v5794_v21 }
  0x71   :  { %v6082_v60 = vor.u32 %v7629_v58, %v6081_v9  ;;  %3903 = vmatpush.bf16.msrb.mxu2 %v5922_v24  ;;  %v6002_v9 = vor.u32 %v7609_v57, %v6001_v8  ;;  %v5729_v58 = vld [vmem:[#allocation2 + $0x520] sm:$0xf] }
  0x72   :  { %v5841_v21 = vld [vmem:[#allocation2 + $0x600] sm:$0xf] }
  0x73   :  { %3914 = vmatpush.bf16.msrb.mxu3 %v6082_v60  ;;  %3878 = vmatpush.bf16.msrb.mxu0 %v5650_v26  ;;  %v5730_v60 = vor.u32 %v7541_v59, %v5729_v58  ;;  %v5842_v23 = vor.u32 %v7569_v22, %v5841_v21  ;;  %v7601_v26 = vld [vmem:[#allocation2 + $0x70c] sm:$0xf0]  ;;  %v6210_v22 = vor.u32 %v7661_v63, %v6209_v62  ;;  %v6561_v62 = vld [vmem:[#allocation2 + $0xba0] sm:$0xf] }
  0x74   :  { %3891 = vmatpush.bf16.msrb.mxu1 %v5778_v32  ;;  %v5970_v27 = vor.u32 %v7601_v26, %v5969_v1 }
  0x75   :  { %3904 = vmatpush.bf16.msrb.mxu2 %v5906_v35 }
  0x77   :  { %3915 = vmatpush.bf16.msrb.mxu3 %v6066_v18  ;;  %3879 = vmatpush.bf16.msrb.mxu0 %v5634_v38  ;;  %v7537_v18 = vld [vmem:[#allocation2 + $0x50c] sm:$0xf0] }
  0x78   :  { %3892 = vmatpush.bf16.msrb.mxu1 %v5762_v44  ;;  %v5714_v20 = vor.u32 %v7537_v18, %v5713_v17  ;;  %v6465_v17 = vld [vmem:[#allocation2 + $0xae0] sm:$0xf]  ;;  %v7725_v18 = vld [vmem:[#allocation2 + $0xaec] sm:$0xf0] }
  0x79   :  { %3905 = vmatpush.bf16.msrb.mxu2 %v5890_v47 }
  0x7b   :  { %3916 = vmatpush.bf16.msrb.mxu3 %v6050_v29  ;;  %3880 = vmatpush.bf16.msrb.mxu0 %v5618_v6  ;;  %v166_v16 = vpop.permute.xlu2 %165 }
  0x7c   :  { %3893 = vmatpush.bf16.msrb.mxu1 %v5746_v7  ;;  %vm248_vm2 = vcmp.eq.s32.totalorder %v8209_v19, %v166_v16  ;;  %v7693_v16 = vld [vmem:[#allocation2 + $0x9ec] sm:$0xf0] }
  0x7d   :  { %3906 = vmatpush.bf16.msrb.mxu2 %v5874_v54  ;;  %v5059_v40 = vsel %vm248_vm2, 1.0, %v8111_v28 }
  0x7e   :  { %v320_v47 = vpack.c.bf16 %v5059_v40, %v5059_v40 }
  0x7f   :  { %3917 = vmatpush.bf16.msrb.mxu3 %v6034_v41  ;;  %3881 = vmatpush.bf16.msrb.mxu0 %v5602_v5 }
  0x80   :  { %3894 = vmatpush.bf16.msrb.mxu1 %v5730_v60  ;;  %v332_v54 = vrot.slane %v320_v47, 4 }
  0x81   :  { %3907 = vmatpush.bf16.msrb.mxu2 %v5858_v2 }
  0x83   :  { %3918 = vmatpush.bf16.msrb.mxu3 %v6018_v49  ;;  %3882 = vmatpush.bf16.msrb.mxu0 %v5586_v12  ;;  %v185_v29 = vpop.permute.xlu2 %184  ;;  %v8113_v49 = vmov 1934713408   ;;  %v6337_v12 = vld [vmem:[#allocation2 + $0x9e0] sm:$0xf] }
  0x84   :  { %3895 = vmatpush.bf16.msrb.mxu1 %v5714_v20  ;;  %vm251_vm3 = vcmp.eq.s32.totalorder %v8209_v19, %v185_v29  ;;  %v350_v50 = vunpack.c.l.s4 %v8113_v49  ;;  %v7757_v29 = vld [vmem:[#allocation2 + $0xbec] sm:$0xf0] }
  0x85   :  { %3908 = vmatpush.bf16.msrb.mxu2 %v5842_v23  ;;  %v5062_v41 = vsel %vm251_vm3, 1.0, %v8111_v28  ;;  %v6193_v23 = vld [vmem:[#allocation2 + $0x8c0] sm:$0xf] }
  0x86   :  { %v323_v4 = vpack.c.bf16 %v5062_v41, %v5062_v41 }
  0x87   :  { %3919 = vmatpush.bf16.msrb.mxu3 %v6002_v9  ;;  %v8235_v9 = vunpack.c.0.s8 %v350_v50  ;;  %v6322_v50 = vor.u32 %v7689_v34, %v6321_v33  ;;  %v6545_v34 = vld [vmem:[#allocation2 + $0xb80] sm:$0xf] }
  0x88   :  { %v361_v55 = vrot.slane %v323_v4, 4  ;;  %v7653_v4 = vld [vmem:[#allocation2 + $0x8ac] sm:$0xf0] }
  0x8b   :  { %3920 = vmatpush.bf16.msrb.mxu3 %v5986_v15 }
  0x8f   :  { %3921 = vmatpush.bf16.msrb.mxu3 %v5970_v27 }
  0x92   :  { %v204_v24 = vpop.permute.xlu0 %203  ;;  %v128_v25 = vpop.permute.xlu1 %127 }
  0x93   :  { %vm254_vm0 = vcmp.eq.s32.totalorder %v8209_v19, %v204_v24  ;;  %vm242_vm1 = vcmp.eq.s32.totalorder %v8209_v19, %v128_v25  ;;  %v210_v46 = vpop.permute.xlu2 %209  ;;  %v7657_v24 = vld [vmem:[#allocation2 + $0x8cc] sm:$0xf0] }
  0x94   :  { %v5065_v0 = vsel %vm254_vm0, 1.0, %v8111_v28  ;;  %v5053_v35 = vsel %vm242_vm1, 1.0, %v8111_v28  ;;  %vm255_vm9 = vcmp.eq.s32.totalorder %v8209_v19, %v210_v46  ;;  %v6194_v41 = vor.u32 %v7657_v24, %v6193_v23  ;;  %v6145_v24 = vld [vmem:[#allocation2 + $0x860] sm:$0xf] }
  0x95   :  { %v326_v30 = vpack.c.bf16 %v5065_v0, %v5065_v0  ;;  %v314_v42 = vpack.c.bf16 %v5053_v35, %v5053_v35  ;;  %v6593_v0 = vld [vmem:[#allocation2 + $0xbe0] sm:$0xf] }
  0x96   :  { %v6594_v49 = vor.u32 %v7757_v29, %v6593_v0 }
  0x97   :  { %v339_v38 = vrot.slane %v326_v30, 4  ;;  %v5066_v30 = vsel %vm255_vm9, 1.0, %v8111_v28 }
  0x98   :  { %v327_v46 = vpack.c.bf16 %v5066_v30, %v5066_v30 }
  0x99   :  { %v340_v3 = vsel %vm333_vm6, %v339_v38, %v314_v42  ;;  %v6449_v38 = vld [vmem:[#allocation2 + $0xac0] sm:$0xf] }
  0x9a   :  { %v223_v31 = vpop.permute.xlu0 %222  ;;  %v147_v32 = vpop.permute.xlu1 %146  ;;  %v344_v51 = vperm.slane %v340_v3, %v8223_v45 }
  0x9b   :  { %vm257_vm4 = vcmp.eq.s32.totalorder %v8209_v19, %v223_v31  ;;  %vm245_vm5 = vcmp.eq.s32.totalorder %v8209_v19, %v147_v32  ;;  %v8241_v13 = vpop.permute.xlu2 %152  ;;  %v6338_v31 = vor.u32 %v7693_v16, %v6337_v12  ;;  %v6289_v16 = vld [vmem:[#allocation2 + $0x980] sm:$0xf] }
  0x9c   :  { %v5068_v36 = vsel %vm257_vm4, 1.0, %v8111_v28  ;;  %v5056_v37 = vsel %vm245_vm5, 1.0, %v8111_v28  ;;  %v345_v58 = vrot.slane %v344_v51, 4  ;;  %vm246_vm10 = vcmp.eq.s32.totalorder %v8209_v19, %v8241_v13 }
  0x9d   :  { %v329_v39 = vpack.c.bf16 %v5068_v36, %v5068_v36  ;;  %v317_v44 = vpack.c.bf16 %v5056_v37, %v5056_v37  ;;  %v6466_v37 = vor.u32 %v7725_v18, %v6465_v17 }
  0x9f   :  { %v367_v43 = vrot.slane %v329_v39, 4  ;;  %v7721_v39 = vld [vmem:[#allocation2 + $0xacc] sm:$0xf0] }
  0xa1   :  { %v368_v6 = vsel %vm333_vm6, %v367_v43, %v317_v44  ;;  %v6177_v43 = vld [vmem:[#allocation2 + $0x8a0] sm:$0xf] }
  0xa2   :  { %v109_v10 = vpop.permute.xlu1 %108  ;;  %v90_v48 = vpop.permute.xlu0 %89  ;;  %v372_v7 = vperm.slane %v368_v6, %v8223_v45  ;;  %v6577_v6 = vld [vmem:[#allocation2 + $0xbc0] sm:$0xf] }
  0xa3   :  { %vm239_vm7 = vcmp.eq.s32.totalorder %v8209_v19, %v109_v10  ;;  %vm236_vm8 = vcmp.eq.s32.totalorder %v8209_v19, %v90_v48 }
  0xa4   :  { %v5050_v52 = vsel %vm239_vm7, 1.0, %v8111_v28  ;;  %v5047_v53 = vsel %vm236_vm8, 1.0, %v8111_v28  ;;  %v373_v59 = vrot.slane %v372_v7, 4 }
  0xa5   :  { %v311_v56 = vpack.c.bf16 %v5050_v52, %v5050_v52  ;;  %v308_v5 = vpack.c.bf16 %v5047_v53, %v5047_v53  ;;  %v6450_v52 = vor.u32 %v7721_v39, %v6449_v38  ;;  %v7753_v53 = vld [vmem:[#allocation2 + $0xbcc] sm:$0xf0] }
  0xa6   :  { %v6578_v17 = vor.u32 %v7753_v53, %v6577_v6  ;;  %v7745_v39 = vld [vmem:[#allocation2 + $0xb8c] sm:$0xf0] }
  0xa7   :  { %v362_v8 = vsel %vm333_vm6, %v361_v55, %v311_v56  ;;  %v334_v57 = vsel %vm333_vm6, %v332_v54, %v308_v5  ;;  %v7685_v54 = vld [vmem:[#allocation2 + $0x9ac] sm:$0xf0]  ;;  %v6433_v5 = vld [vmem:[#allocation2 + $0xaa0] sm:$0xf]  ;;  %v6546_v53 = vor.u32 %v7745_v39, %v6545_v34 }
  0xa8   :  { %v366_v60 = vperm.slane %v362_v8, %v8223_v45  ;;  %v338_v61 = vperm.slane %v334_v57, %v8223_v45  ;;  %v6161_v8 = vld [vmem:[#allocation2 + $0x880] sm:$0xf]  ;;  %v7701_v39 = vld [vmem:[#allocation2 + $0xa2c] sm:$0xf0] }
  0xaa   :  { %v374_v2 = vsel %vm333_vm6, %v373_v59, %v366_v60  ;;  %v346_v11 = vsel %vm333_vm6, %v345_v58, %v338_v61  ;;  %v375_v20 = vrot.slane %v366_v60, 4  ;;  %v347_v21 = vrot.slane %v338_v61, 4  ;;  %v7649_v61 = vld [vmem:[#allocation2 + $0x88c] sm:$0xf0] }
  0xab   :  { %v352_v14 = vperm.slane %v346_v11, %v8235_v9  ;;  %v380_v15 = vperm.slane %v374_v2, %v8235_v9  ;;  %v6178_v59 = vor.u32 %v7653_v4, %v6177_v43  ;;  %v191_v2 = vpop.permute.xlu2 %190  ;;  %v395_v11 = vrot.slane %v327_v46, 4  ;;  %v7677_v46 = vld [vmem:[#allocation2 + $0x96c] sm:$0xf0] }
  0xac   :  { %v348_v44 = vsel %vm333_vm6, %v344_v51, %v347_v21  ;;  %v376_v10 = vsel %vm333_vm6, %v372_v7, %v375_v20  ;;  %v6305_v51 = vld [vmem:[#allocation2 + $0x9a0] sm:$0xf]  ;;  %v7717_v7 = vld [vmem:[#allocation2 + $0xaac] sm:$0xf0]  ;;  %vm252_vm13 = vcmp.eq.s32.totalorder %v8209_v19, %v191_v2 }
  0xad   :  { %v8246_v25 = vpack.i.b16 %v380_v15, %v352_v14  ;;  %v485_v1 = vshrl.u32 %v352_v14, 16  ;;  %v486_v26 = vshrl.u32 %v380_v15, 16  ;;  %v357_v27 = vrot.slane %v352_v14, 4  ;;  %v7681_v20 = vld [vmem:[#allocation2 + $0x98c] sm:$0xf0] }
  0xae   :  { %v385_v32 = vrot.slane %v380_v15, 4  ;;  %v8267_v57 = vperm.slane %v348_v44, %v8235_v9  ;;  %v8272_v63 = vperm.slane %v376_v10, %v8235_v9  ;;  %v8279_v14 = vsel %vm246_vm10, 1.0, %v8111_v28  ;;  %v7749_v15 = vld [vmem:[#allocation2 + $0xbac] sm:$0xf0]  ;;  %v6417_v21 = vld [vmem:[#allocation2 + $0xa80] sm:$0xf] }
  0xaf   :  { %3831 = vmatmul.bf16.vlgmr.msra.gmra.mxu0 %v8246_v25  ;;  %v8250_v35 = vpack.i.b16 %v486_v26, %v485_v1  ;;  %v358_v36 = vsel %vm333_vm6, 0, %v357_v27  ;;  %v6306_v18 = vor.u32 %v7685_v54, %v6305_v51  ;;  %v7645_v1 = vld [vmem:[#allocation2 + $0x86c] sm:$0xf0]  ;;  %v6434_v13 = vor.u32 %v7717_v7, %v6433_v5  ;;  %v6273_v44 = vld [vmem:[#allocation2 + $0x960] sm:$0xf] }
  0xb0   :  { %3927 = vmatpush.bf16.msra.mxu0 %v6210_v22  ;;  %v386_v40 = vsel %vm333_vm6, 0, %v385_v32  ;;  %v493_v42 = vshrl.u32 %v358_v36, 16  ;;  %v7713_v22 = vld [vmem:[#allocation2 + $0xa8c] sm:$0xf0]  ;;  %v359_v26 = vrot.slane %v8267_v57, 4  ;;  %v6162_v27 = vor.u32 %v7649_v61, %v6161_v8 }
  0xb1   :  { %3844 = vmatmul.bf16.vlgmr.msra.gmra.mxu1 %v8250_v35  ;;  %v8256_v47 = vpack.i.b16 %v386_v40, %v358_v36  ;;  %v494_v3 = vshrl.u32 %v386_v40, 16  ;;  %v6562_v0 = vor.u32 %v7749_v15, %v6561_v62  ;;  %v387_v29 = vrot.slane %v8272_v63, 4  ;;  %v7709_v51 = vld [vmem:[#allocation2 + $0xa6c] sm:$0xf0]  ;;  %v6257_v61 = vld [vmem:[#allocation2 + $0x940] sm:$0xf] }
  0xb2   :  { %3940 = vmatpush.bf16.msra.mxu1 %v6338_v31  ;;  %v134_v48 = vpop.permute.xlu1 %133  ;;  %v229_v55 = vpop.permute.xlu0 %228  ;;  %v318_v31 = vpack.c.bf16 %v8279_v14, %v8279_v14  ;;  %v6290_v32 = vor.u32 %v7681_v20, %v6289_v16  ;;  %v6418_v33 = vor.u32 %v7713_v22, %v6417_v21  ;;  %v5063_v38 = vsel %vm252_vm13, 1.0, %v8111_v28  ;;  %v7641_v5 = vld [vmem:[#allocation2 + $0x84c] sm:$0xf0]  ;;  %v6385_v16 = vld [vmem:[#allocation2 + $0xa40] sm:$0xf] }
  0xb3   :  { %vm243_vm11 = vcmp.eq.s32.totalorder %v8209_v19, %v134_v48  ;;  %3857 = vmatmul.bf16.vlgmr.msra.gmra.mxu2 %v8256_v47  ;;  %v8263_v56 = vpack.i.b16 %v494_v3, %v493_v42  ;;  %vm258_vm12 = vcmp.eq.s32.totalorder %v8209_v19, %v229_v55  ;;  %v501_v40 = vshrl.u32 %v8267_v57, 16  ;;  %v6401_v48 = vld [vmem:[#allocation2 + $0xa60] sm:$0xf]  ;;  %v7705_v21 = vld [vmem:[#allocation2 + $0xa4c] sm:$0xf0] }
  0xb4   :  { %v5054_v58 = vsel %vm243_vm11, 1.0, %v8111_v28  ;;  %3953 = vmatpush.bf16.msra.mxu2 %v6466_v37  ;;  %3928 = vmatpush.bf16.msra.mxu0 %v6194_v41  ;;  %v5069_v60 = vsel %vm258_vm12, 1.0, %v8111_v28  ;;  %v6146_v37 = vor.u32 %v7645_v1, %v6145_v24  ;;  %v502_v41 = vshrl.u32 %v8272_v63, 16  ;;  %v6129_v55 = vld [vmem:[#allocation2 + $0x840] sm:$0xf] }
  0xb5   :  { %v315_v12 = vpack.c.bf16 %v5054_v58, %v5054_v58  ;;  %3870 = vmatmul.bf16.vlgmr.msra.gmra.mxu3 %v8263_v56  ;;  %v330_v23 = vpack.c.bf16 %v5069_v60, %v5069_v60  ;;  %v360_v3 = vsel %vm333_vm6, 0, %v359_v26  ;;  %v388_v10 = vsel %vm333_vm6, 0, %v387_v29  ;;  %v7741_v60 = vld [vmem:[#allocation2 + $0xb6c] sm:$0xf0]  ;;  %v6113_v22 = vld [vmem:[#allocation2 + $0x820] sm:$0xf] }
  0xb6   :  { %3966 = vmatpush.bf16.msra.mxu3 %v6594_v49  ;;  %3941 = vmatpush.bf16.msra.mxu1 %v6322_v50  ;;  %v324_v7 = vpack.c.bf16 %v5063_v38, %v5063_v38  ;;  %v8305_v8 = vpack.i.b16 %v502_v41, %v501_v40  ;;  %v6274_v58 = vor.u32 %v7677_v46, %v6273_v44  ;;  %v7737_v29 = vld [vmem:[#allocation2 + $0xb4c] sm:$0xf0]  ;;  %v6097_v40 = vld [vmem:[#allocation2 + $0x800] sm:$0xf] }
  0xb7   :  { %v396_v30 = vsel %vm333_vm6, %v395_v11, %v315_v12  ;;  %v423_v43 = vrot.slane %v330_v23, 4  ;;  %v7673_v11 = vld [vmem:[#allocation2 + $0x94c] sm:$0xf0]  ;;  %v6402_v14 = vor.u32 %v7709_v51, %v6401_v48  ;;  %v6130_v15 = vor.u32 %v7641_v5, %v6129_v55  ;;  %v6721_v48 = vld [vmem:[#allocation2 + $0xce0] sm:$0xf] }
  0xb8   :  { %3954 = vmatpush.bf16.msra.mxu2 %v6450_v52  ;;  %3929 = vmatpush.bf16.msra.mxu0 %v6178_v59  ;;  %v8296_v4 = vperm.slane %v396_v30, %v8223_v45  ;;  %v8303_v52 = vpack.i.b16 %v8272_v63, %v8267_v57  ;;  %v6529_v59 = vld [vmem:[#allocation2 + $0xb60] sm:$0xf]  ;;  %v509_v57 = vshrl.u32 %v360_v3, 16  ;;  %v510_v63 = vshrl.u32 %v388_v10, 16  ;;  %v7637_v23 = vld [vmem:[#allocation2 + $0x82c] sm:$0xf0] }
  0xb9   :  { %v424_v2 = vsel %vm333_vm6, %v423_v43, %v318_v31  ;;  %v6530_v20 = vor.u32 %v7741_v60, %v6529_v59  ;;  %v417_v1 = vrot.slane %v324_v7, 4  ;;  %v6241_v31 = vld [vmem:[#allocation2 + $0x920] sm:$0xf]  ;;  %v6114_v38 = vor.u32 %v7637_v23, %v6113_v22  ;;  %v7733_v44 = vld [vmem:[#allocation2 + $0xb2c] sm:$0xf0] }
  0xba   :  { %3967 = vmatpush.bf16.msra.mxu3 %v6578_v17  ;;  %3942 = vmatpush.bf16.msra.mxu1 %v6306_v18  ;;  %v172_v36 = vpop.permute.xlu1 %171  ;;  %v96_v42 = vpop.permute.xlu0 %95  ;;  %v401_v12 = vrot.slane %v8296_v4, 4  ;;  %v8311_v17 = vpack.i.b16 %v388_v10, %v360_v3  ;;  %v8315_v24 = vperm.slane %v424_v2, %v8223_v45  ;;  %v8322_v30 = vpack.i.b16 %v510_v63, %v509_v57  ;;  %v6497_v43 = vld [vmem:[#allocation2 + $0xb20] sm:$0xf]  ;;  %v7665_v51 = vld [vmem:[#allocation2 + $0x90c] sm:$0xf0] }
  0xbb   :  { %vm249_vm14 = vcmp.eq.s32.totalorder %v8209_v19, %v172_v36  ;;  %vm237_vm15 = vcmp.eq.s32.totalorder %v8209_v19, %v96_v42  ;;  %v7633_v42 = vld [vmem:[#allocation2 + $0x80c] sm:$0xf0]  ;;  %v6849_v59 = vld [vmem:[#allocation2 + $0xde0] sm:$0xf] }
  0xbc   :  { %v5060_v6 = vsel %vm249_vm14, 1.0, %v8111_v28  ;;  %3955 = vmatpush.bf16.msra.mxu2 %v6434_v13  ;;  %3930 = vmatpush.bf16.msra.mxu0 %v6162_v27  ;;  %v5048_v49 = vsel %vm237_vm15, 1.0, %v8111_v28  ;;  %v6258_v27 = vor.u32 %v7673_v11, %v6257_v61  ;;  %v429_v3 = vrot.slane %v8315_v24, 4  ;;  %v7821_v60 = vld [vmem:[#allocation2 + $0xdec] sm:$0xf0] }
  0xbd   :  { %v321_v50 = vpack.c.bf16 %v5060_v6, %v5060_v6  ;;  %v309_v54 = vpack.c.bf16 %v5048_v49, %v5048_v49  ;;  %v7789_v49 = vld [vmem:[#allocation2 + $0xcec] sm:$0xf0]  ;;  %v6098_v7 = vor.u32 %v7633_v42, %v6097_v40  ;;  %v6977_v2 = vld [vmem:[#allocation2 + $0xee0] sm:$0xf]  ;;  %v6498_v11 = vor.u32 %v7733_v44, %v6497_v43 }
  0xbe   :  { %3968 = vmatpush.bf16.msra.mxu3 %v6562_v0  ;;  %3943 = vmatpush.bf16.msra.mxu1 %v6290_v32  ;;  %v6513_v0 = vld [vmem:[#allocation2 + $0xb40] sm:$0xf]  ;;  %v7669_v32 = vld [vmem:[#allocation2 + $0x92c] sm:$0xf0]  ;;  %v6722_v61 = vor.u32 %v7789_v49, %v6721_v48 }
  0xbf   :  { %v389_v62 = vrot.slane %v321_v50, 4  ;;  %3883 = vmatmul.bf16.vlgmr.msrb.gmra.mxu0 %v8303_v52  ;;  %v6514_v6 = vor.u32 %v7737_v29, %v6513_v0  ;;  %v6242_v10 = vor.u32 %v7669_v32, %v6241_v31  ;;  %v7853_v57 = vld [vmem:[#allocation2 + $0xeec] sm:$0xf0]  ;;  %v6689_v44 = vld [vmem:[#allocation2 + $0xca0] sm:$0xf] }
  0xc0   :  { %3956 = vmatpush.bf16.msra.mxu2 %v6418_v33  ;;  %3931 = vmatpush.bf16.msra.mxu0 %v6146_v37  ;;  %v6369_v33 = vld [vmem:[#allocation2 + $0xa20] sm:$0xf]  ;;  %v6386_v37 = vor.u32 %v7705_v21, %v6385_v16  ;;  %v6850_v16 = vor.u32 %v7821_v60, %v6849_v59  ;;  %v7729_v21 = vld [vmem:[#allocation2 + $0xb0c] sm:$0xf0] }
  0xc1   :  { %3896 = vmatmul.bf16.vlgmr.msrb.gmra.mxu1 %v8305_v8  ;;  %v390_v18 = vsel %vm333_vm6, %v389_v62, %v309_v54  ;;  %v6370_v5 = vor.u32 %v7701_v39, %v6369_v33  ;;  %v7697_v62 = vld [vmem:[#allocation2 + $0xa0c] sm:$0xf0]  ;;  %v7089_v48 = vld [vmem:[#allocation2 + $0xfc0] sm:$0xf] }
  0xc2   :  { %3969 = vmatpush.bf16.msra.mxu3 %v6546_v53  ;;  %3944 = vmatpush.bf16.msra.mxu1 %v6274_v58  ;;  %v115_v26 = vpop.permute.xlu1 %114  ;;  %v8318_v13 = vperm.slane %v390_v18, %v8223_v45  ;;  %v6225_v53 = vld [vmem:[#allocation2 + $0x900] sm:$0xf]  ;;  %v7885_v0 = vld [vmem:[#allocation2 + $0xfec] sm:$0xf0] }
  0xc3   :  { %vm240_vm0 = vcmp.eq.s32.totalorder %v8209_v19, %v115_v26  ;;  %3909 = vmatmul.bf16.vlgmr.msrb.gmra.mxu2 %v8311_v17  ;;  %v6353_v58 = vld [vmem:[#allocation2 + $0xa00] sm:$0xf]  ;;  %v6978_v26 = vor.u32 %v7853_v57, %v6977_v2  ;;  %v7849_v39 = vld [vmem:[#allocation2 + $0xecc] sm:$0xf0] }
  0xc4   :  { %v5051_v34 = vsel %vm240_vm0, 1.0, %v8111_v28  ;;  %3957 = vmatpush.bf16.msra.mxu2 %v6402_v14  ;;  %v402_v36 = vsel %vm333_vm6, %v401_v12, %v8318_v13  ;;  %3932 = vmatpush.bf16.msra.mxu0 %v6130_v15  ;;  %v6226_v12 = vor.u32 %v7665_v51, %v6225_v53  ;;  %v6705_v14 = vld [vmem:[#allocation2 + $0xcc0] sm:$0xf]  ;;  %v7785_v15 = vld [vmem:[#allocation2 + $0xccc] sm:$0xf0] }
  0xc5   :  { %v312_v41 = vpack.c.bf16 %v5051_v34, %v5051_v34  ;;  %3922 = vmatmul.bf16.vlgmr.msrb.gmra.mxu3 %v8322_v30  ;;  %v408_v46 = vperm.slane %v402_v36, %v8235_v9  ;;  %v6706_v31 = vor.u32 %v7785_v15, %v6705_v14  ;;  %v6833_v34 = vld [vmem:[#allocation2 + $0xdc0] sm:$0xf]  ;;  %v7817_v36 = vld [vmem:[#allocation2 + $0xdcc] sm:$0xf0] }
  0xc6   :  { %3970 = vmatpush.bf16.msra.mxu3 %v6530_v20  ;;  %3945 = vmatpush.bf16.msra.mxu1 %v6258_v27  ;;  %v6481_v20 = vld [vmem:[#allocation2 + $0xb00] sm:$0xf]  ;;  %v7881_v49 = vld [vmem:[#allocation2 + $0xfcc] sm:$0xf0] }
  0xc7   :  { %v418_v50 = vsel %vm333_vm6, %v417_v1, %v312_v41  ;;  %v413_v54 = vrot.slane %v408_v46, 4  ;;  %v517_v22 = vshrl.u32 %v408_v46, 16  ;;  %v6354_v1 = vor.u32 %v7697_v62, %v6353_v58  ;;  %v7105_v27 = vld [vmem:[#allocation2 + $0xfe0] sm:$0xf]  ;;  %v7813_v51 = vld [vmem:[#allocation2 + $0xdac] sm:$0xf0] }
  0xc8   :  { %v8332_v55 = vperm.slane %v418_v50, %v8223_v45  ;;  %3958 = vmatpush.bf16.msra.mxu2 %v6386_v37  ;;  %3933 = vmatpush.bf16.msra.mxu0 %v6114_v38  ;;  %v6482_v37 = vor.u32 %v7729_v21, %v6481_v20  ;;  %v6961_v38 = vld [vmem:[#allocation2 + $0xec0] sm:$0xf]  ;;  %v7106_v42 = vor.u32 %v7885_v0, %v7105_v27  ;;  %v7845_v58 = vld [vmem:[#allocation2 + $0xeac] sm:$0xf0] }
  0xc9   :  { %v414_v23 = vsel %vm333_vm6, 0, %v413_v54  ;;  %v6962_v50 = vor.u32 %v7849_v39, %v6961_v38  ;;  %v6817_v53 = vld [vmem:[#allocation2 + $0xda0] sm:$0xf]  ;;  %v7090_v59 = vor.u32 %v7881_v49, %v7089_v48  ;;  %v7877_v57 = vld [vmem:[#allocation2 + $0xfac] sm:$0xf0] }
  0xca   :  { %v430_v63 = vsel %vm333_vm6, %v429_v3, %v8332_v55  ;;  %3971 = vmatpush.bf16.msra.mxu3 %v6514_v6  ;;  %3946 = vmatpush.bf16.msra.mxu1 %v6242_v10  ;;  %v525_v40 = vshrl.u32 %v414_v23, 16  ;;  %v6834_v6 = vor.u32 %v7817_v36, %v6833_v34  ;;  %v6673_v60 = vld [vmem:[#allocation2 + $0xc80] sm:$0xf]  ;;  %v6818_v62 = vor.u32 %v7813_v51, %v6817_v53  ;;  %v7809_v14 = vld [vmem:[#allocation2 + $0xd8c] sm:$0xf0] }
  0xcb   :  { %v436_v18 = vperm.slane %v430_v63, %v8235_v9  ;;  %v7073_v2 = vld [vmem:[#allocation2 + $0xfa0] sm:$0xf]  ;;  %v8350_v63 = vpop.permute.xlu2 %215  ;;  %v403_v34 = vrot.slane %v8318_v13, 4  ;;  %v7837_v38 = vld [vmem:[#allocation2 + $0xe6c] sm:$0xf0] }
  0xcc   :  { %3959 = vmatpush.bf16.msra.mxu2 %v6370_v5  ;;  %3934 = vmatpush.bf16.msra.mxu0 %v6098_v7  ;;  %v6945_v7 = vld [vmem:[#allocation2 + $0xea0] sm:$0xf]  ;;  %v7074_v20 = vor.u32 %v7877_v57, %v7073_v2  ;;  %v7801_v48 = vld [vmem:[#allocation2 + $0xd4c] sm:$0xf0]  ;;  %vm256_vm1 = vcmp.eq.s32.totalorder %v8209_v19, %v8350_v63 }
  0xcd   :  { %v8338_v29 = vpack.i.b16 %v436_v18, %v408_v46  ;;  %v518_v32 = vshrl.u32 %v436_v18, 16  ;;  %v441_v33 = vrot.slane %v436_v18, 4  ;;  %v7781_v46 = vld [vmem:[#allocation2 + $0xcac] sm:$0xf0]  ;;  %v6657_v21 = vld [vmem:[#allocation2 + $0xc60] sm:$0xf]  ;;  %v404_v53 = vsel %vm333_vm6, %v8296_v4, %v403_v34 }
  0xce   :  { %3972 = vmatpush.bf16.msra.mxu3 %v6498_v11  ;;  %3947 = vmatpush.bf16.msra.mxu1 %v6226_v12  ;;  %v6690_v5 = vor.u32 %v7781_v46, %v6689_v44  ;;  %v6946_v11 = vor.u32 %v7845_v58, %v6945_v7  ;;  %v6801_v12 = vld [vmem:[#allocation2 + $0xd80] sm:$0xf]  ;;  %v7841_v18 = vld [vmem:[#allocation2 + $0xe8c] sm:$0xf0] }
  0xcf   :  { %3935 = vmatmul.bf16.vlgmr.msra.gmra.mxu0 %v8338_v29  ;;  %v8341_v41 = vpack.i.b16 %v518_v32, %v517_v22  ;;  %v442_v43 = vsel %vm333_vm6, 0, %v441_v33  ;;  %v7773_v22 = vld [vmem:[#allocation2 + $0xc6c] sm:$0xf0]  ;;  %v431_v33 = vrot.slane %v8332_v55, 4  ;;  %v7041_v44 = vld [vmem:[#allocation2 + $0xf60] sm:$0xf] }
  0xd0   :  { %3979 = vmatpush.bf16.msrb.mxu0 %v6722_v61  ;;  %3960 = vmatpush.bf16.msra.mxu2 %v6354_v1  ;;  %v8344_v3 = vpack.i.b16 %v442_v43, %v414_v23  ;;  %v526_v10 = vshrl.u32 %v442_v43, 16  ;;  %v7777_v61 = vld [vmem:[#allocation2 + $0xc8c] sm:$0xf0]  ;;  %v6802_v23 = vor.u32 %v7809_v14, %v6801_v12  ;;  %v7057_v1 = vld [vmem:[#allocation2 + $0xf80] sm:$0xf]  ;;  %v6658_v36 = vor.u32 %v7773_v22, %v6657_v21 }
  0xd1   :  { %3948 = vmatmul.bf16.vlgmr.msra.gmra.mxu1 %v8341_v41  ;;  %v6674_v15 = vor.u32 %v7777_v61, %v6673_v60  ;;  %v7805_v32 = vld [vmem:[#allocation2 + $0xd6c] sm:$0xf0]  ;;  %v6897_v49 = vld [vmem:[#allocation2 + $0xe40] sm:$0xf]  ;;  %v432_v51 = vsel %vm333_vm6, %v8315_v24, %v431_v33  ;;  %v8366_v14 = vperm.slane %v404_v53, %v8235_v9 }
  0xd2   :  { %3992 = vmatpush.bf16.msrb.mxu1 %v6850_v16  ;;  %3973 = vmatpush.bf16.msra.mxu3 %v6482_v37  ;;  %v8347_v54 = vpack.i.b16 %v526_v10, %v525_v40  ;;  %v6929_v16 = vld [vmem:[#allocation2 + $0xe80] sm:$0xf]  ;;  %v8353_v27 = vpop.permute.xlu1 %139  ;;  %v7869_v46 = vld [vmem:[#allocation2 + $0xf6c] sm:$0xf0] }
  0xd3   :  { %3961 = vmatmul.bf16.vlgmr.msra.gmra.mxu2 %v8344_v3  ;;  %v6930_v0 = vor.u32 %v7841_v18, %v6929_v16  ;;  %v6913_v37 = vld [vmem:[#allocation2 + $0xe60] sm:$0xf]  ;;  %v7833_v13 = vld [vmem:[#allocation2 + $0xe4c] sm:$0xf0]  ;;  %v7042_v7 = vor.u32 %v7869_v46, %v7041_v44  ;;  %v7435_v44 = vld [vmem:[#allocation2 + $0x1e4] sm:$0xf]  ;;  %vm244_vm3 = vcmp.eq.s32.totalorder %v8209_v19, %v8353_v27 }
  0xd4   :  { %4005 = vmatpush.bf16.msrb.mxu2 %v6978_v26  ;;  %3980 = vmatpush.bf16.msrb.mxu0 %v6706_v31  ;;  %v7873_v26 = vld [vmem:[#allocation2 + $0xf8c] sm:$0xf0]  ;;  %v6785_v31 = vld [vmem:[#allocation2 + $0xd60] sm:$0xf]  ;;  %v6898_v4 = vor.u32 %v7833_v13, %v6897_v49  ;;  %v533_v63 = vshrl.u32 %v8366_v14, 16 }
  0xd5   :  { %3974 = vmatmul.bf16.vlgmr.msra.gmra.mxu3 %v8347_v54  ;;  %v7058_v39 = vor.u32 %v7873_v26, %v7057_v1  ;;  %v6641_v40 = vld [vmem:[#allocation2 + $0xc40] sm:$0xf]  ;;  %v6786_v43 = vor.u32 %v7805_v32, %v6785_v31  ;;  %v7765_v58 = vld [vmem:[#allocation2 + $0xc2c] sm:$0xf0]  ;;  %v5067_v26 = vsel %vm256_vm1, 1.0, %v8111_v28 }
  0xd6   :  { %4018 = vmatpush.bf16.msrb.mxu3 %v7106_v42  ;;  %3993 = vmatpush.bf16.msrb.mxu1 %v6834_v6  ;;  %v7769_v42 = vld [vmem:[#allocation2 + $0xc4c] sm:$0xf0]  ;;  %v6914_v6 = vor.u32 %v7837_v38, %v6913_v37  ;;  %v6769_v10 = vld [vmem:[#allocation2 + $0xd40] sm:$0xf]  ;;  %v7403_v38 = vld [vmem:[#allocation2 + $0xe4] sm:$0xf]  ;;  %v328_v46 = vpack.c.bf16 %v5067_v26, %v5067_v26 }
  0xd7   :  { %v6642_v55 = vor.u32 %v7769_v42, %v6641_v40  ;;  %v7865_v60 = vld [vmem:[#allocation2 + $0xf4c] sm:$0xf0]  ;;  %v6770_v61 = vor.u32 %v7801_v48, %v6769_v10  ;;  %v6881_v57 = vld [vmem:[#allocation2 + $0xe20] sm:$0xf]  ;;  %v415_v40 = vrot.slane %v8366_v14, 4 }
  0xd8   :  { %4006 = vmatpush.bf16.msrb.mxu2 %v6962_v50  ;;  %3981 = vmatpush.bf16.msrb.mxu0 %v6690_v5  ;;  %v6625_v50 = vld [vmem:[#allocation2 + $0xc20] sm:$0xf]  ;;  %v8361_v5 = vpop.permute.xlu2 %158  ;;  %v7797_v2 = vld [vmem:[#allocation2 + $0xd2c] sm:$0xf0]  ;;  %v5315_v48 = vld [vmem:[#allocation2 + $0x1f0] sm:$0xf0] }
  0xd9   :  { %v6609_v12 = vld [vmem:[#allocation2 + $0xc00] sm:$0xf]  ;;  %v7761_v24 = vld [vmem:[#allocation2 + $0xc0c] sm:$0xf0]  ;;  %v6626_v16 = vor.u32 %v7765_v58, %v6625_v50  ;;  %vm247_vm4 = vcmp.eq.s32.totalorder %v8209_v19, %v8361_v5 }
  0xda   :  { %4019 = vmatpush.bf16.msrb.mxu3 %v7090_v59  ;;  %3994 = vmatpush.bf16.msrb.mxu1 %v6818_v62  ;;  %v7025_v59 = vld [vmem:[#allocation2 + $0xf40] sm:$0xf]  ;;  %v8371_v22 = vpop.permute.xlu1 %177  ;;  %v7793_v33 = vld [vmem:[#allocation2 + $0xd0c] sm:$0xf0] }
  0xdb   :  { %v6753_v62 = vld [vmem:[#allocation2 + $0xd20] sm:$0xf]  ;;  %v7026_v1 = vor.u32 %v7865_v60, %v7025_v59  ;;  %v7857_v49 = vld [vmem:[#allocation2 + $0xf0c] sm:$0xf0]  ;;  %v416_v60 = vsel %vm333_vm6, 0, %v415_v40  ;;  %vm250_vm5 = vcmp.eq.s32.totalorder %v8209_v19, %v8371_v22 }
  0xdc   :  { %4007 = vmatpush.bf16.msrb.mxu2 %v6946_v11  ;;  %3982 = vmatpush.bf16.msrb.mxu0 %v6674_v15  ;;  %v7829_v11 = vld [vmem:[#allocation2 + $0xe2c] sm:$0xf0]  ;;  %v8369_v15 = vperm.slane %v432_v51, %v8235_v9  ;;  %v7009_v18 = vld [vmem:[#allocation2 + $0xf20] sm:$0xf]  ;;  %v6754_v32 = vor.u32 %v7797_v2, %v6753_v62  ;;  %v7467_v62 = vld [vmem:[#allocation2 + $0x2e4] sm:$0xf] }
  0xdd   :  { %v7233_v21 = vld [vmem:[#allocation2 + $0x10e0] sm:$0xf]  ;;  %v6882_v37 = vor.u32 %v7829_v11, %v6881_v57  ;;  %v7913_v58 = vld [vmem:[#allocation2 + $0x10cc] sm:$0xf0]  ;;  %v7463_v40 = vld [vmem:[#allocation2 + $0x2c4] sm:$0xf] }
  0xde   :  { %4020 = vmatpush.bf16.msrb.mxu3 %v7074_v20  ;;  %3995 = vmatpush.bf16.msrb.mxu1 %v6802_v23  ;;  %v7861_v20 = vld [vmem:[#allocation2 + $0xf2c] sm:$0xf0]  ;;  %v235_v23 = vpop.permute.xlu0 %234  ;;  %v6737_v31 = vld [vmem:[#allocation2 + $0xd00] sm:$0xf]  ;;  %v443_v42 = vrot.slane %v8369_v15, 4  ;;  %v534_v51 = vshrl.u32 %v8369_v15, 16  ;;  %v8391_v57 = vpack.i.b16 %v8369_v15, %v8366_v14 }
  0xdf   :  { %v6865_v34 = vld [vmem:[#allocation2 + $0xe00] sm:$0xf]  ;;  %vm259_vm2 = vcmp.eq.s32.totalorder %v8209_v19, %v235_v23  ;;  %v6738_v13 = vor.u32 %v7793_v33, %v6737_v31  ;;  %v5299_v23 = vld [vmem:[#allocation2 + $0x1d0] sm:$0xf0]  ;;  %v5055_v14 = vsel %vm244_vm3, 1.0, %v8111_v28  ;;  %v541_v15 = vshrl.u32 %v416_v60, 16 }
  0xe0   :  { %4008 = vmatpush.bf16.msrb.mxu2 %v6930_v0  ;;  %3983 = vmatpush.bf16.msrb.mxu0 %v6658_v36  ;;  %v7917_v0 = vld [vmem:[#allocation2 + $0x10ec] sm:$0xf0]  ;;  %v197_v59 = vpop.permute.xlu2 %196  ;;  %v5070_v2 = vsel %vm259_vm2, 1.0, %v8111_v28  ;;  %v316_v5 = vpack.c.bf16 %v5055_v14, %v5055_v14 }
  0xe1   :  { %v7825_v36 = vld [vmem:[#allocation2 + $0xe0c] sm:$0xf0]  ;;  %v7234_v10 = vor.u32 %v7917_v0, %v7233_v21  ;;  %v7431_v21 = vld [vmem:[#allocation2 + $0x1c4] sm:$0xf]  ;;  %vm253_vm7 = vcmp.eq.s32.totalorder %v8209_v19, %v197_v59  ;;  %v331_v26 = vpack.c.bf16 %v5070_v2, %v5070_v2 }
  0xe2   :  { %4021 = vmatpush.bf16.msrb.mxu3 %v7058_v39  ;;  %3996 = vmatpush.bf16.msrb.mxu1 %v6786_v43  ;;  %v5187_v39 = vld [vmem:[#allocation2 + $0xf0] sm:$0xf0]  ;;  %v6610_v43 = vor.u32 %v7761_v24, %v6609_v12  ;;  %v6866_v50 = vor.u32 %v7825_v36, %v6865_v34  ;;  %v7399_v24 = vld [vmem:[#allocation2 + $0xc4] sm:$0xf]  ;;  %v121_v0 = vpop.permute.xlu1 %120  ;;  %v5058_v36 = vsel %vm247_vm4, 1.0, %v8111_v28 }
  0xe3   :  { %v5190_v53 = vor.u32 %v7403_v38, %v5187_v39  ;;  %v5443_v12 = vld [vmem:[#allocation2 + $0x2f0] sm:$0xf0]  ;;  %v7909_v27 = vld [vmem:[#allocation2 + $0x10ac] sm:$0xf0]  ;;  %v5302_v39 = vor.u32 %v7431_v21, %v5299_v23  ;;  %vm241_vm8 = vcmp.eq.s32.totalorder %v8209_v19, %v121_v0  ;;  %v7423_v21 = vld [vmem:[#allocation2 + $0x184] sm:$0xf] }
  0xe4   :  { %4009 = vmatpush.bf16.msrb.mxu2 %v6914_v6  ;;  %3984 = vmatpush.bf16.msrb.mxu0 %v6642_v55  ;;  %v7010_v6 = vor.u32 %v7861_v20, %v7009_v18  ;;  %v6993_v55 = vld [vmem:[#allocation2 + $0xf00] sm:$0xf]  ;;  %v8395_v18 = vrot.slane %v328_v46, 4  ;;  %v5446_v33 = vor.u32 %v7467_v62, %v5443_v12  ;;  %v5155_v46 = vld [vmem:[#allocation2 + $0xb0] sm:$0xf0] }
  0xe5   :  { %v6994_v11 = vor.u32 %v7857_v49, %v6993_v55  ;;  %v469_v55 = vrot.slane %v331_v26, 4  ;;  %v5283_v49 = vld [vmem:[#allocation2 + $0x1b0] sm:$0xf0] }
  0xe6   :  { %4022 = vmatpush.bf16.msrb.mxu3 %v7042_v7  ;;  %3997 = vmatpush.bf16.msrb.mxu1 %v6770_v61  ;;  %v7217_v7 = vld [vmem:[#allocation2 + $0x10c0] sm:$0xf]  ;;  %v444_v61 = vsel %vm333_vm6, 0, %v443_v42  ;;  %v102_v31 = vpop.permute.xlu0 %101  ;;  %v5427_v42 = vld [vmem:[#allocation2 + $0x2d0] sm:$0xf0]  ;;  %v452_v12 = vsel %vm333_vm6, %v8395_v18, %v316_v5 }
  0xe7   :  { %v7218_v20 = vor.u32 %v7913_v58, %v7217_v7  ;;  %v8411_v38 = vpack.i.b16 %v444_v61, %v416_v60  ;;  %vm238_vm9 = vcmp.eq.s32.totalorder %v8209_v19, %v102_v31  ;;  %v7459_v7 = vld [vmem:[#allocation2 + $0x2a4] sm:$0xf]  ;;  %v5411_v58 = vld [vmem:[#allocation2 + $0x2b0] sm:$0xf0]  ;;  %v7901_v19 = vld [vmem:[#allocation2 + $0x106c] sm:$0xf0]  ;;  %v456_v18 = vperm.slane %v452_v12, %v8223_v45 }
  0xe8   :  { %4010 = vmatpush.bf16.msrb.mxu2 %v6898_v4  ;;  %3985 = vmatpush.bf16.msrb.mxu0 %v6626_v16  ;;  %v5318_v4 = vor.u32 %v7435_v44, %v5315_v48  ;;  %v5171_v16 = vld [vmem:[#allocation2 + $0xd0] sm:$0xf0]  ;;  %v5064_v44 = vsel %vm253_vm7, 1.0, %v8111_v28  ;;  %v5049_v62 = vsel %vm238_vm9, 1.0, %v8111_v28  ;;  %v7455_v31 = vld [vmem:[#allocation2 + $0x284] sm:$0xf] }
  0xe9   :  { %v5174_v34 = vor.u32 %v7399_v24, %v5171_v16  ;;  %v325_v59 = vpack.c.bf16 %v5064_v44, %v5064_v44  ;;  %v5267_v23 = vld [vmem:[#allocation2 + $0x190] sm:$0xf0]  ;;  %v310_v26 = vpack.c.bf16 %v5049_v62, %v5049_v62  ;;  %v7137_v62 = vld [vmem:[#allocation2 + $0x1020] sm:$0xf] }
  0xea   :  { %4023 = vmatpush.bf16.msrb.mxu3 %v7026_v1  ;;  %3998 = vmatpush.bf16.msrb.mxu1 %v6754_v32  ;;  %v542_v1 = vshrl.u32 %v444_v61, 16  ;;  %v8405_v32 = vpack.i.b16 %v534_v51, %v533_v63  ;;  %v7395_v63 = vld [vmem:[#allocation2 + $0xa4] sm:$0xf]  ;;  %v7905_v51 = vld [vmem:[#allocation2 + $0x108c] sm:$0xf0]  ;;  %v5052_v61 = vsel %vm241_vm8, 1.0, %v8111_v28 }
  0xeb   :  { %v5158_v60 = vor.u32 %v7395_v63, %v5155_v46  ;;  %v7153_v63 = vld [vmem:[#allocation2 + $0x1040] sm:$0xf]  ;;  %v7897_v46 = vld [vmem:[#allocation2 + $0x104c] sm:$0xf0]  ;;  %v5363_v12 = vld [vmem:[#allocation2 + $0x250] sm:$0xf0] }
  0xec   :  { %4011 = vmatpush.bf16.msrb.mxu2 %v6882_v37  ;;  %3986 = vmatpush.bf16.msrb.mxu0 %v6610_v43  ;;  %v7201_v37 = vld [vmem:[#allocation2 + $0x10a0] sm:$0xf]  ;;  %v5061_v43 = vsel %vm250_vm5, 1.0, %v8111_v28  ;;  %v8424_v22 = vpack.i.b16 %v542_v1, %v541_v15  ;;  %v463_v15 = vrot.slane %v325_v59, 4  ;;  %v313_v28 = vpack.c.bf16 %v5052_v61, %v5052_v61  ;;  %v7415_v59 = vld [vmem:[#allocation2 + $0x144] sm:$0xf] }
  0xed   :  { %v7202_v48 = vor.u32 %v7909_v27, %v7201_v37  ;;  %v7169_v1 = vld [vmem:[#allocation2 + $0x1060] sm:$0xf]  ;;  %v5123_v37 = vld [vmem:[#allocation2 + $0x70] sm:$0xf0] }
  0xee   :  { %4024 = vmatpush.bf16.msrb.mxu3 %v7010_v6  ;;  %3999 = vmatpush.bf16.msrb.mxu1 %v6738_v13  ;;  %v7427_v6 = vld [vmem:[#allocation2 + $0x1a4] sm:$0xf]  ;;  %v7185_v13 = vld [vmem:[#allocation2 + $0x1080] sm:$0xf]  ;;  %v464_v44 = vsel %vm333_vm6, %v463_v15, %v313_v28  ;;  %v7889_v28 = vld [vmem:[#allocation2 + $0x100c] sm:$0xf0] }
  0xef   :  { %3987 = vmatmul.bf16.vlgmr.msrb.gmra.mxu0 %v8391_v57  ;;  %v5286_v2 = vor.u32 %v7427_v6, %v5283_v49  ;;  %v7186_v16 = vor.u32 %v7905_v51, %v7185_v13  ;;  %v7383_v13 = vld [vmem:[#allocation2 + $0x44] sm:$0xf]  ;;  %v468_v51 = vperm.slane %v464_v44, %v8223_v45 }
  0xf0   :  { %4031 = vmatpush.bf16.msra.mxu0 %v7234_v10  ;;  %4012 = vmatpush.bf16.msrb.mxu2 %v6866_v50  ;;  %v319_v10 = vpack.c.bf16 %v5058_v36, %v5058_v36  ;;  %v5430_v50 = vor.u32 %v7463_v40, %v5427_v42  ;;  %v7387_v36 = vld [vmem:[#allocation2 + $0x64] sm:$0xf]  ;;  %v5251_v42 = vld [vmem:[#allocation2 + $0x170] sm:$0xf0] }
  0xf1   :  { %4000 = vmatmul.bf16.vlgmr.msrb.gmra.mxu1 %v8405_v32  ;;  %v7419_v40 = vld [vmem:[#allocation2 + $0x164] sm:$0xf]  ;;  %v5126_v6 = vor.u32 %v7387_v36, %v5123_v37  ;;  %v5075_v37 = vld [vmem:[#allocation2 + $0x10] sm:$0xf0] }
  0xf2   :  { %4044 = vmatpush.bf16.msra.mxu1 %v5190_v53  ;;  %4025 = vmatpush.bf16.msrb.mxu3 %v6994_v11  ;;  %v322_v53 = vpack.c.bf16 %v5061_v43, %v5061_v43  ;;  %v5139_v11 = vld [vmem:[#allocation2 + $0x90] sm:$0xf0]  ;;  %v470_v24 = vsel %vm333_vm6, %v469_v55, %v319_v10  ;;  %v7451_v10 = vld [vmem:[#allocation2 + $0x264] sm:$0xf]  ;;  %v457_v55 = vrot.slane %v456_v18, 4  ;;  %v5254_v49 = vor.u32 %v7419_v40, %v5251_v42 }
  0xf3   :  { %4013 = vmatmul.bf16.vlgmr.msrb.gmra.mxu2 %v8411_v38  ;;  %v474_v27 = vperm.slane %v470_v24, %v8223_v45  ;;  %v5571_v18 = vld [vmem:[#allocation2 + $0x3f0] sm:$0xf0]  ;;  %v7375_v36 = vld [vmem:[#allocation2 + $0x4] sm:$0xf] }
  0xf4   :  { %4057 = vmatpush.bf16.msra.mxu2 %v5318_v4  ;;  %4032 = vmatpush.bf16.msra.mxu0 %v7218_v20  ;;  %v7391_v4 = vld [vmem:[#allocation2 + $0x84] sm:$0xf]  ;;  %v5414_v20 = vor.u32 %v7459_v7, %v5411_v58  ;;  %v445_v14 = vrot.slane %v322_v53, 4  ;;  %v7154_v58 = vor.u32 %v7897_v46, %v7153_v63  ;;  %v5699_v46 = vld [vmem:[#allocation2 + $0x4f0] sm:$0xf0] }
  0xf5   :  { %4026 = vmatmul.bf16.vlgmr.msrb.gmra.mxu3 %v8424_v22  ;;  %v5142_v0 = vor.u32 %v7391_v4, %v5139_v11  ;;  %v475_v53 = vrot.slane %v474_v27, 4  ;;  %v7447_v11 = vld [vmem:[#allocation2 + $0x244] sm:$0xf] }
  0xf6   :  { %4070 = vmatpush.bf16.msra.mxu3 %v5446_v33  ;;  %4045 = vmatpush.bf16.msra.mxu1 %v5174_v34  ;;  %v5395_v33 = vld [vmem:[#allocation2 + $0x290] sm:$0xf0]  ;;  %v5270_v34 = vor.u32 %v7423_v21, %v5267_v23  ;;  %v446_v5 = vsel %vm333_vm6, %v445_v14, %v310_v26  ;;  %v7411_v23 = vld [vmem:[#allocation2 + $0x124] sm:$0xf] }
  0xf7   :  { %v5398_v43 = vor.u32 %v7455_v31, %v5395_v33  ;;  %v450_v7 = vperm.slane %v446_v5, %v8223_v45  ;;  %v5219_v14 = vld [vmem:[#allocation2 + $0x130] sm:$0xf0]  ;;  %v476_v15 = vsel %vm333_vm6, %v475_v53, %v468_v51  ;;  %v7443_v26 = vld [vmem:[#allocation2 + $0x224] sm:$0xf] }
  0xf8   :  { %4058 = vmatpush.bf16.msra.mxu2 %v5302_v39  ;;  %4033 = vmatpush.bf16.msra.mxu0 %v7202_v48  ;;  %v7170_v39 = vor.u32 %v7901_v19, %v7169_v1  ;;  %v5379_v48 = vld [vmem:[#allocation2 + $0x270] sm:$0xf0]  ;;  %v5366_v1 = vor.u32 %v7447_v11, %v5363_v12  ;;  %v7121_v19 = vld [vmem:[#allocation2 + $0x1000] sm:$0xf]  ;;  %v7499_v33 = vld [vmem:[#allocation2 + $0x3e4] sm:$0xf] }
  0xf9   :  { %v5382_v61 = vor.u32 %v7451_v10, %v5379_v48  ;;  %v458_v45 = vsel %vm333_vm6, %v457_v55, %v450_v7  ;;  %v5347_v31 = vld [vmem:[#allocation2 + $0x230] sm:$0xf0]  ;;  %v7122_v40 = vor.u32 %v7889_v28, %v7121_v19  ;;  %v7407_v42 = vld [vmem:[#allocation2 + $0x104] sm:$0xf]  ;;  %v5574_v63 = vor.u32 %v7499_v33, %v5571_v18 }
  0xfa   :  { %4071 = vmatpush.bf16.msra.mxu3 %v5430_v50  ;;  %4046 = vmatpush.bf16.msra.mxu1 %v5158_v60  ;;  %v5107_v50 = vld [vmem:[#allocation2 + $0x50] sm:$0xf0]  ;;  %v462_v27 = vperm.slane %v458_v45, %v8235_v9  ;;  %v7531_v44 = vld [vmem:[#allocation2 + $0x4e4] sm:$0xf]  ;;  %v5350_v5 = vor.u32 %v7443_v26, %v5347_v31  ;;  %v5078_v48 = vor.u32 %v7375_v36, %v5075_v37 }
  0xfb   :  { %v5235_v60 = vld [vmem:[#allocation2 + $0x150] sm:$0xf0]  ;;  %v5110_v4 = vor.u32 %v7383_v13, %v5107_v50  ;;  %v7439_v55 = vld [vmem:[#allocation2 + $0x204] sm:$0xf]  ;;  %v5702_v51 = vor.u32 %v7531_v44, %v5699_v46 }
  0xfc   :  { %4059 = vmatpush.bf16.msra.mxu2 %v5286_v2  ;;  %4034 = vmatpush.bf16.msra.mxu0 %v7186_v16  ;;  %v7893_v2 = vld [vmem:[#allocation2 + $0x102c] sm:$0xf0]  ;;  %v5238_v24 = vor.u32 %v7415_v59, %v5235_v60  ;;  %v7379_v16 = vld [vmem:[#allocation2 + $0x24] sm:$0xf]  ;;  %v5827_v10 = vld [vmem:[#allocation2 + $0x5f0] sm:$0xf0] }
  0xfd   :  { %v7138_v21 = vor.u32 %v7893_v2, %v7137_v62  ;;  %v5555_v53 = vld [vmem:[#allocation2 + $0x3d0] sm:$0xf0]  ;;  %v7523_v45 = vld [vmem:[#allocation2 + $0x4a4] sm:$0xf] }
  0xfe   :  { %4072 = vmatpush.bf16.msra.mxu3 %v5414_v20  ;;  %4047 = vmatpush.bf16.msra.mxu1 %v5142_v0  ;;  %v5091_v20 = vld [vmem:[#allocation2 + $0x30] sm:$0xf0]  ;;  %v7555_v19 = vld [vmem:[#allocation2 + $0x5a4] sm:$0xf] }
  0xff   :  { %v5094_v0 = vor.u32 %v7379_v16, %v5091_v20  ;;  %v5955_v59 = vld [vmem:[#allocation2 + $0x6f0] sm:$0xf0]  ;;  %v7587_v18 = vld [vmem:[#allocation2 + $0x6a4] sm:$0xf] }
 0x100   :  { %4060 = vmatpush.bf16.msra.mxu2 %v5270_v34  ;;  %4035 = vmatpush.bf16.msra.mxu0 %v7170_v39  ;;  %v5222_v34 = vor.u32 %v7411_v23, %v5219_v14  ;;  %v480_v39 = vperm.slane %v476_v15, %v8235_v9  ;;  %v7495_v9 = vld [vmem:[#allocation2 + $0x3c4] sm:$0xf]  ;;  %v5683_v62 = vld [vmem:[#allocation2 + $0x4d0] sm:$0xf0] }
 0x101   :  { %v5558_v2 = vor.u32 %v7495_v9, %v5555_v53  ;;  %v5811_v11 = vld [vmem:[#allocation2 + $0x5d0] sm:$0xf0]  ;;  %v7519_v37 = vld [vmem:[#allocation2 + $0x484] sm:$0xf] }
 0x102   :  { %4073 = vmatpush.bf16.msra.mxu3 %v5398_v43  ;;  %4048 = vmatpush.bf16.msra.mxu1 %v5126_v6  ;;  %v5203_v43 = vld [vmem:[#allocation2 + $0x110] sm:$0xf0]  ;;  %v7563_v6 = vld [vmem:[#allocation2 + $0x5e4] sm:$0xf]  ;;  %v8446_v13 = vpack.i.b16 %v480_v39, %v462_v27 }
 0x103   :  { %v5206_v50 = vor.u32 %v7407_v42, %v5203_v43  ;;  %v5830_v7 = vor.u32 %v7563_v6, %v5827_v10  ;;  %v5539_v16 = vld [vmem:[#allocation2 + $0x3b0] sm:$0xf0]  ;;  %v7483_v44 = vld [vmem:[#allocation2 + $0x364] sm:$0xf] }
 0x104   :  { %4061 = vmatpush.bf16.msra.mxu2 %v5254_v49  ;;  %4036 = vmatpush.bf16.msra.mxu0 %v7154_v58  ;;  %v5331_v49 = vld [vmem:[#allocation2 + $0x210] sm:$0xf0]  ;;  %v7595_v58 = vld [vmem:[#allocation2 + $0x6e4] sm:$0xf] }
 0x105   :  { %v5334_v60 = vor.u32 %v7439_v55, %v5331_v49  ;;  %v5958_v12 = vor.u32 %v7595_v58, %v5955_v59  ;;  %v5939_v23 = vld [vmem:[#allocation2 + $0x6d0] sm:$0xf0]  ;;  %v7583_v46 = vld [vmem:[#allocation2 + $0x684] sm:$0xf] }
 0x106   :  { %4074 = vmatpush.bf16.msra.mxu3 %v5382_v61  ;;  %4049 = vmatpush.bf16.msra.mxu1 %v5110_v4  ;;  %v7527_v61 = vld [vmem:[#allocation2 + $0x4c4] sm:$0xf]  ;;  %v5667_v15 = vld [vmem:[#allocation2 + $0x4b0] sm:$0xf0] }
 0x107   :  { %v7559_v4 = vld [vmem:[#allocation2 + $0x5c4] sm:$0xf]  ;;  %v5686_v20 = vor.u32 %v7527_v61, %v5683_v62  ;;  %v5795_v28 = vld [vmem:[#allocation2 + $0x5b0] sm:$0xf0]  ;;  %v5670_v33 = vor.u32 %v7523_v45, %v5667_v15 }
 0x108   :  { %4062 = vmatpush.bf16.msra.mxu2 %v5238_v24  ;;  %4037 = vmatpush.bf16.msra.mxu0 %v7138_v21  ;;  %v7491_v24 = vld [vmem:[#allocation2 + $0x3a4] sm:$0xf]  ;;  %v5814_v14 = vor.u32 %v7559_v4, %v5811_v11  ;;  %v5523_v31 = vld [vmem:[#allocation2 + $0x390] sm:$0xf0]  ;;  %v5798_v36 = vor.u32 %v7555_v19, %v5795_v28 }
 0x109   :  { %v7591_v21 = vld [vmem:[#allocation2 + $0x6c4] sm:$0xf]  ;;  %v5651_v27 = vld [vmem:[#allocation2 + $0x490] sm:$0xf0] }
 0x10a   :  { %4075 = vmatpush.bf16.msra.mxu3 %v5366_v1  ;;  %4050 = vmatpush.bf16.msra.mxu1 %v5094_v0  ;;  %v5542_v1 = vor.u32 %v7491_v24, %v5539_v16  ;;  %v5942_v26 = vor.u32 %v7591_v21, %v5939_v23  ;;  %v7487_v0 = vld [vmem:[#allocation2 + $0x384] sm:$0xf]  ;;  %v5779_v42 = vld [vmem:[#allocation2 + $0x590] sm:$0xf0] }
 0x10b   :  { %v5526_v39 = vor.u32 %v7487_v0, %v5523_v31  ;;  %v5907_v6 = vld [vmem:[#allocation2 + $0x690] sm:$0xf0]  ;;  %v7579_v59 = vld [vmem:[#allocation2 + $0x664] sm:$0xf] }
 0x10c   :  { %4063 = vmatpush.bf16.msra.mxu2 %v5222_v34  ;;  %4038 = vmatpush.bf16.msra.mxu0 %v7122_v40  ;;  %v5923_v34 = vld [vmem:[#allocation2 + $0x6b0] sm:$0xf0]  ;;  %v7551_v40 = vld [vmem:[#allocation2 + $0x584] sm:$0xf]  ;;  %v5910_v53 = vor.u32 %v7583_v46, %v5907_v6 }
 0x10d   :  { %v5926_v43 = vor.u32 %v7587_v18, %v5923_v34  ;;  %v5782_v10 = vor.u32 %v7551_v40, %v5779_v42  ;;  %v5635_v55 = vld [vmem:[#allocation2 + $0x470] sm:$0xf0]  ;;  %v7511_v62 = vld [vmem:[#allocation2 + $0x444] sm:$0xf] }
 0x10e   :  { %4076 = vmatpush.bf16.msra.mxu3 %v5350_v5  ;;  %4051 = vmatpush.bf16.msra.mxu1 %v5078_v48  ;;  %v5507_v5 = vld [vmem:[#allocation2 + $0x370] sm:$0xf0]  ;;  %v7515_v48 = vld [vmem:[#allocation2 + $0x464] sm:$0xf] }
 0x10f   :  { %4039 = vmatmul.bf16.vlgmr.msra.gmra.mxu0 %v8446_v13  ;;  %v5510_v49 = vor.u32 %v7483_v44, %v5507_v5  ;;  %v5763_v9 = vld [vmem:[#allocation2 + $0x570] sm:$0xf0]  ;;  %v5638_v58 = vor.u32 %v7515_v48, %v5635_v55  ;;  %v7543_v11 = vld [vmem:[#allocation2 + $0x544] sm:$0xf] }
 0x110   :  { %4083 = vmatpush.bf16.msrb.mxu0 %v5574_v63  ;;  %4064 = vmatpush.bf16.msra.mxu2 %v5206_v50  ;;  %v5654_v63 = vor.u32 %v7519_v37, %v5651_v27  ;;  %v7547_v50 = vld [vmem:[#allocation2 + $0x564] sm:$0xf]  ;;  %v6083_v27 = vld [vmem:[#allocation2 + $0x7f0] sm:$0xf0] }
 0x111   :  { %4052 = vmatmul.bf16.vlgmr.msra.gmra.mxu1 %v8246_v25  ;;  %v5766_v61 = vor.u32 %v7547_v50, %v5763_v9  ;;  %v7475_v16 = vld [vmem:[#allocation2 + $0x324] sm:$0xf]  ;;  %v5587_v42 = vld [vmem:[#allocation2 + $0x410] sm:$0xf0] }
 0x112   :  { %4096 = vmatpush.bf16.msrb.mxu1 %v5702_v51  ;;  %4077 = vmatpush.bf16.msra.mxu3 %v5334_v60  ;;  %v7479_v51 = vld [vmem:[#allocation2 + $0x344] sm:$0xf]  ;;  %v5891_v60 = vld [vmem:[#allocation2 + $0x670] sm:$0xf0] }
 0x113   :  { %4065 = vmatmul.bf16.vlgmr.msra.gmra.mxu2 %v8250_v35  ;;  %v5894_v24 = vor.u32 %v7579_v59, %v5891_v60  ;;  %v7575_v23 = vld [vmem:[#allocation2 + $0x644] sm:$0xf]  ;;  %v5715_v5 = vld [vmem:[#allocation2 + $0x510] sm:$0xf0] }
 0x114   :  { %4109 = vmatpush.bf16.msrb.mxu2 %v5830_v7  ;;  %4084 = vmatpush.bf16.msrb.mxu0 %v5558_v2  ;;  %v5491_v7 = vld [vmem:[#allocation2 + $0x350] sm:$0xf0]  ;;  %v7507_v15 = vld [vmem:[#allocation2 + $0x424] sm:$0xf] }
 0x115   :  { %4078 = vmatmul.bf16.vlgmr.msra.gmra.mxu3 %v8256_v47  ;;  %v5619_v2 = vld [vmem:[#allocation2 + $0x450] sm:$0xf0]  ;;  %v5494_v4 = vor.u32 %v7479_v51, %v5491_v7  ;;  %v7539_v28 = vld [vmem:[#allocation2 + $0x524] sm:$0xf] }
 0x116   :  { %4122 = vmatpush.bf16.msrb.mxu3 %v5958_v12  ;;  %4097 = vmatpush.bf16.msrb.mxu1 %v5686_v20  ;;  %v5747_v12 = vld [vmem:[#allocation2 + $0x550] sm:$0xf0]  ;;  %v5622_v21 = vor.u32 %v7511_v62, %v5619_v2  ;;  %v7471_v31 = vld [vmem:[#allocation2 + $0x304] sm:$0xf]  ;;  %v8452_v62 = vld [vmem:[#allocation5] sm:$0xf] }
 0x117   :  { %v5475_v20 = vld [vmem:[#allocation2 + $0x330] sm:$0xf0]  ;;  %v5750_v45 = vor.u32 %v7543_v11, %v5747_v12  ;;  %v7571_v18 = vld [vmem:[#allocation2 + $0x624] sm:$0xf] }
 0x118   :  { %4110 = vmatpush.bf16.msrb.mxu2 %v5814_v14  ;;  %4085 = vmatpush.bf16.msrb.mxu0 %v5542_v1  ;;  %v5875_v14 = vld [vmem:[#allocation2 + $0x650] sm:$0xf0]  ;;  %v5478_v19 = vor.u32 %v7475_v16, %v5475_v20  ;;  %v7627_v37 = vld [vmem:[#allocation2 + $0x7e4] sm:$0xf] }
 0x119   :  { %v5603_v1 = vld [vmem:[#allocation2 + $0x430] sm:$0xf0]  ;;  %v5878_v0 = vor.u32 %v7575_v23, %v5875_v14  ;;  %v7503_v40 = vld [vmem:[#allocation2 + $0x404] sm:$0xf]  ;;  %v6086_v6 = vor.u32 %v7627_v37, %v6083_v27  ;;  %v1095_v14 = vperm.slane %v8452_v62, 0 }
 0x11a   :  { %4123 = vmatpush.bf16.msrb.mxu3 %v5942_v26  ;;  %4098 = vmatpush.bf16.msrb.mxu1 %v5670_v33  ;;  %v5731_v26 = vld [vmem:[#allocation2 + $0x530] sm:$0xf0]  ;;  %v5606_v34 = vor.u32 %v7507_v15, %v5603_v1  ;;  %v7535_v44 = vld [vmem:[#allocation2 + $0x504] sm:$0xf] }
 0x11b   :  { %v5459_v33 = vld [vmem:[#allocation2 + $0x310] sm:$0xf0]  ;;  %v7691_v48 = vld [vmem:[#allocation2 + $0x9e4] sm:$0xf] }
 0x11c   :  { %4111 = vmatpush.bf16.msrb.mxu2 %v5798_v36  ;;  %4086 = vmatpush.bf16.msrb.mxu0 %v5526_v39  ;;  %v5859_v36 = vld [vmem:[#allocation2 + $0x630] sm:$0xf0]  ;;  %v5734_v39 = vor.u32 %v7539_v28, %v5731_v26  ;;  %v7567_v50 = vld [vmem:[#allocation2 + $0x604] sm:$0xf] }
 0x11d   :  { %v5862_v46 = vor.u32 %v7571_v18, %v5859_v36  ;;  %v6339_v55 = vld [vmem:[#allocation2 + $0x9f0] sm:$0xf0]  ;;  %v7623_v51 = vld [vmem:[#allocation2 + $0x7c4] sm:$0xf] }
 0x11e   :  { %4124 = vmatpush.bf16.msrb.mxu3 %v5926_v43  ;;  %4099 = vmatpush.bf16.msrb.mxu1 %v5654_v63  ;;  %v5462_v43 = vor.u32 %v7471_v31, %v5459_v33  ;;  %v7659_v63 = vld [vmem:[#allocation2 + $0x8e4] sm:$0xf]  ;;  %v5843_v9 = vld [vmem:[#allocation2 + $0x610] sm:$0xf0]  ;;  %v6342_v59 = vor.u32 %v7691_v48, %v6339_v55 }
 0x11f   :  { %v6067_v7 = vld [vmem:[#allocation2 + $0x7d0] sm:$0xf0]  ;;  %v7723_v60 = vld [vmem:[#allocation2 + $0xae4] sm:$0xf]  ;;  %v5846_v2 = vor.u32 %v7567_v50, %v5843_v9 }
 0x120   :  { %4112 = vmatpush.bf16.msrb.mxu2 %v5782_v10  ;;  %4087 = vmatpush.bf16.msrb.mxu0 %v5510_v49  ;;  %v6211_v10 = vld [vmem:[#allocation2 + $0x8f0] sm:$0xf0]  ;;  %v5590_v49 = vor.u32 %v7503_v40, %v5587_v42  ;;  %v6070_v12 = vor.u32 %v7623_v51, %v6067_v7  ;;  %v7719_v15 = vld [vmem:[#allocation2 + $0xac4] sm:$0xf] }
 0x121   :  { %v6195_v11 = vld [vmem:[#allocation2 + $0x8d0] sm:$0xf0]  ;;  %v7651_v28 = vld [vmem:[#allocation2 + $0x8a4] sm:$0xf] }
 0x122   :  { %4125 = vmatpush.bf16.msrb.mxu3 %v5910_v53  ;;  %4100 = vmatpush.bf16.msrb.mxu1 %v5638_v58  ;;  %v5718_v53 = vor.u32 %v7535_v44, %v5715_v5  ;;  %v6214_v58 = vor.u32 %v7659_v63, %v6211_v10  ;;  %v6323_v16 = vld [vmem:[#allocation2 + $0x9d0] sm:$0xf0]  ;;  %v7683_v33 = vld [vmem:[#allocation2 + $0x9a4] sm:$0xf] }
 0x123   :  { %v6051_v23 = vld [vmem:[#allocation2 + $0x7b0] sm:$0xf0]  ;;  %v7615_v37 = vld [vmem:[#allocation2 + $0x784] sm:$0xf] }
 0x124   :  { %4113 = vmatpush.bf16.msrb.mxu2 %v5766_v61  ;;  %4088 = vmatpush.bf16.msrb.mxu0 %v5494_v4  ;;  %v6467_v61 = vld [vmem:[#allocation2 + $0xaf0] sm:$0xf0]  ;;  %v7655_v4 = vld [vmem:[#allocation2 + $0x8c4] sm:$0xf] }
 0x125   :  { %v6470_v20 = vor.u32 %v7723_v60, %v6467_v61  ;;  %v6451_v1 = vld [vmem:[#allocation2 + $0xad0] sm:$0xf0]  ;;  %v7715_v42 = vld [vmem:[#allocation2 + $0xaa4] sm:$0xf] }
 0x126   :  { %4126 = vmatpush.bf16.msrb.mxu3 %v5894_v24  ;;  %4101 = vmatpush.bf16.msrb.mxu1 %v5622_v21  ;;  %v7687_v24 = vld [vmem:[#allocation2 + $0x9c4] sm:$0xf]  ;;  %v6179_v26 = vld [vmem:[#allocation2 + $0x8b0] sm:$0xf0]  ;;  %v6454_v36 = vor.u32 %v7719_v15, %v6451_v1 }
 0x127   :  { %v7619_v21 = vld [vmem:[#allocation2 + $0x7a4] sm:$0xf]  ;;  %v6307_v18 = vld [vmem:[#allocation2 + $0x9b0] sm:$0xf0] }
 0x128   :  { %4114 = vmatpush.bf16.msrb.mxu2 %v5750_v45  ;;  %4089 = vmatpush.bf16.msrb.mxu0 %v5478_v19  ;;  %v6198_v45 = vor.u32 %v7655_v4, %v6195_v11  ;;  %v6326_v19 = vor.u32 %v7687_v24, %v6323_v16  ;;  %v6035_v27 = vld [vmem:[#allocation2 + $0x790] sm:$0xf0]  ;;  %v6310_v5 = vor.u32 %v7683_v33, %v6307_v18  ;;  %v7647_v63 = vld [vmem:[#allocation2 + $0x884] sm:$0xf] }
 0x129   :  { %v7679_v10 = vld [vmem:[#allocation2 + $0x984] sm:$0xf]  ;;  %v6291_v48 = vld [vmem:[#allocation2 + $0x990] sm:$0xf0] }
 0x12a   :  { %4127 = vmatpush.bf16.msrb.mxu3 %v5878_v0  ;;  %4102 = vmatpush.bf16.msrb.mxu1 %v5606_v34  ;;  %v6054_v0 = vor.u32 %v7619_v21, %v6051_v23  ;;  %v6019_v50 = vld [vmem:[#allocation2 + $0x770] sm:$0xf0]  ;;  %v6294_v7 = vor.u32 %v7679_v10, %v6291_v48  ;;  %v7707_v23 = vld [vmem:[#allocation2 + $0xa64] sm:$0xf] }
 0x12b   :  { %v6419_v51 = vld [vmem:[#allocation2 + $0xa90] sm:$0xf0]  ;;  %v7639_v1 = vld [vmem:[#allocation2 + $0x844] sm:$0xf] }
 0x12c   :  { %4115 = vmatpush.bf16.msrb.mxu2 %v5734_v39  ;;  %4090 = vmatpush.bf16.msrb.mxu0 %v5462_v43  ;;  %v3832_v31 = vpop.f32.mrf.mxu0  ;;  %v6182_v39 = vor.u32 %v7651_v28, %v6179_v26  ;;  %v6435_v43 = vld [vmem:[#allocation2 + $0xab0] sm:$0xf0]  ;;  %v7599_v48 = vld [vmem:[#allocation2 + $0x704] sm:$0xf] }
 0x12d   :  { %v3833_v34 = vadd.f32 %v3832_v31, %v1095_v14  ;;  %v6438_v55 = vor.u32 %v7715_v42, %v6435_v43  ;;  %v6275_v4 = vld [vmem:[#allocation2 + $0x970] sm:$0xf0]  ;;  %v7635_v42 = vld [vmem:[#allocation2 + $0x824] sm:$0xf] }
 0x12e   :  { %4128 = vmatpush.bf16.msrb.mxu3 %v5862_v46  ;;  %4103 = vmatpush.bf16.msrb.mxu1 %v5590_v49  ;;  %v3845_v40 = vpop.f32.mrf.mxu1  ;;  %v6163_v46 = vld [vmem:[#allocation2 + $0x890] sm:$0xf0]  ;;  %v7611_v49 = vld [vmem:[#allocation2 + $0x764] sm:$0xf] }
 0x12f   :  { %4091 = vmatmul.bf16.vlgmr.msrb.gmra.mxu0 %v8263_v56  ;;  %v3846_v44 = vadd.f32 %v3845_v40, %v3833_v34  ;;  %v6166_v9 = vor.u32 %v7647_v63, %v6163_v46  ;;  %v6022_v60 = vor.u32 %v7611_v49, %v6019_v50  ;;  %v6003_v24 = vld [vmem:[#allocation2 + $0x750] sm:$0xf0]  ;;  %v7603_v34 = vld [vmem:[#allocation2 + $0x724] sm:$0xf] }
 0x130   :  { %4135 = vmatpush.bf16.msra.mxu0 %v6086_v6  ;;  %4116 = vmatpush.bf16.msrb.mxu2 %v5718_v53  ;;  %v6038_v6 = vor.u32 %v7615_v37, %v6035_v27  ;;  %v7711_v53 = vld [vmem:[#allocation2 + $0xa84] sm:$0xf]  ;;  %v6403_v14 = vld [vmem:[#allocation2 + $0xa70] sm:$0xf0] }
 0x131   :  { %4104 = vmatmul.bf16.vlgmr.msrb.gmra.mxu1 %v8303_v52  ;;  %v6422_v11 = vor.u32 %v7711_v53, %v6419_v51  ;;  %v6259_v31 = vld [vmem:[#allocation2 + $0x950] sm:$0xf0]  ;;  %v6406_v18 = vor.u32 %v7707_v23, %v6403_v14  ;;  %v7703_v27 = vld [vmem:[#allocation2 + $0xa44] sm:$0xf] }
 0x132   :  { %4148 = vmatpush.bf16.msra.mxu1 %v6214_v58  ;;  %4129 = vmatpush.bf16.msrb.mxu3 %v5846_v2  ;;  %v7643_v58 = vld [vmem:[#allocation2 + $0x864] sm:$0xf]  ;;  %v6115_v43 = vld [vmem:[#allocation2 + $0x830] sm:$0xf0] }
 0x133   :  { %4117 = vmatmul.bf16.vlgmr.msrb.gmra.mxu2 %v8305_v8  ;;  %v7675_v2 = vld [vmem:[#allocation2 + $0x964] sm:$0xf]  ;;  %v6243_v46 = vld [vmem:[#allocation2 + $0x930] sm:$0xf0] }
 0x134   :  { %4161 = vmatpush.bf16.msra.mxu2 %v6342_v59  ;;  %4136 = vmatpush.bf16.msra.mxu0 %v6070_v12  ;;  %v6147_v59 = vld [vmem:[#allocation2 + $0x870] sm:$0xf0]  ;;  %v3834_v61 = vpop.f32.mrf.mxu0  ;;  %v7607_v12 = vld [vmem:[#allocation2 + $0x744] sm:$0xf]  ;;  %v6278_v15 = vor.u32 %v7675_v2, %v6275_v4 }
 0x135   :  { %4130 = vmatmul.bf16.vlgmr.msrb.gmra.mxu3 %v8311_v17  ;;  %v6006_v26 = vor.u32 %v7607_v12, %v6003_v24  ;;  %v7667_v63 = vld [vmem:[#allocation2 + $0x924] sm:$0xf]  ;;  %v6371_v51 = vld [vmem:[#allocation2 + $0xa30] sm:$0xf0] }
 0x136   :  { %4174 = vmatpush.bf16.msra.mxu3 %v6470_v20  ;;  %4149 = vmatpush.bf16.msra.mxu1 %v6198_v45  ;;  %v3858_v16 = vpop.f32.mrf.mxu2  ;;  %v6150_v20 = vor.u32 %v7643_v58, %v6147_v59  ;;  %v3847_v21 = vpop.f32.mrf.mxu1  ;;  %v7699_v49 = vld [vmem:[#allocation2 + $0xa24] sm:$0xf]  ;;  %v6595_v58 = vld [vmem:[#allocation2 + $0xbf0] sm:$0xf0] }
 0x137   :  { %v3859_v45 = vadd.f32 %v3858_v16, %v3846_v44  ;;  %v7631_v61 = vld [vmem:[#allocation2 + $0x804] sm:$0xf]  ;;  %v6099_v2 = vld [vmem:[#allocation2 + $0x810] sm:$0xf0] }
 0x138   :  { %4162 = vmatpush.bf16.msra.mxu2 %v6326_v19  ;;  %4137 = vmatpush.bf16.msra.mxu0 %v6054_v0  ;;  %v6131_v19 = vld [vmem:[#allocation2 + $0x850] sm:$0xf0]  ;;  %v3871_v28 = vpop.f32.mrf.mxu3  ;;  %v7671_v0 = vld [vmem:[#allocation2 + $0x944] sm:$0xf] }
 0x139   :  { %v3872_v33 = vadd.f32 %v3871_v28, %v3859_v45  ;;  %v6134_v37 = vor.u32 %v7639_v1, %v6131_v19  ;;  %v6262_v40 = vor.u32 %v7671_v0, %v6259_v31  ;;  %v7663_v12 = vld [vmem:[#allocation2 + $0x904] sm:$0xf]  ;;  %v6227_v24 = vld [vmem:[#allocation2 + $0x910] sm:$0xf0] }
 0x13a   :  { %4175 = vmatpush.bf16.msra.mxu3 %v6454_v36  ;;  %4150 = vmatpush.bf16.msra.mxu1 %v6182_v39  ;;  %v5987_v36 = vld [vmem:[#allocation2 + $0x730] sm:$0xf0]  ;;  %v7787_v16 = vld [vmem:[#allocation2 + $0xce4] sm:$0xf]  ;;  %v6230_v28 = vor.u32 %v7663_v12, %v6227_v24 }
 0x13b   :  { %v6387_v39 = vld [vmem:[#allocation2 + $0xa50] sm:$0xf0]  ;;  %v5990_v44 = vor.u32 %v7603_v34, %v5987_v36  ;;  %v7819_v14 = vld [vmem:[#allocation2 + $0xde4] sm:$0xf] }
 0x13c   :  { %4163 = vmatpush.bf16.msra.mxu2 %v6310_v5  ;;  %4138 = vmatpush.bf16.msra.mxu0 %v6038_v6  ;;  %v3884_v5 = vpop.f32.mrf.mxu0  ;;  %v6390_v10 = vor.u32 %v7703_v27, %v6387_v39  ;;  %v6723_v23 = vld [vmem:[#allocation2 + $0xcf0] sm:$0xf0]  ;;  %v7695_v1 = vld [vmem:[#allocation2 + $0xa04] sm:$0xf] }
 0x13d   :  { %v3885_v6 = vadd.f32 %v3884_v5, %v3872_v33  ;;  %v6851_v45 = vld [vmem:[#allocation2 + $0xdf0] sm:$0xf0]  ;;  %v6726_v31 = vor.u32 %v7787_v16, %v6723_v23  ;;  %v7851_v34 = vld [vmem:[#allocation2 + $0xee4] sm:$0xf] }
 0x13e   :  { %4176 = vmatpush.bf16.msra.mxu3 %v6438_v55  ;;  %4151 = vmatpush.bf16.msra.mxu1 %v6166_v9  ;;  %v5971_v55 = vld [vmem:[#allocation2 + $0x710] sm:$0xf0]  ;;  %v3860_v50 = vpop.f32.mrf.mxu2  ;;  %v6118_v9 = vor.u32 %v7635_v42, %v6115_v43  ;;  %v3897_v53 = vpop.f32.mrf.mxu1  ;;  %v6854_v33 = vor.u32 %v7819_v14, %v6851_v45  ;;  %v7783_v27 = vld [vmem:[#allocation2 + $0xcc4] sm:$0xf] }
 0x13f   :  { %v3898_v59 = vadd.f32 %v3897_v53, %v3885_v6  ;;  %v6355_v19 = vld [vmem:[#allocation2 + $0xa10] sm:$0xf0]  ;;  %v7747_v6 = vld [vmem:[#allocation2 + $0xba4] sm:$0xf] }
 0x140   :  { %4164 = vmatpush.bf16.msra.mxu2 %v6294_v7  ;;  %4139 = vmatpush.bf16.msra.mxu0 %v6022_v60  ;;  %v7755_v7 = vld [vmem:[#allocation2 + $0xbe4] sm:$0xf]  ;;  %v6246_v60 = vor.u32 %v7667_v63, %v6243_v46  ;;  %v3873_v4 = vpop.f32.mrf.mxu3  ;;  %v6579_v0 = vld [vmem:[#allocation2 + $0xbd0] sm:$0xf0] }
 0x141   :  { %v6598_v21 = vor.u32 %v7755_v7, %v6595_v58  ;;  %v6979_v36 = vld [vmem:[#allocation2 + $0xef0] sm:$0xf0]  ;;  %v7843_v24 = vld [vmem:[#allocation2 + $0xea4] sm:$0xf] }
 0x142   :  { %4177 = vmatpush.bf16.msra.mxu3 %v6422_v11  ;;  %4152 = vmatpush.bf16.msra.mxu1 %v6150_v20  ;;  %v5974_v11 = vor.u32 %v7599_v48, %v5971_v55  ;;  %v6374_v20 = vor.u32 %v7699_v49, %v6371_v51  ;;  %v6707_v39 = vld [vmem:[#allocation2 + $0xcd0] sm:$0xf0]  ;;  %v6982_v46 = vor.u32 %v7851_v34, %v6979_v36  ;;  %v7847_v49 = vld [vmem:[#allocation2 + $0xec4] sm:$0xf] }
 0x143   :  { %v6835_v5 = vld [vmem:[#allocation2 + $0xdd0] sm:$0xf0]  ;;  %v6710_v48 = vor.u32 %v7783_v27, %v6707_v39  ;;  %v7779_v51 = vld [vmem:[#allocation2 + $0xca4] sm:$0xf] }
 0x144   :  { %4165 = vmatpush.bf16.msra.mxu2 %v6278_v15  ;;  %4140 = vmatpush.bf16.msra.mxu0 %v6006_v26  ;;  %v6102_v15 = vor.u32 %v7631_v61, %v6099_v2  ;;  %v7751_v26 = vld [vmem:[#allocation2 + $0xbc4] sm:$0xf]  ;;  %v6963_v50 = vld [vmem:[#allocation2 + $0xed0] sm:$0xf0] }
 0x145   :  { %v6691_v7 = vld [vmem:[#allocation2 + $0xcb0] sm:$0xf0]  ;;  %v6966_v61 = vor.u32 %v7847_v49, %v6963_v50  ;;  %v7743_v2 = vld [vmem:[#allocation2 + $0xb84] sm:$0xf] }
 0x146   :  { %4178 = vmatpush.bf16.msra.mxu3 %v6406_v18  ;;  %4153 = vmatpush.bf16.msra.mxu1 %v6134_v37  ;;  %v3886_v18 = vpop.f32.mrf.mxu0  ;;  %v6358_v37 = vor.u32 %v7695_v1, %v6355_v19  ;;  %v3910_v42 = vpop.f32.mrf.mxu2  ;;  %v6547_v4 = vld [vmem:[#allocation2 + $0xb90] sm:$0xf0]  ;;  %v7775_v23 = vld [vmem:[#allocation2 + $0xc84] sm:$0xf] }
 0x147   :  { %v3899_v43 = vpop.f32.mrf.mxu1  ;;  %v3911_v63 = vadd.f32 %v3910_v42, %v3898_v59  ;;  %v7811_v59 = vld [vmem:[#allocation2 + $0xda4] sm:$0xf]  ;;  %v6947_v16 = vld [vmem:[#allocation2 + $0xeb0] sm:$0xf0]  ;;  %v6550_v45 = vor.u32 %v7743_v2, %v6547_v4 }
 0x148   :  { %4166 = vmatpush.bf16.msra.mxu2 %v6262_v40  ;;  %4141 = vmatpush.bf16.msra.mxu0 %v5990_v44  ;;  %v6582_v40 = vor.u32 %v7751_v26, %v6579_v0  ;;  %v7815_v44 = vld [vmem:[#allocation2 + $0xdc4] sm:$0xf]  ;;  %v3923_v55 = vpop.f32.mrf.mxu3  ;;  %v6675_v14 = vld [vmem:[#allocation2 + $0xc90] sm:$0xf0] }
 0x149   :  { %v6838_v53 = vor.u32 %v7815_v44, %v6835_v5  ;;  %v7807_v1 = vld [vmem:[#allocation2 + $0xd84] sm:$0xf]  ;;  %v6803_v19 = vld [vmem:[#allocation2 + $0xd90] sm:$0xf0]  ;;  %v6678_v18 = vor.u32 %v7775_v23, %v6675_v14 }
 0x14a   :  { %4179 = vmatpush.bf16.msra.mxu3 %v6390_v10  ;;  %4154 = vmatpush.bf16.msra.mxu1 %v6118_v9  ;;  %v6563_v10 = vld [vmem:[#allocation2 + $0xbb0] sm:$0xf0]  ;;  %v3924_v9 = vadd.f32 %v3923_v55, %v3911_v63  ;;  %v7739_v0 = vld [vmem:[#allocation2 + $0xb64] sm:$0xf]  ;;  %v6806_v27 = vor.u32 %v7807_v1, %v6803_v19 }
 0x14b   :  { %v6566_v58 = vor.u32 %v7747_v6, %v6563_v10  ;;  %v7839_v36 = vld [vmem:[#allocation2 + $0xe84] sm:$0xf]  ;;  %v6787_v44 = vld [vmem:[#allocation2 + $0xd70] sm:$0xf0] }
 0x14c   :  { %4167 = vmatpush.bf16.msra.mxu2 %v6246_v60  ;;  %4142 = vmatpush.bf16.msra.mxu0 %v5974_v11  ;;  %v6819_v60 = vld [vmem:[#allocation2 + $0xdb0] sm:$0xf0]  ;;  %v6694_v11 = vor.u32 %v7779_v51, %v6691_v7  ;;  %v7771_v39 = vld [vmem:[#allocation2 + $0xc64] sm:$0xf] }
 0x14d   :  { %v7803_v43 = vld [vmem:[#allocation2 + $0xd64] sm:$0xf]  ;;  %v6499_v4 = vld [vmem:[#allocation2 + $0xb30] sm:$0xf0] }
 0x14e   :  { %4180 = vmatpush.bf16.msra.mxu3 %v6374_v20  ;;  %4155 = vmatpush.bf16.msra.mxu1 %v6102_v15  ;;  %v3936_v12 = vpop.f32.mrf.mxu0  ;;  %v6822_v20 = vor.u32 %v7811_v59, %v6819_v60  ;;  %v3912_v15 = vpop.f32.mrf.mxu2  ;;  %v7735_v63 = vld [vmem:[#allocation2 + $0xb44] sm:$0xf]  ;;  %v6790_v49 = vor.u32 %v7803_v43, %v6787_v44  ;;  %v6627_v14 = vld [vmem:[#allocation2 + $0xc30] sm:$0xf0] }
 0x14f   :  { %4143 = vmatmul.bf16.vlgmr.msra.gmra.mxu0 %v8322_v30  ;;  %v3949_v26 = vpop.f32.mrf.mxu1  ;;  %v7835_v10 = vld [vmem:[#allocation2 + $0xe64] sm:$0xf]  ;;  %v6755_v1 = vld [vmem:[#allocation2 + $0xd30] sm:$0xf0] }
 0x150   :  { %4187 = vmatpush.bf16.msrb.mxu0 %v6598_v21  ;;  %4168 = vmatpush.bf16.msra.mxu2 %v6230_v28  ;;  %v3937_v21 = vadd.f32 %v3936_v12, %v3924_v9  ;;  %v6950_v28 = vor.u32 %v7843_v24, %v6947_v16  ;;  %v3925_v34 = vpop.f32.mrf.mxu3  ;;  %v7767_v50 = vld [vmem:[#allocation2 + $0xc44] sm:$0xf]  ;;  %v6643_v9 = vld [vmem:[#allocation2 + $0xc50] sm:$0xf0] }
 0x151   :  { %4156 = vmatmul.bf16.vlgmr.msra.gmra.mxu1 %v8338_v29  ;;  %v7799_v7 = vld [vmem:[#allocation2 + $0xd44] sm:$0xf]  ;;  %v6899_v16 = vld [vmem:[#allocation2 + $0xe50] sm:$0xf0] }
 0x152   :  { %4200 = vmatpush.bf16.msrb.mxu1 %v6726_v31  ;;  %4181 = vmatpush.bf16.msra.mxu3 %v6358_v37  ;;  %v6531_v31 = vld [vmem:[#allocation2 + $0xb70] sm:$0xf0]  ;;  %v7731_v2 = vld [vmem:[#allocation2 + $0xb24] sm:$0xf] }
 0x153   :  { %4169 = vmatmul.bf16.vlgmr.msra.gmra.mxu2 %v8341_v41  ;;  %v6931_v37 = vld [vmem:[#allocation2 + $0xe90] sm:$0xf0]  ;;  %v6534_v42 = vor.u32 %v7739_v0, %v6531_v31  ;;  %v7831_v24 = vld [vmem:[#allocation2 + $0xe44] sm:$0xf] }
 0x154   :  { %4213 = vmatpush.bf16.msrb.mxu2 %v6854_v33  ;;  %4188 = vmatpush.bf16.msrb.mxu0 %v6582_v40  ;;  %v3950_v33 = vadd.f32 %v3949_v26, %v3937_v21  ;;  %v6659_v40 = vld [vmem:[#allocation2 + $0xc70] sm:$0xf0]  ;;  %v6934_v5 = vor.u32 %v7839_v36, %v6931_v37  ;;  %v7763_v23 = vld [vmem:[#allocation2 + $0xc24] sm:$0xf]  ;;  %v6902_v19 = vor.u32 %v7831_v24, %v6899_v16  ;;  %v7402_v24 = vld [vmem:[#allocation2 + $0xd4] sm:$0xf0] }
 0x155   :  { %4182 = vmatmul.bf16.vlgmr.msra.gmra.mxu3 %v8344_v3  ;;  %v6662_v6 = vor.u32 %v7771_v39, %v6659_v40  ;;  %v7795_v15 = vld [vmem:[#allocation2 + $0xd24] sm:$0xf]  ;;  %v6483_v26 = vld [vmem:[#allocation2 + $0xb10] sm:$0xf0]  ;;  %v6630_v31 = vor.u32 %v7763_v23, %v6627_v14 }
 0x156   :  { %4226 = vmatpush.bf16.msrb.mxu3 %v6982_v46  ;;  %4201 = vmatpush.bf16.msrb.mxu1 %v6710_v48  ;;  %v6515_v46 = vld [vmem:[#allocation2 + $0xb50] sm:$0xf0]  ;;  %v3938_v55 = vpop.f32.mrf.mxu0  ;;  %v3962_v51 = vpop.f32.mrf.mxu2  ;;  %v7827_v0 = vld [vmem:[#allocation2 + $0xe24] sm:$0xf]  ;;  %v6758_v36 = vor.u32 %v7795_v15, %v6755_v1  ;;  %v7434_v15 = vld [vmem:[#allocation2 + $0x1d4] sm:$0xf0] }
 0x157   :  { %v6915_v48 = vld [vmem:[#allocation2 + $0xe70] sm:$0xf0]  ;;  %v3963_v59 = vadd.f32 %v3962_v51, %v3950_v33  ;;  %v7759_v37 = vld [vmem:[#allocation2 + $0xc04] sm:$0xf] }
 0x158   :  { %4214 = vmatpush.bf16.msrb.mxu2 %v6838_v53  ;;  %4189 = vmatpush.bf16.msrb.mxu0 %v6566_v58  ;;  %v6518_v53 = vor.u32 %v7735_v63, %v6515_v46  ;;  %v6771_v58 = vld [vmem:[#allocation2 + $0xd50] sm:$0xf0]  ;;  %v6918_v60 = vor.u32 %v7835_v10, %v6915_v48  ;;  %v3975_v12 = vpop.f32.mrf.mxu3  ;;  %v7915_v44 = vld [vmem:[#allocation2 + $0x10e4] sm:$0xf]  ;;  %v7406_v10 = vld [vmem:[#allocation2 + $0xf4] sm:$0xf0] }
 0x159   :  { %v6774_v21 = vor.u32 %v7799_v7, %v6771_v58  ;;  %v6883_v33 = vld [vmem:[#allocation2 + $0xe30] sm:$0xf0] }
 0x15a   :  { %4227 = vmatpush.bf16.msrb.mxu3 %v6966_v61  ;;  %4202 = vmatpush.bf16.msrb.mxu1 %v6694_v11  ;;  %v3951_v61 = vpop.f32.mrf.mxu1  ;;  %v6646_v11 = vor.u32 %v7767_v50, %v6643_v9  ;;  %v7107_v34 = vld [vmem:[#allocation2 + $0xff0] sm:$0xf0] }
 0x15b   :  { %v6739_v43 = vld [vmem:[#allocation2 + $0xd10] sm:$0xf0] }
 0x15c   :  { %4215 = vmatpush.bf16.msrb.mxu2 %v6822_v20  ;;  %4190 = vmatpush.bf16.msrb.mxu0 %v6550_v45  ;;  %v8463_v20 = vadd.f32 %v3975_v12, %v3963_v59  ;;  %v6502_v45 = vor.u32 %v7731_v2, %v6499_v4  ;;  %v7235_v46 = vld [vmem:[#allocation2 + $0x10f0] sm:$0xf0]  ;;  %v5321_v59 = vld [vmem:[#allocation2 + $0x1e8] sm:$0xf]  ;;  %v7911_v2 = vld [vmem:[#allocation2 + $0x10c4] sm:$0xf] }
 0x15d   :  { %v6867_v50 = vld [vmem:[#allocation2 + $0xe10] sm:$0xf0]  ;;  %v7238_v7 = vor.u32 %v7915_v44, %v7235_v46  ;;  %v5177_v12 = vld [vmem:[#allocation2 + $0xc8] sm:$0xf] }
 0x15e   :  { %4228 = vmatpush.bf16.msrb.mxu3 %v6950_v28  ;;  %4203 = vmatpush.bf16.msrb.mxu1 %v6678_v18  ;;  %v7727_v28 = vld [vmem:[#allocation2 + $0xb04] sm:$0xf]  ;;  %v3964_v40 = vpop.f32.mrf.mxu2  ;;  %v7091_v51 = vld [vmem:[#allocation2 + $0xfd0] sm:$0xf0]  ;;  %v5178_v1 = vor.u32 %v7402_v24, %v5177_v12  ;;  %v5145_v46 = vld [vmem:[#allocation2 + $0x88] sm:$0xf] }
 0x15f   :  { %v7883_v18 = vld [vmem:[#allocation2 + $0xfe4] sm:$0xf]  ;;  %v6486_v39 = vor.u32 %v7727_v28, %v6483_v26  ;;  %v7219_v4 = vld [vmem:[#allocation2 + $0x10d0] sm:$0xf0]  ;;  %v5257_v24 = vld [vmem:[#allocation2 + $0x168] sm:$0xf] }
 0x160   :  { %4216 = vmatpush.bf16.msrb.mxu2 %v6806_v27  ;;  %4191 = vmatpush.bf16.msrb.mxu0 %v6534_v42  ;;  %v6611_v27 = vld [vmem:[#allocation2 + $0xc10] sm:$0xf0]  ;;  %v7791_v42 = vld [vmem:[#allocation2 + $0xd04] sm:$0xf]  ;;  %v7110_v63 = vor.u32 %v7883_v18, %v7107_v34  ;;  %v3977_v55 = vpop.f32.mrf.mxu3  ;;  %v7222_v14 = vor.u32 %v7911_v2, %v7219_v4 }
 0x161   :  { %v6614_v48 = vor.u32 %v7759_v37, %v6611_v27  ;;  %v6742_v9 = vor.u32 %v7791_v42, %v6739_v43  ;;  %v7075_v23 = vld [vmem:[#allocation2 + $0xfb0] sm:$0xf0]  ;;  %v7871_v18 = vld [vmem:[#allocation2 + $0xf84] sm:$0xf]  ;;  %v5289_v27 = vld [vmem:[#allocation2 + $0x1a8] sm:$0xf] }
 0x162   :  { %4229 = vmatpush.bf16.msrb.mxu3 %v6934_v5  ;;  %4204 = vmatpush.bf16.msrb.mxu1 %v6662_v6  ;;  %v6886_v5 = vor.u32 %v7827_v0, %v6883_v33  ;;  %v5193_v6 = vld [vmem:[#allocation2 + $0xe8] sm:$0xf]  ;;  %v7203_v28 = vld [vmem:[#allocation2 + $0x10b0] sm:$0xf0]  ;;  %v7903_v43 = vld [vmem:[#allocation2 + $0x1084] sm:$0xf] }
 0x163   :  { %v5194_v58 = vor.u32 %v7406_v10, %v5193_v6  ;;  %v5161_v0 = vld [vmem:[#allocation2 + $0xa8] sm:$0xf]  ;;  %v7059_v34 = vld [vmem:[#allocation2 + $0xf90] sm:$0xf0]  ;;  %v7394_v6 = vld [vmem:[#allocation2 + $0x94] sm:$0xf0] }
 0x164   :  { %4217 = vmatpush.bf16.msrb.mxu2 %v6790_v49  ;;  %4192 = vmatpush.bf16.msrb.mxu0 %v6518_v53  ;;  %v7823_v49 = vld [vmem:[#allocation2 + $0xe04] sm:$0xf]  ;;  %v7187_v44 = vld [vmem:[#allocation2 + $0x1090] sm:$0xf0] }
 0x165   :  { %v7879_v53 = vld [vmem:[#allocation2 + $0xfc4] sm:$0xf]  ;;  %v6870_v61 = vor.u32 %v7823_v49, %v6867_v50  ;;  %v7043_v49 = vld [vmem:[#allocation2 + $0xf70] sm:$0xf0]  ;;  %v7190_v50 = vor.u32 %v7903_v43, %v7187_v44  ;;  %v5097_v44 = vld [vmem:[#allocation2 + $0x28] sm:$0xf] }
 0x166   :  { %4230 = vmatpush.bf16.msrb.mxu3 %v6918_v60  ;;  %4205 = vmatpush.bf16.msrb.mxu1 %v6646_v11  ;;  %v7438_v60 = vld [vmem:[#allocation2 + $0x1f4] sm:$0xf0]  ;;  %v7094_v11 = vor.u32 %v7879_v53, %v7091_v51  ;;  %v7867_v55 = vld [vmem:[#allocation2 + $0xf64] sm:$0xf]  ;;  %v5146_v51 = vor.u32 %v7394_v6, %v5145_v46  ;;  %v7027_v4 = vld [vmem:[#allocation2 + $0xf50] sm:$0xf0] }
 0x167   :  { %v5322_v16 = vor.u32 %v7438_v60, %v5321_v59  ;;  %v7426_v53 = vld [vmem:[#allocation2 + $0x194] sm:$0xf0]  ;;  %v5129_v59 = vld [vmem:[#allocation2 + $0x68] sm:$0xf]  ;;  %v7863_v2 = vld [vmem:[#allocation2 + $0xf44] sm:$0xf] }
 0x168   :  { %4218 = vmatpush.bf16.msrb.mxu2 %v6774_v21  ;;  %4193 = vmatpush.bf16.msrb.mxu0 %v6502_v45  ;;  %v7875_v21 = vld [vmem:[#allocation2 + $0xfa4] sm:$0xf]  ;;  %v5305_v45 = vld [vmem:[#allocation2 + $0x1c8] sm:$0xf]  ;;  %v7390_v60 = vld [vmem:[#allocation2 + $0x74] sm:$0xf0] }
 0x169   :  { %v7078_v26 = vor.u32 %v7875_v21, %v7075_v23  ;;  %v5306_v33 = vor.u32 %v7434_v15, %v5305_v45  ;;  %v5130_v21 = vor.u32 %v7390_v60, %v5129_v59  ;;  %v7155_v45 = vld [vmem:[#allocation2 + $0x1050] sm:$0xf0]  ;;  %v7855_v46 = vld [vmem:[#allocation2 + $0xf04] sm:$0xf]  ;;  %v7378_v59 = vld [vmem:[#allocation2 + $0x14] sm:$0xf0] }
 0x16a   :  { %4231 = vmatpush.bf16.msrb.mxu3 %v6902_v19  ;;  %4206 = vmatpush.bf16.msrb.mxu1 %v6630_v31  ;;  %v7907_v19 = vld [vmem:[#allocation2 + $0x10a4] sm:$0xf]  ;;  %v7398_v31 = vld [vmem:[#allocation2 + $0xb4] sm:$0xf0]  ;;  %v6995_v6 = vld [vmem:[#allocation2 + $0xf10] sm:$0xf0] }
 0x16b   :  { %v5162_v42 = vor.u32 %v7398_v31, %v5161_v0  ;;  %v5577_v60 = vld [vmem:[#allocation2 + $0x3e8] sm:$0xf] }
 0x16c   :  { %4219 = vmatpush.bf16.msrb.mxu2 %v6758_v36  ;;  %4194 = vmatpush.bf16.msrb.mxu0 %v6486_v39  ;;  %v7206_v36 = vor.u32 %v7907_v19, %v7203_v28  ;;  %v3988_v37 = vpop.f32.mrf.mxu0  ;;  %v7430_v39 = vld [vmem:[#allocation2 + $0x1b4] sm:$0xf0]  ;;  %v5113_v28 = vld [vmem:[#allocation2 + $0x48] sm:$0xf] }
 0x16d   :  { %v3989_v40 = vadd.f32 %v3988_v37, %v8463_v20  ;;  %v7899_v20 = vld [vmem:[#allocation2 + $0x1064] sm:$0xf]  ;;  %v5241_v37 = vld [vmem:[#allocation2 + $0x148] sm:$0xf] }
 0x16e   :  { %4232 = vmatpush.bf16.msrb.mxu3 %v6886_v5  ;;  %4207 = vmatpush.bf16.msrb.mxu1 %v6614_v48  ;;  %v7062_v5 = vor.u32 %v7871_v18, %v7059_v34  ;;  %v5290_v48 = vor.u32 %v7430_v39, %v5289_v27  ;;  %v7011_v18 = vld [vmem:[#allocation2 + $0xf30] sm:$0xf0]  ;;  %v7418_v27 = vld [vmem:[#allocation2 + $0x154] sm:$0xf0] }
 0x16f   :  { %4195 = vmatmul.bf16.vlgmr.msrb.gmra.mxu0 %v8347_v54 }
 0x170   :  { %4239 = vmatpush.bf16.msra.mxu0 %v7110_v63  ;;  %4220 = vmatpush.bf16.msrb.mxu2 %v6742_v9  ;;  %v4001_v63 = vpop.f32.mrf.mxu1  ;;  %v5273_v9 = vld [vmem:[#allocation2 + $0x188] sm:$0xf] }
 0x171   :  { %4208 = vmatmul.bf16.vlgmr.msrb.gmra.mxu1 %v8391_v57  ;;  %v4002_v10 = vadd.f32 %v4001_v63, %v3989_v40  ;;  %v7891_v40 = vld [vmem:[#allocation2 + $0x1024] sm:$0xf]  ;;  %v5242_v63 = vor.u32 %v7418_v27, %v5241_v37  ;;  %v7530_v37 = vld [vmem:[#allocation2 + $0x4d4] sm:$0xf0] }
 0x172   :  { %4252 = vmatpush.bf16.msra.mxu1 %v7238_v7  ;;  %4233 = vmatpush.bf16.msrb.mxu3 %v6870_v61  ;;  %v7171_v7 = vld [vmem:[#allocation2 + $0x1070] sm:$0xf0]  ;;  %v5274_v61 = vor.u32 %v7426_v53, %v5273_v9 }
 0x173   :  { %4221 = vmatmul.bf16.vlgmr.msrb.gmra.mxu2 %v8405_v32 }
 0x174   :  { %4265 = vmatpush.bf16.msra.mxu2 %v5194_v58  ;;  %4240 = vmatpush.bf16.msra.mxu0 %v7094_v11  ;;  %v7046_v58 = vor.u32 %v7867_v55, %v7043_v49  ;;  %v7174_v11 = vor.u32 %v7899_v20, %v7171_v7  ;;  %v3990_v12 = vpop.f32.mrf.mxu0  ;;  %v7414_v55 = vld [vmem:[#allocation2 + $0x134] sm:$0xf0]  ;;  %v5449_v49 = vld [vmem:[#allocation2 + $0x2e8] sm:$0xf]  ;;  %v7123_v20 = vld [vmem:[#allocation2 + $0x1010] sm:$0xf0]  ;;  %v6998_v7 = vor.u32 %v7855_v46, %v6995_v6 }
 0x175   :  { %4234 = vmatmul.bf16.vlgmr.msrb.gmra.mxu3 %v8411_v38  ;;  %v5705_v12 = vld [vmem:[#allocation2 + $0x4e8] sm:$0xf]  ;;  %v7494_v46 = vld [vmem:[#allocation2 + $0x3b4] sm:$0xf0] }
 0x176   :  { %4278 = vmatpush.bf16.msra.mxu3 %v5322_v16  ;;  %4253 = vmatpush.bf16.msra.mxu1 %v7222_v14  ;;  %v7422_v16 = vld [vmem:[#allocation2 + $0x174] sm:$0xf0]  ;;  %v4014_v23 = vpop.f32.mrf.mxu2  ;;  %v7895_v14 = vld [vmem:[#allocation2 + $0x1044] sm:$0xf] }
 0x177   :  { %v4015_v15 = vadd.f32 %v4014_v23, %v4002_v10  ;;  %v5258_v0 = vor.u32 %v7422_v16, %v5257_v24  ;;  %v5225_v10 = vld [vmem:[#allocation2 + $0x128] sm:$0xf]  ;;  %v7534_v24 = vld [vmem:[#allocation2 + $0x4f4] sm:$0xf0] }
 0x178   :  { %4266 = vmatpush.bf16.msra.mxu2 %v5178_v1  ;;  %4241 = vmatpush.bf16.msra.mxu0 %v7078_v26  ;;  %v7030_v1 = vor.u32 %v7863_v2, %v7027_v4  ;;  %v4003_v19 = vpop.f32.mrf.mxu1  ;;  %v7386_v26 = vld [vmem:[#allocation2 + $0x54] sm:$0xf0]  ;;  %v4027_v31 = vpop.f32.mrf.mxu3 }
 0x179   :  { %v8470_v34 = vadd.f32 %v4027_v31, %v4015_v15  ;;  %v5114_v39 = vor.u32 %v7386_v26, %v5113_v28  ;;  %v7410_v23 = vld [vmem:[#allocation2 + $0x114] sm:$0xf0]  ;;  %v5706_v19 = vor.u32 %v7534_v24, %v5705_v12  ;;  %v5833_v28 = vld [vmem:[#allocation2 + $0x5e8] sm:$0xf] }
 0x17a   :  { %4279 = vmatpush.bf16.msra.mxu3 %v5306_v33  ;;  %4254 = vmatpush.bf16.msra.mxu1 %v7206_v36  ;;  %v7859_v33 = vld [vmem:[#allocation2 + $0xf24] sm:$0xf]  ;;  %v7158_v36 = vor.u32 %v7895_v14, %v7155_v45  ;;  %v5433_v45 = vld [vmem:[#allocation2 + $0x2c8] sm:$0xf]  ;;  %v7466_v15 = vld [vmem:[#allocation2 + $0x2d4] sm:$0xf0] }
 0x17b   :  { %v7014_v43 = vor.u32 %v7859_v33, %v7011_v18  ;;  %v7566_v26 = vld [vmem:[#allocation2 + $0x5f4] sm:$0xf0]  ;;  %v5561_v31 = vld [vmem:[#allocation2 + $0x3c8] sm:$0xf]  ;;  %v5434_v18 = vor.u32 %v7466_v15, %v5433_v45 }
 0x17c   :  { %4267 = vmatpush.bf16.msra.mxu2 %v5162_v42  ;;  %4242 = vmatpush.bf16.msra.mxu0 %v7062_v5  ;;  %v7139_v42 = vld [vmem:[#allocation2 + $0x1030] sm:$0xf0]  ;;  %v7382_v5 = vld [vmem:[#allocation2 + $0x34] sm:$0xf0]  ;;  %v5834_v27 = vor.u32 %v7566_v26, %v5833_v28  ;;  %v5385_v24 = vld [vmem:[#allocation2 + $0x268] sm:$0xf] }
 0x17d   :  { %v5098_v9 = vor.u32 %v7382_v5, %v5097_v44  ;;  %v7498_v33 = vld [vmem:[#allocation2 + $0x3d4] sm:$0xf0]  ;;  %v5513_v15 = vld [vmem:[#allocation2 + $0x368] sm:$0xf] }
 0x17e   :  { %4280 = vmatpush.bf16.msra.mxu3 %v5290_v48  ;;  %4255 = vmatpush.bf16.msra.mxu1 %v7190_v50  ;;  %v7142_v48 = vor.u32 %v7891_v40, %v7139_v42  ;;  %v7470_v50 = vld [vmem:[#allocation2 + $0x2f4] sm:$0xf0]  ;;  %v4016_v53 = vpop.f32.mrf.mxu2  ;;  %v5562_v42 = vor.u32 %v7498_v33, %v5561_v31  ;;  %v5641_v28 = vld [vmem:[#allocation2 + $0x468] sm:$0xf] }
 0x17f   :  { %v5450_v2 = vor.u32 %v7470_v50, %v5449_v49  ;;  %v7462_v40 = vld [vmem:[#allocation2 + $0x2b4] sm:$0xf0]  ;;  %v5401_v49 = vld [vmem:[#allocation2 + $0x288] sm:$0xf] }
 0x180   :  { %4268 = vmatpush.bf16.msra.mxu2 %v5146_v51  ;;  %4243 = vmatpush.bf16.msra.mxu0 %v7046_v58  ;;  %v7887_v51 = vld [vmem:[#allocation2 + $0x1004] sm:$0xf]  ;;  %v5081_v58 = vld [vmem:[#allocation2 + $0x8] sm:$0xf]  ;;  %v4029_v4 = vpop.f32.mrf.mxu3  ;;  %v7562_v44 = vld [vmem:[#allocation2 + $0x5d4] sm:$0xf0] }
 0x181   :  { %v7126_v16 = vor.u32 %v7887_v51, %v7123_v20  ;;  %v5082_v14 = vor.u32 %v7378_v59, %v5081_v58  ;;  %v7458_v50 = vld [vmem:[#allocation2 + $0x294] sm:$0xf0]  ;;  %v5801_v51 = vld [vmem:[#allocation2 + $0x5a8] sm:$0xf] }
 0x182   :  { %4281 = vmatpush.bf16.msra.mxu3 %v5274_v61  ;;  %4256 = vmatpush.bf16.msra.mxu1 %v7174_v11  ;;  %v5226_v61 = vor.u32 %v7414_v55, %v5225_v10  ;;  %v7502_v11 = vld [vmem:[#allocation2 + $0x3f4] sm:$0xf0]  ;;  %v5673_v10 = vld [vmem:[#allocation2 + $0x4a8] sm:$0xf] }
 0x183   :  { %v7558_v20 = vld [vmem:[#allocation2 + $0x5b4] sm:$0xf0]  ;;  %v5529_v59 = vld [vmem:[#allocation2 + $0x388] sm:$0xf] }
 0x184   :  { %4269 = vmatpush.bf16.msra.mxu2 %v5130_v21  ;;  %4244 = vmatpush.bf16.msra.mxu0 %v7030_v1  ;;  %v5209_v21 = vld [vmem:[#allocation2 + $0x108] sm:$0xf]  ;;  %v5578_v1 = vor.u32 %v7502_v11, %v5577_v60  ;;  %v7490_v60 = vld [vmem:[#allocation2 + $0x394] sm:$0xf0]  ;;  %v5802_v12 = vor.u32 %v7558_v20, %v5801_v51 }
 0x185   :  { %v5657_v4 = vld [vmem:[#allocation2 + $0x488] sm:$0xf]  ;;  %v7522_v11 = vld [vmem:[#allocation2 + $0x494] sm:$0xf0] }
 0x186   :  { %4282 = vmatpush.bf16.msra.mxu3 %v5258_v0  ;;  %4257 = vmatpush.bf16.msra.mxu1 %v7158_v36  ;;  %v5210_v0 = vor.u32 %v7410_v23, %v5209_v21  ;;  %v5689_v36 = vld [vmem:[#allocation2 + $0x4c8] sm:$0xf]  ;;  %v1096_v21 = vperm.slane %v8452_v62, 1  ;;  %v5530_v23 = vor.u32 %v7490_v60, %v5529_v59  ;;  %v7554_v45 = vld [vmem:[#allocation2 + $0x594] sm:$0xf0] }
 0x187   :  { %v5690_v5 = vor.u32 %v7530_v37, %v5689_v36  ;;  %v7518_v26 = vld [vmem:[#allocation2 + $0x474] sm:$0xf0]  ;;  %v5369_v31 = vld [vmem:[#allocation2 + $0x248] sm:$0xf] }
 0x188   :  { %4270 = vmatpush.bf16.msra.mxu2 %v5114_v39  ;;  %4245 = vmatpush.bf16.msra.mxu0 %v7014_v43  ;;  %v5417_v39 = vld [vmem:[#allocation2 + $0x2a8] sm:$0xf]  ;;  %v7450_v33 = vld [vmem:[#allocation2 + $0x254] sm:$0xf0] }
 0x189   :  { %v5817_v43 = vld [vmem:[#allocation2 + $0x5c8] sm:$0xf]  ;;  %v5418_v6 = vor.u32 %v7462_v40, %v5417_v39  ;;  %v7550_v62 = vld [vmem:[#allocation2 + $0x574] sm:$0xf0]  ;;  %v5642_v39 = vor.u32 %v7518_v26, %v5641_v28 }
 0x18a   :  { %4283 = vmatpush.bf16.msra.mxu3 %v5242_v63  ;;  %4258 = vmatpush.bf16.msra.mxu1 %v7142_v48  ;;  %v5545_v63 = vld [vmem:[#allocation2 + $0x3a8] sm:$0xf]  ;;  %v7526_v48 = vld [vmem:[#allocation2 + $0x4b4] sm:$0xf0]  ;;  %v5818_v55 = vor.u32 %v7562_v44, %v5817_v43 }
 0x18b   :  { %v5674_v58 = vor.u32 %v7526_v48, %v5673_v10  ;;  %v5769_v37 = vld [vmem:[#allocation2 + $0x568] sm:$0xf]  ;;  %v7482_v43 = vld [vmem:[#allocation2 + $0x354] sm:$0xf0] }
 0x18c   :  { %4271 = vmatpush.bf16.msra.mxu2 %v5098_v9  ;;  %4246 = vmatpush.bf16.msra.mxu0 %v6998_v7  ;;  %v5546_v9 = vor.u32 %v7494_v46, %v5545_v63  ;;  %v4040_v53 = vpop.f32.mrf.mxu0  ;;  %v5625_v46 = vld [vmem:[#allocation2 + $0x448] sm:$0xf]  ;;  %v5770_v10 = vor.u32 %v7550_v62, %v5769_v37  ;;  %v7546_v51 = vld [vmem:[#allocation2 + $0x554] sm:$0xf0] }
 0x18d   :  { %v8477_v7 = vadd.f32 %v4040_v53, %v8470_v34  ;;  %v5658_v34 = vor.u32 %v7522_v11, %v5657_v4  ;;  %v5753_v53 = vld [vmem:[#allocation2 + $0x548] sm:$0xf]  ;;  %v7478_v59 = vld [vmem:[#allocation2 + $0x334] sm:$0xf0] }
 0x18e   :  { %4284 = vmatpush.bf16.msra.mxu3 %v5226_v61  ;;  %4259 = vmatpush.bf16.msra.mxu1 %v7126_v16  ;;  %v5402_v61 = vor.u32 %v7458_v50, %v5401_v49  ;;  %v7454_v16 = vld [vmem:[#allocation2 + $0x274] sm:$0xf0]  ;;  %v5754_v4 = vor.u32 %v7546_v51, %v5753_v53  ;;  %v5337_v11 = vld [vmem:[#allocation2 + $0x208] sm:$0xf] }
 0x18f   :  { %4247 = vmatmul.bf16.vlgmr.msra.gmra.mxu0 %v8424_v22  ;;  %v7446_v49 = vld [vmem:[#allocation2 + $0x234] sm:$0xf0]  ;;  %v5593_v28 = vld [vmem:[#allocation2 + $0x408] sm:$0xf] }
 0x190   :  { %4291 = vmatpush.bf16.msrb.mxu0 %v5450_v2  ;;  %4272 = vmatpush.bf16.msra.mxu2 %v5082_v14  ;;  %v4053_v2 = vpop.f32.mrf.mxu1  ;;  %v5785_v14 = vld [vmem:[#allocation2 + $0x588] sm:$0xf]  ;;  %v7506_v26 = vld [vmem:[#allocation2 + $0x414] sm:$0xf0] }
 0x191   :  { %4260 = vmatmul.bf16.vlgmr.msra.gmra.mxu1 %v8446_v13  ;;  %v6217_v37 = vld [vmem:[#allocation2 + $0x8e8] sm:$0xf]  ;;  %v7662_v62 = vld [vmem:[#allocation2 + $0x8f4] sm:$0xf0] }
 0x192   :  { %4304 = vmatpush.bf16.msrb.mxu1 %v5578_v1  ;;  %4285 = vmatpush.bf16.msra.mxu3 %v5210_v0  ;;  %v7486_v1 = vld [vmem:[#allocation2 + $0x374] sm:$0xf0]  ;;  %v5786_v0 = vor.u32 %v7554_v45, %v5785_v14 }
 0x193   :  { %4273 = vmatmul.bf16.vlgmr.msra.gmra.mxu2 %v8246_v25  ;;  %v5514_v36 = vor.u32 %v7486_v1, %v5513_v15  ;;  %v7598_v14 = vld [vmem:[#allocation2 + $0x6f4] sm:$0xf0]  ;;  %v5465_v15 = vld [vmem:[#allocation2 + $0x308] sm:$0xf] }
 0x194   :  { %4317 = vmatpush.bf16.msrb.mxu2 %v5706_v19  ;;  %4292 = vmatpush.bf16.msrb.mxu0 %v5434_v18  ;;  %v5386_v19 = vor.u32 %v7454_v16, %v5385_v24  ;;  %v4054_v18 = vadd.f32 %v4053_v2, %v1096_v21  ;;  %v7510_v2 = vld [vmem:[#allocation2 + $0x434] sm:$0xf0]  ;;  %v5737_v24 = vld [vmem:[#allocation2 + $0x528] sm:$0xf] }
 0x195   :  { %4286 = vmatmul.bf16.vlgmr.msra.gmra.mxu3 %v8250_v35  ;;  %v7542_v21 = vld [vmem:[#allocation2 + $0x534] sm:$0xf0] }
 0x196   :  { %4330 = vmatpush.bf16.msrb.mxu3 %v5834_v27  ;;  %4305 = vmatpush.bf16.msrb.mxu1 %v5562_v42  ;;  %v4042_v27 = vpop.f32.mrf.mxu0  ;;  %v4066_v40 = vpop.f32.mrf.mxu2  ;;  %v5497_v42 = vld [vmem:[#allocation2 + $0x348] sm:$0xf]  ;;  %v7474_v1 = vld [vmem:[#allocation2 + $0x314] sm:$0xf0] }
 0x197   :  { %v4067_v44 = vadd.f32 %v4066_v40, %v4054_v18  ;;  %v5466_v27 = vor.u32 %v7474_v1, %v5465_v15  ;;  %v7538_v40 = vld [vmem:[#allocation2 + $0x514] sm:$0xf0]  ;;  %v6313_v15 = vld [vmem:[#allocation2 + $0x9a8] sm:$0xf] }
 0x198   :  { %4318 = vmatpush.bf16.msrb.mxu2 %v5690_v5  ;;  %4293 = vmatpush.bf16.msrb.mxu0 %v5418_v6  ;;  %v5370_v5 = vor.u32 %v7450_v33, %v5369_v31  ;;  %v4055_v63 = vpop.f32.mrf.mxu1  ;;  %v7514_v6 = vld [vmem:[#allocation2 + $0x454] sm:$0xf0]  ;;  %v4079_v48 = vpop.f32.mrf.mxu3  ;;  %v5738_v31 = vor.u32 %v7542_v21, %v5737_v24  ;;  %v6185_v24 = vld [vmem:[#allocation2 + $0x8a8] sm:$0xf] }
 0x199   :  { %v8480_v50 = vadd.f32 %v4079_v48, %v4067_v44  ;;  %v5626_v20 = vor.u32 %v7514_v6, %v5625_v46  ;;  %v7594_v44 = vld [vmem:[#allocation2 + $0x6d4] sm:$0xf0]  ;;  %v6218_v63 = vor.u32 %v7662_v62, %v6217_v37  ;;  %v6345_v46 = vld [vmem:[#allocation2 + $0x9e8] sm:$0xf] }
 0x19a   :  { %4331 = vmatpush.bf16.msrb.mxu3 %v5818_v55  ;;  %4306 = vmatpush.bf16.msrb.mxu1 %v5546_v9  ;;  %v5353_v55 = vld [vmem:[#allocation2 + $0x228] sm:$0xf]  ;;  %v5498_v9 = vor.u32 %v7482_v43, %v5497_v42  ;;  %v5594_v42 = vor.u32 %v7506_v26, %v5593_v28  ;;  %v7694_v6 = vld [vmem:[#allocation2 + $0x9f4] sm:$0xf0] }
 0x19b   :  { %v5354_v60 = vor.u32 %v7446_v49, %v5353_v55  ;;  %v5945_v43 = vld [vmem:[#allocation2 + $0x6c8] sm:$0xf]  ;;  %v7626_v55 = vld [vmem:[#allocation2 + $0x7d4] sm:$0xf0]  ;;  %v6346_v51 = vor.u32 %v7694_v6, %v6345_v46 }
 0x19c   :  { %4319 = vmatpush.bf16.msrb.mxu2 %v5674_v58  ;;  %4294 = vmatpush.bf16.msrb.mxu0 %v5402_v61  ;;  %v5481_v58 = vld [vmem:[#allocation2 + $0x328] sm:$0xf]  ;;  %v5946_v49 = vor.u32 %v7594_v44, %v5945_v43  ;;  %v7658_v53 = vld [vmem:[#allocation2 + $0x8d4] sm:$0xf0] }
 0x19d   :  { %v5609_v61 = vld [vmem:[#allocation2 + $0x428] sm:$0xf]  ;;  %v5482_v16 = vor.u32 %v7478_v59, %v5481_v58  ;;  %v7590_v58 = vld [vmem:[#allocation2 + $0x6b4] sm:$0xf0] }
 0x19e   :  { %4332 = vmatpush.bf16.msrb.mxu3 %v5802_v12  ;;  %4307 = vmatpush.bf16.msrb.mxu1 %v5530_v23  ;;  %v7442_v12 = vld [vmem:[#allocation2 + $0x214] sm:$0xf0]  ;;  %v5961_v23 = vld [vmem:[#allocation2 + $0x6e8] sm:$0xf]  ;;  %v5610_v45 = vor.u32 %v7510_v2, %v5609_v61 }
 0x19f   :  { %v5962_v33 = vor.u32 %v7598_v14, %v5961_v23  ;;  %v6073_v48 = vld [vmem:[#allocation2 + $0x7c8] sm:$0xf]  ;;  %v7690_v61 = vld [vmem:[#allocation2 + $0x9d4] sm:$0xf0] }
 0x1a0   :  { %4320 = vmatpush.bf16.msrb.mxu2 %v5658_v34  ;;  %4295 = vmatpush.bf16.msrb.mxu0 %v5386_v19  ;;  %v4068_v34 = vpop.f32.mrf.mxu2  ;;  %v5338_v19 = vor.u32 %v7442_v12, %v5337_v11  ;;  %v4081_v18 = vpop.f32.mrf.mxu3  ;;  %v6074_v59 = vor.u32 %v7626_v55, %v6073_v48  ;;  %v7622_v11 = vld [vmem:[#allocation2 + $0x7b4] sm:$0xf0]  ;;  %v5913_v23 = vld [vmem:[#allocation2 + $0x688] sm:$0xf] }
 0x1a1   :  { %v7586_v14 = vld [vmem:[#allocation2 + $0x694] sm:$0xf0]  ;;  %v6041_v26 = vld [vmem:[#allocation2 + $0x788] sm:$0xf] }
 0x1a2   :  { %4333 = vmatpush.bf16.msrb.mxu3 %v5786_v0  ;;  %4308 = vmatpush.bf16.msrb.mxu1 %v5514_v36  ;;  %v6089_v0 = vld [vmem:[#allocation2 + $0x7e8] sm:$0xf]  ;;  %v7630_v36 = vld [vmem:[#allocation2 + $0x7f4] sm:$0xf0] }
 0x1a3   :  { %v7686_v1 = vld [vmem:[#allocation2 + $0x9b4] sm:$0xf0]  ;;  %v6169_v18 = vld [vmem:[#allocation2 + $0x888] sm:$0xf] }
 0x1a4   :  { %4321 = vmatpush.bf16.msrb.mxu2 %v5642_v39  ;;  %4296 = vmatpush.bf16.msrb.mxu0 %v5370_v5  ;;  %v5721_v39 = vld [vmem:[#allocation2 + $0x508] sm:$0xf]  ;;  %v6090_v5 = vor.u32 %v7630_v36, %v6089_v0  ;;  %v7618_v0 = vld [vmem:[#allocation2 + $0x794] sm:$0xf0]  ;;  %v6314_v62 = vor.u32 %v7686_v1, %v6313_v15 }
 0x1a5   :  { %v7650_v36 = vld [vmem:[#allocation2 + $0x894] sm:$0xf0]  ;;  %v6153_v46 = vld [vmem:[#allocation2 + $0x868] sm:$0xf] }
 0x1a6   :  { %4334 = vmatpush.bf16.msrb.mxu3 %v5770_v10  ;;  %4309 = vmatpush.bf16.msrb.mxu1 %v5498_v9  ;;  %v5722_v10 = vor.u32 %v7538_v40, %v5721_v39  ;;  %v6201_v9 = vld [vmem:[#allocation2 + $0x8c8] sm:$0xf]  ;;  %v7582_v39 = vld [vmem:[#allocation2 + $0x674] sm:$0xf0]  ;;  %v6042_v40 = vor.u32 %v7618_v0, %v6041_v26  ;;  %v6170_v44 = vor.u32 %v7650_v36, %v6169_v18 }
 0x1a7   :  { %v6202_v2 = vor.u32 %v7658_v53, %v6201_v9  ;;  %v7682_v43 = vld [vmem:[#allocation2 + $0x994] sm:$0xf0]  ;;  %v5881_v48 = vld [vmem:[#allocation2 + $0x648] sm:$0xf] }
 0x1a8   :  { %4322 = vmatpush.bf16.msrb.mxu2 %v5626_v20  ;;  %4297 = vmatpush.bf16.msrb.mxu0 %v5354_v60  ;;  %v5929_v20 = vld [vmem:[#allocation2 + $0x6a8] sm:$0xf]  ;;  %v7646_v6 = vld [vmem:[#allocation2 + $0x874] sm:$0xf0] }
 0x1a9   :  { %v6329_v60 = vld [vmem:[#allocation2 + $0x9c8] sm:$0xf]  ;;  %v5930_v12 = vor.u32 %v7590_v58, %v5929_v20  ;;  %v7578_v55 = vld [vmem:[#allocation2 + $0x654] sm:$0xf0]  ;;  %v6154_v20 = vor.u32 %v7646_v6, %v6153_v46 }
 0x1aa   :  { %4335 = vmatpush.bf16.msrb.mxu3 %v5754_v4  ;;  %4310 = vmatpush.bf16.msrb.mxu1 %v5482_v16  ;;  %v6057_v4 = vld [vmem:[#allocation2 + $0x7a8] sm:$0xf]  ;;  %v7654_v16 = vld [vmem:[#allocation2 + $0x8b4] sm:$0xf0]  ;;  %v6330_v21 = vor.u32 %v7690_v61, %v6329_v60 }
 0x1ab   :  { %v6186_v28 = vor.u32 %v7654_v16, %v6185_v24  ;;  %v6281_v53 = vld [vmem:[#allocation2 + $0x968] sm:$0xf]  ;;  %v7610_v60 = vld [vmem:[#allocation2 + $0x754] sm:$0xf0] }
 0x1ac   :  { %4323 = vmatpush.bf16.msrb.mxu2 %v5610_v45  ;;  %4298 = vmatpush.bf16.msrb.mxu0 %v5338_v19  ;;  %v6058_v45 = vor.u32 %v7622_v11, %v6057_v4  ;;  %v4092_v34 = vpop.f32.mrf.mxu0  ;;  %v6137_v11 = vld [vmem:[#allocation2 + $0x848] sm:$0xf]  ;;  %v7674_v15 = vld [vmem:[#allocation2 + $0x954] sm:$0xf0] }
 0x1ad   :  { %v4093_v19 = vadd.f32 %v4092_v34, %v8480_v50  ;;  %v6025_v50 = vld [vmem:[#allocation2 + $0x768] sm:$0xf]  ;;  %v7570_v36 = vld [vmem:[#allocation2 + $0x614] sm:$0xf0] }
 0x1ae   :  { %4336 = vmatpush.bf16.msrb.mxu3 %v5738_v31  ;;  %4311 = vmatpush.bf16.msrb.mxu1 %v5466_v27  ;;  %v5914_v31 = vor.u32 %v7586_v14, %v5913_v23  ;;  %v5897_v27 = vld [vmem:[#allocation2 + $0x668] sm:$0xf]  ;;  %v7574_v23 = vld [vmem:[#allocation2 + $0x634] sm:$0xf0] }
 0x1af   :  { %4299 = vmatmul.bf16.vlgmr.msrb.gmra.mxu0 %v8256_v47  ;;  %v6265_v34 = vld [vmem:[#allocation2 + $0x948] sm:$0xf]  ;;  %v7634_v46 = vld [vmem:[#allocation2 + $0x814] sm:$0xf0] }
 0x1b0   :  { %4343 = vmatpush.bf16.msra.mxu0 %v5962_v33  ;;  %4324 = vmatpush.bf16.msrb.mxu2 %v5594_v42  ;;  %v4105_v33 = vpop.f32.mrf.mxu1  ;;  %v6297_v42 = vld [vmem:[#allocation2 + $0x988] sm:$0xf] }
 0x1b1   :  { %4312 = vmatmul.bf16.vlgmr.msrb.gmra.mxu1 %v8263_v56  ;;  %v4106_v37 = vadd.f32 %v4105_v33, %v4093_v19  ;;  %v5993_v19 = vld [vmem:[#allocation2 + $0x728] sm:$0xf]  ;;  %v6266_v33 = vor.u32 %v7674_v15, %v6265_v34  ;;  %v7786_v34 = vld [vmem:[#allocation2 + $0xcd4] sm:$0xf0] }
 0x1b2   :  { %4356 = vmatpush.bf16.msra.mxu1 %v6090_v5  ;;  %4337 = vmatpush.bf16.msrb.mxu3 %v5722_v10  ;;  %v7614_v5 = vld [vmem:[#allocation2 + $0x774] sm:$0xf0]  ;;  %v6298_v10 = vor.u32 %v7682_v43, %v6297_v42  ;;  %v6121_v0 = vld [vmem:[#allocation2 + $0x828] sm:$0xf] }
 0x1b3   :  { %4325 = vmatmul.bf16.vlgmr.msrb.gmra.mxu2 %v8303_v52  ;;  %v5849_v18 = vld [vmem:[#allocation2 + $0x608] sm:$0xf] }
 0x1b4   :  { %4369 = vmatpush.bf16.msra.mxu2 %v6218_v63  ;;  %4344 = vmatpush.bf16.msra.mxu0 %v5946_v49  ;;  %v5898_v63 = vor.u32 %v7582_v39, %v5897_v27  ;;  %v6026_v49 = vor.u32 %v7614_v5, %v6025_v50  ;;  %v4094_v9 = vpop.f32.mrf.mxu0  ;;  %v7670_v27 = vld [vmem:[#allocation2 + $0x934] sm:$0xf0]  ;;  %v6473_v39 = vld [vmem:[#allocation2 + $0xae8] sm:$0xf]  ;;  %v5850_v5 = vor.u32 %v7570_v36, %v5849_v18 }
 0x1b5   :  { %4338 = vmatmul.bf16.vlgmr.msrb.gmra.mxu3 %v8305_v8  ;;  %v7602_v50 = vld [vmem:[#allocation2 + $0x714] sm:$0xf0]  ;;  %v6601_v6 = vld [vmem:[#allocation2 + $0xbe8] sm:$0xf] }
 0x1b6   :  { %4382 = vmatpush.bf16.msra.mxu3 %v6346_v51  ;;  %4357 = vmatpush.bf16.msra.mxu1 %v6074_v59  ;;  %v7678_v51 = vld [vmem:[#allocation2 + $0x974] sm:$0xf0]  ;;  %v4118_v58 = vpop.f32.mrf.mxu2  ;;  %v6009_v59 = vld [vmem:[#allocation2 + $0x748] sm:$0xf] }
 0x1b7   :  { %v4119_v61 = vadd.f32 %v4118_v58, %v4106_v37  ;;  %v6282_v24 = vor.u32 %v7678_v51, %v6281_v53  ;;  %v6249_v37 = vld [vmem:[#allocation2 + $0x928] sm:$0xf]  ;;  %v7790_v53 = vld [vmem:[#allocation2 + $0xcf4] sm:$0xf0] }
 0x1b8   :  { %4370 = vmatpush.bf16.msra.mxu2 %v6202_v2  ;;  %4345 = vmatpush.bf16.msra.mxu0 %v5930_v12  ;;  %v5882_v2 = vor.u32 %v7578_v55, %v5881_v48  ;;  %v4107_v4 = vpop.f32.mrf.mxu1  ;;  %v7642_v12 = vld [vmem:[#allocation2 + $0x854] sm:$0xf0]  ;;  %v4131_v16 = vpop.f32.mrf.mxu3  ;;  %v6729_v9 = vld [vmem:[#allocation2 + $0xce8] sm:$0xf] }
 0x1b9   :  { %v8487_v14 = vadd.f32 %v4131_v16, %v4119_v61  ;;  %v6138_v1 = vor.u32 %v7642_v12, %v6137_v11  ;;  %v7666_v58 = vld [vmem:[#allocation2 + $0x914] sm:$0xf0]  ;;  %v6730_v4 = vor.u32 %v7790_v53, %v6729_v9  ;;  %v6857_v11 = vld [vmem:[#allocation2 + $0xde8] sm:$0xf] }
 0x1ba   :  { %4383 = vmatpush.bf16.msra.mxu3 %v6330_v21  ;;  %4358 = vmatpush.bf16.msra.mxu1 %v6058_v45  ;;  %v5865_v21 = vld [vmem:[#allocation2 + $0x628] sm:$0xf]  ;;  %v6010_v45 = vor.u32 %v7610_v60, %v6009_v59  ;;  %v7722_v61 = vld [vmem:[#allocation2 + $0xad4] sm:$0xf0] }
 0x1bb   :  { %v5866_v26 = vor.u32 %v7574_v23, %v5865_v21  ;;  %v6457_v60 = vld [vmem:[#allocation2 + $0xac8] sm:$0xf]  ;;  %v7822_v12 = vld [vmem:[#allocation2 + $0xdf4] sm:$0xf0] }
 0x1bc   :  { %4371 = vmatpush.bf16.msra.mxu2 %v6186_v28  ;;  %4346 = vmatpush.bf16.msra.mxu0 %v5914_v31  ;;  %v7606_v28 = vld [vmem:[#allocation2 + $0x734] sm:$0xf0]  ;;  %v6585_v16 = vld [vmem:[#allocation2 + $0xbc8] sm:$0xf]  ;;  %v6458_v23 = vor.u32 %v7722_v61, %v6457_v60  ;;  %v6858_v15 = vor.u32 %v7822_v12, %v6857_v11 }
 0x1bd   :  { %v7638_v31 = vld [vmem:[#allocation2 + $0x834] sm:$0xf0]  ;;  %v6665_v11 = vld [vmem:[#allocation2 + $0xc68] sm:$0xf] }
 0x1be   :  { %4384 = vmatpush.bf16.msra.mxu3 %v6314_v62  ;;  %4359 = vmatpush.bf16.msra.mxu1 %v6042_v40  ;;  %v5994_v62 = vor.u32 %v7606_v28, %v5993_v19  ;;  %v7726_v40 = vld [vmem:[#allocation2 + $0xaf4] sm:$0xf0]  ;;  %v6122_v42 = vor.u32 %v7638_v31, %v6121_v0  ;;  %v4120_v43 = vpop.f32.mrf.mxu2 }
 0x1bf   :  { %v6474_v48 = vor.u32 %v7726_v40, %v6473_v39  ;;  %v7754_v21 = vld [vmem:[#allocation2 + $0xbd4] sm:$0xf0]  ;;  %v6425_v39 = vld [vmem:[#allocation2 + $0xa88] sm:$0xf] }
 0x1c0   :  { %4372 = vmatpush.bf16.msra.mxu2 %v6170_v44  ;;  %4347 = vmatpush.bf16.msra.mxu0 %v5898_v63  ;;  %v5977_v44 = vld [vmem:[#allocation2 + $0x708] sm:$0xf]  ;;  %v4133_v55 = vpop.f32.mrf.mxu3  ;;  %v7718_v19 = vld [vmem:[#allocation2 + $0xab4] sm:$0xf0]  ;;  %v6586_v28 = vor.u32 %v7754_v21, %v6585_v16 }
 0x1c1   :  { %v6105_v63 = vld [vmem:[#allocation2 + $0x808] sm:$0xf]  ;;  %v5978_v51 = vor.u32 %v7602_v50, %v5977_v44  ;;  %v7818_v0 = vld [vmem:[#allocation2 + $0xdd4] sm:$0xf0] }
 0x1c2   :  { %4385 = vmatpush.bf16.msra.mxu3 %v6298_v10  ;;  %4360 = vmatpush.bf16.msra.mxu1 %v6026_v49  ;;  %v6250_v10 = vor.u32 %v7670_v27, %v6249_v37  ;;  %v7758_v49 = vld [vmem:[#allocation2 + $0xbf4] sm:$0xf0]  ;;  %v6106_v59 = vor.u32 %v7634_v46, %v6105_v63  ;;  %v6697_v37 = vld [vmem:[#allocation2 + $0xca8] sm:$0xf] }
 0x1c3   :  { %v7750_v18 = vld [vmem:[#allocation2 + $0xbb4] sm:$0xf0]  ;;  %v6825_v44 = vld [vmem:[#allocation2 + $0xda8] sm:$0xf] }
 0x1c4   :  { %4373 = vmatpush.bf16.msra.mxu2 %v6154_v20  ;;  %4348 = vmatpush.bf16.msra.mxu0 %v5882_v2  ;;  %v6233_v20 = vld [vmem:[#allocation2 + $0x908] sm:$0xf]  ;;  %v6602_v2 = vor.u32 %v7758_v49, %v6601_v6  ;;  %v7714_v40 = vld [vmem:[#allocation2 + $0xa94] sm:$0xf0] }
 0x1c5   :  { %v7814_v50 = vld [vmem:[#allocation2 + $0xdb4] sm:$0xf0]  ;;  %v6553_v46 = vld [vmem:[#allocation2 + $0xb88] sm:$0xf] }
 0x1c6   :  { %4386 = vmatpush.bf16.msra.mxu3 %v6282_v24  ;;  %4361 = vmatpush.bf16.msra.mxu1 %v6010_v45  ;;  %v6234_v24 = vor.u32 %v7666_v58, %v6233_v20  ;;  %v6713_v45 = vld [vmem:[#allocation2 + $0xcc8] sm:$0xf]  ;;  %v7746_v6 = vld [vmem:[#allocation2 + $0xb94] sm:$0xf0]  ;;  %v6826_v53 = vor.u32 %v7814_v50, %v6825_v44 }
 0x1c7   :  { %v6714_v31 = vor.u32 %v7786_v34, %v6713_v45  ;;  %v6681_v55 = vld [vmem:[#allocation2 + $0xc88] sm:$0xf]  ;;  %v7778_v49 = vld [vmem:[#allocation2 + $0xc94] sm:$0xf0]  ;;  %v6554_v58 = vor.u32 %v7746_v6, %v6553_v46 }
 0x1c8   :  { %4374 = vmatpush.bf16.msra.mxu2 %v6138_v1  ;;  %4349 = vmatpush.bf16.msra.mxu0 %v5866_v26  ;;  %v6441_v1 = vld [vmem:[#allocation2 + $0xaa8] sm:$0xf]  ;;  %v7710_v20 = vld [vmem:[#allocation2 + $0xa74] sm:$0xf0]  ;;  %v6682_v61 = vor.u32 %v7778_v49, %v6681_v55 }
 0x1c9   :  { %v6841_v26 = vld [vmem:[#allocation2 + $0xdc8] sm:$0xf]  ;;  %v6442_v36 = vor.u32 %v7718_v19, %v6441_v1  ;;  %v7810_v60 = vld [vmem:[#allocation2 + $0xd94] sm:$0xf0] }
 0x1ca   :  { %4387 = vmatpush.bf16.msra.mxu3 %v6266_v33  ;;  %4362 = vmatpush.bf16.msra.mxu1 %v5994_v62  ;;  %v6569_v33 = vld [vmem:[#allocation2 + $0xba8] sm:$0xf]  ;;  %v7782_v62 = vld [vmem:[#allocation2 + $0xcb4] sm:$0xf0]  ;;  %v6842_v27 = vor.u32 %v7818_v0, %v6841_v26 }
 0x1cb   :  { %v6698_v63 = vor.u32 %v7782_v62, %v6697_v37  ;;  %v7774_v12 = vld [vmem:[#allocation2 + $0xc74] sm:$0xf0]  ;;  %v6393_v16 = vld [vmem:[#allocation2 + $0xa48] sm:$0xf] }
 0x1cc   :  { %4375 = vmatpush.bf16.msra.mxu2 %v6122_v42  ;;  %4350 = vmatpush.bf16.msra.mxu0 %v5850_v5  ;;  %v6570_v42 = vor.u32 %v7750_v18, %v6569_v33  ;;  %v4144_v43 = vpop.f32.mrf.mxu0  ;;  %v7706_v21 = vld [vmem:[#allocation2 + $0xa54] sm:$0xf0]  ;;  %v6793_v34 = vld [vmem:[#allocation2 + $0xd68] sm:$0xf]  ;;  %v6666_v1 = vor.u32 %v7774_v12, %v6665_v11 }
 0x1cd   :  { %v4145_v5 = vadd.f32 %v4144_v43, %v8487_v14  ;;  %v6537_v14 = vld [vmem:[#allocation2 + $0xb68] sm:$0xf]  ;;  %v7738_v26 = vld [vmem:[#allocation2 + $0xb54] sm:$0xf0] }
 0x1ce   :  { %4388 = vmatpush.bf16.msra.mxu3 %v6250_v10  ;;  %4363 = vmatpush.bf16.msra.mxu1 %v5978_v51  ;;  %v6426_v10 = vor.u32 %v7714_v40, %v6425_v39  ;;  %v6409_v51 = vld [vmem:[#allocation2 + $0xa68] sm:$0xf]  ;;  %v7702_v39 = vld [vmem:[#allocation2 + $0xa34] sm:$0xf0] }
 0x1cf   :  { %4351 = vmatmul.bf16.vlgmr.msra.gmra.mxu0 %v8311_v17  ;;  %v6649_v18 = vld [vmem:[#allocation2 + $0xc48] sm:$0xf]  ;;  %v7802_v44 = vld [vmem:[#allocation2 + $0xd54] sm:$0xf0] }
 0x1d0   :  { %4395 = vmatpush.bf16.msrb.mxu0 %v6474_v48  ;;  %4376 = vmatpush.bf16.msra.mxu2 %v6106_v59  ;;  %v4157_v48 = vpop.f32.mrf.mxu1  ;;  %v6809_v59 = vld [vmem:[#allocation2 + $0xd88] sm:$0xf]  ;;  %v7698_v49 = vld [vmem:[#allocation2 + $0xa14] sm:$0xf0] }
 0x1d1   :  { %4364 = vmatmul.bf16.vlgmr.msra.gmra.mxu1 %v8322_v30  ;;  %v4158_v9 = vadd.f32 %v4157_v48, %v4145_v5  ;;  %v6777_v43 = vld [vmem:[#allocation2 + $0xd48] sm:$0xf]  ;;  %v7762_v11 = vld [vmem:[#allocation2 + $0xc14] sm:$0xf0] }
 0x1d2   :  { %4408 = vmatpush.bf16.msrb.mxu1 %v6602_v2  ;;  %4389 = vmatpush.bf16.msra.mxu3 %v6234_v24  ;;  %v7742_v2 = vld [vmem:[#allocation2 + $0xb74] sm:$0xf0]  ;;  %v6810_v24 = vor.u32 %v7810_v60, %v6809_v59  ;;  %v6505_v5 = vld [vmem:[#allocation2 + $0xb28] sm:$0xf]  ;;  %v6778_v48 = vor.u32 %v7802_v44, %v6777_v43 }
 0x1d3   :  { %4377 = vmatmul.bf16.vlgmr.msra.gmra.mxu2 %v8338_v29  ;;  %v6633_v6 = vld [vmem:[#allocation2 + $0xc28] sm:$0xf]  ;;  %v7914_v43 = vld [vmem:[#allocation2 + $0x10d4] sm:$0xf0] }
 0x1d4   :  { %4421 = vmatpush.bf16.msrb.mxu2 %v6730_v4  ;;  %4396 = vmatpush.bf16.msrb.mxu0 %v6458_v23  ;;  %v6410_v4 = vor.u32 %v7710_v20, %v6409_v51  ;;  %v6538_v23 = vor.u32 %v7742_v2, %v6537_v14  ;;  %v4146_v45 = vpop.f32.mrf.mxu0  ;;  %v6361_v55 = vld [vmem:[#allocation2 + $0xa08] sm:$0xf]  ;;  %v7798_v51 = vld [vmem:[#allocation2 + $0xd34] sm:$0xf0] }
 0x1d5   :  { %4390 = vmatmul.bf16.vlgmr.msra.gmra.mxu3 %v8341_v41  ;;  %v6985_v20 = vld [vmem:[#allocation2 + $0xee8] sm:$0xf]  ;;  %v7730_v14 = vld [vmem:[#allocation2 + $0xb14] sm:$0xf0]  ;;  %v6362_v2 = vor.u32 %v7698_v49, %v6361_v55 }
 0x1d6   :  { %4434 = vmatpush.bf16.msrb.mxu3 %v6858_v15  ;;  %4409 = vmatpush.bf16.msrb.mxu1 %v6586_v28  ;;  %v7806_v15 = vld [vmem:[#allocation2 + $0xd74] sm:$0xf0]  ;;  %v4170_v19 = vpop.f32.mrf.mxu2  ;;  %v6521_v28 = vld [vmem:[#allocation2 + $0xb48] sm:$0xf] }
 0x1d7   :  { %v4171_v0 = vadd.f32 %v4170_v19, %v4158_v9  ;;  %v6794_v37 = vor.u32 %v7806_v15, %v6793_v34  ;;  %v6761_v9 = vld [vmem:[#allocation2 + $0xd28] sm:$0xf]  ;;  %v7918_v34 = vld [vmem:[#allocation2 + $0x10f4] sm:$0xf0] }
 0x1d8   :  { %4422 = vmatpush.bf16.msrb.mxu2 %v6714_v31  ;;  %4397 = vmatpush.bf16.msrb.mxu0 %v6442_v36  ;;  %v6394_v31 = vor.u32 %v7706_v21, %v6393_v16  ;;  %v4159_v33 = vpop.f32.mrf.mxu1  ;;  %v7770_v36 = vld [vmem:[#allocation2 + $0xc54] sm:$0xf0]  ;;  %v4183_v62 = vpop.f32.mrf.mxu3  ;;  %v7113_v12 = vld [vmem:[#allocation2 + $0xfe8] sm:$0xf] }
 0x1d9   :  { %v8494_v40 = vadd.f32 %v4183_v62, %v4171_v0  ;;  %v6650_v50 = vor.u32 %v7770_v36, %v6649_v18  ;;  %v7241_v45 = vld [vmem:[#allocation2 + $0x10e8] sm:$0xf]  ;;  %v7794_v19 = vld [vmem:[#allocation2 + $0xd14] sm:$0xf0]  ;;  %v7404_v18 = vld [vmem:[#allocation2 + $0xec] sm:$0xf] }
 0x1da   :  { %4435 = vmatpush.bf16.msrb.mxu3 %v6842_v27  ;;  %4410 = vmatpush.bf16.msrb.mxu1 %v6570_v42  ;;  %v6377_v27 = vld [vmem:[#allocation2 + $0xa28] sm:$0xf]  ;;  %v6522_v42 = vor.u32 %v7738_v26, %v6521_v28  ;;  %v7850_v0 = vld [vmem:[#allocation2 + $0xed4] sm:$0xf0]  ;;  %v7242_v33 = vor.u32 %v7918_v34, %v7241_v45  ;;  %v5195_v36 = vld [vmem:[#allocation2 + $0xf8] sm:$0xf0] }
 0x1db   :  { %v6378_v46 = vor.u32 %v7702_v39, %v6377_v27  ;;  %v6969_v26 = vld [vmem:[#allocation2 + $0xec8] sm:$0xf]  ;;  %v7882_v27 = vld [vmem:[#allocation2 + $0xfd4] sm:$0xf0]  ;;  %v5198_v44 = vor.u32 %v7404_v18, %v5195_v36 }
 0x1dc   :  { %4423 = vmatpush.bf16.msrb.mxu2 %v6698_v63  ;;  %4398 = vmatpush.bf16.msrb.mxu0 %v6426_v10  ;;  %v7734_v63 = vld [vmem:[#allocation2 + $0xb34] sm:$0xf0]  ;;  %v7097_v62 = vld [vmem:[#allocation2 + $0xfc8] sm:$0xf]  ;;  %v6970_v39 = vor.u32 %v7850_v0, %v6969_v26  ;;  %v5147_v26 = vld [vmem:[#allocation2 + $0x98] sm:$0xf0] }
 0x1dd   :  { %v7766_v10 = vld [vmem:[#allocation2 + $0xc34] sm:$0xf0]  ;;  %v7177_v18 = vld [vmem:[#allocation2 + $0x1068] sm:$0xf] }
 0x1de   :  { %4436 = vmatpush.bf16.msrb.mxu3 %v6826_v53  ;;  %4411 = vmatpush.bf16.msrb.mxu1 %v6554_v58  ;;  %v6506_v53 = vor.u32 %v7734_v63, %v6505_v5  ;;  %v7854_v58 = vld [vmem:[#allocation2 + $0xef4] sm:$0xf0]  ;;  %v6634_v59 = vor.u32 %v7766_v10, %v6633_v6  ;;  %v4172_v60 = vpop.f32.mrf.mxu2  ;;  %v7098_v63 = vor.u32 %v7882_v27, %v7097_v62  ;;  %v5179_v6 = vld [vmem:[#allocation2 + $0xd8] sm:$0xf0]  ;;  %v6905_v62 = vld [vmem:[#allocation2 + $0xe48] sm:$0xf] }
 0x1df   :  { %v6986_v16 = vor.u32 %v7854_v58, %v6985_v20  ;;  %v7846_v5 = vld [vmem:[#allocation2 + $0xeb4] sm:$0xf0]  ;;  %v6937_v20 = vld [vmem:[#allocation2 + $0xe88] sm:$0xf] }
 0x1e0   :  { %4424 = vmatpush.bf16.msrb.mxu2 %v6682_v61  ;;  %4399 = vmatpush.bf16.msrb.mxu0 %v6410_v4  ;;  %v6489_v61 = vld [vmem:[#allocation2 + $0xb08] sm:$0xf]  ;;  %v4185_v21 = vpop.f32.mrf.mxu3  ;;  %v7878_v55 = vld [vmem:[#allocation2 + $0xfb4] sm:$0xf0] }
 0x1e1   :  { %v6617_v4 = vld [vmem:[#allocation2 + $0xc08] sm:$0xf]  ;;  %v6490_v15 = vor.u32 %v7730_v14, %v6489_v61  ;;  %v7842_v58 = vld [vmem:[#allocation2 + $0xe94] sm:$0xf0]  ;;  %v7396_v61 = vld [vmem:[#allocation2 + $0xac] sm:$0xf] }
 0x1e2   :  { %4437 = vmatpush.bf16.msrb.mxu3 %v6810_v24  ;;  %4412 = vmatpush.bf16.msrb.mxu1 %v6538_v23  ;;  %v6762_v24 = vor.u32 %v7798_v51, %v6761_v9  ;;  %v7886_v23 = vld [vmem:[#allocation2 + $0xff4] sm:$0xf0]  ;;  %v6618_v28 = vor.u32 %v7762_v11, %v6617_v4  ;;  %v7209_v9 = vld [vmem:[#allocation2 + $0x10a8] sm:$0xf]  ;;  %v5163_v14 = vld [vmem:[#allocation2 + $0xb8] sm:$0xf0] }
 0x1e3   :  { %v7065_v11 = vld [vmem:[#allocation2 + $0xf88] sm:$0xf]  ;;  %v5166_v34 = vor.u32 %v7396_v61, %v5163_v14  ;;  %v7902_v36 = vld [vmem:[#allocation2 + $0x1074] sm:$0xf0]  ;;  %v5115_v61 = vld [vmem:[#allocation2 + $0x58] sm:$0xf0] }
 0x1e4   :  { %4425 = vmatpush.bf16.msrb.mxu2 %v6666_v1  ;;  %4400 = vmatpush.bf16.msrb.mxu0 %v6394_v31  ;;  %v6745_v1 = vld [vmem:[#allocation2 + $0xd08] sm:$0xf]  ;;  %v7114_v31 = vor.u32 %v7886_v23, %v7113_v12  ;;  %v7874_v12 = vld [vmem:[#allocation2 + $0xf94] sm:$0xf0] }
 0x1e5   :  { %v7193_v21 = vld [vmem:[#allocation2 + $0x1088] sm:$0xf]  ;;  %v7906_v23 = vld [vmem:[#allocation2 + $0x1094] sm:$0xf0] }
 0x1e6   :  { %4438 = vmatpush.bf16.msrb.mxu3 %v6794_v37  ;;  %4413 = vmatpush.bf16.msrb.mxu1 %v6522_v42  ;;  %v6746_v37 = vor.u32 %v7794_v19, %v6745_v1  ;;  %v7225_v42 = vld [vmem:[#allocation2 + $0x10c8] sm:$0xf]  ;;  %v7838_v1 = vld [vmem:[#allocation2 + $0xe74] sm:$0xf0]  ;;  %v7066_v19 = vor.u32 %v7874_v12, %v7065_v11  ;;  %v7194_v0 = vor.u32 %v7906_v23, %v7193_v21 }
 0x1e7   :  { %v7226_v10 = vor.u32 %v7914_v43, %v7225_v42  ;;  %v7834_v27 = vld [vmem:[#allocation2 + $0xe54] sm:$0xf0]  ;;  %v7388_v43 = vld [vmem:[#allocation2 + $0x6c] sm:$0xf]  ;;  %v7145_v12 = vld [vmem:[#allocation2 + $0x1028] sm:$0xf] }
 0x1e8   :  { %4426 = vmatpush.bf16.msrb.mxu2 %v6650_v50  ;;  %4401 = vmatpush.bf16.msrb.mxu0 %v6378_v46  ;;  %v6953_v50 = vld [vmem:[#allocation2 + $0xea8] sm:$0xf]  ;;  %v7400_v46 = vld [vmem:[#allocation2 + $0xcc] sm:$0xf]  ;;  %v7826_v23 = vld [vmem:[#allocation2 + $0xe14] sm:$0xf0] }
 0x1e9   :  { %v6954_v49 = vor.u32 %v7846_v5, %v6953_v50  ;;  %v5182_v51 = vor.u32 %v7400_v46, %v5179_v6  ;;  %v7178_v50 = vor.u32 %v7902_v36, %v7177_v18  ;;  %v7866_v46 = vld [vmem:[#allocation2 + $0xf54] sm:$0xf0]  ;;  %v6873_v21 = vld [vmem:[#allocation2 + $0xe08] sm:$0xf]  ;;  %v7468_v36 = vld [vmem:[#allocation2 + $0x2ec] sm:$0xf] }
 0x1ea   :  { %4439 = vmatpush.bf16.msrb.mxu3 %v6778_v48  ;;  %4414 = vmatpush.bf16.msrb.mxu1 %v6506_v53  ;;  %v7081_v48 = vld [vmem:[#allocation2 + $0xfa8] sm:$0xf]  ;;  %v7910_v53 = vld [vmem:[#allocation2 + $0x10b4] sm:$0xf0] }
 0x1eb   :  { %v7210_v4 = vor.u32 %v7910_v53, %v7209_v9  ;;  %v7890_v18 = vld [vmem:[#allocation2 + $0x1014] sm:$0xf0] }
 0x1ec   :  { %4427 = vmatpush.bf16.msrb.mxu2 %v6634_v59  ;;  %4402 = vmatpush.bf16.msrb.mxu0 %v6362_v2  ;;  %v7082_v59 = vor.u32 %v7878_v55, %v7081_v48  ;;  %v4196_v60 = vpop.f32.mrf.mxu0  ;;  %v7161_v55 = vld [vmem:[#allocation2 + $0x1048] sm:$0xf] }
 0x1ed   :  { %v4197_v2 = vadd.f32 %v4196_v60, %v8494_v40  ;;  %v7049_v40 = vld [vmem:[#allocation2 + $0xf68] sm:$0xf]  ;;  %v7384_v60 = vld [vmem:[#allocation2 + $0x4c] sm:$0xf] }
 0x1ee   :  { %4440 = vmatpush.bf16.msrb.mxu3 %v6762_v24  ;;  %4415 = vmatpush.bf16.msrb.mxu1 %v6490_v15  ;;  %v6938_v24 = vor.u32 %v7842_v58, %v6937_v20  ;;  %v6921_v15 = vld [vmem:[#allocation2 + $0xe68] sm:$0xf]  ;;  %v7830_v20 = vld [vmem:[#allocation2 + $0xe34] sm:$0xf0] }
 0x1ef   :  { %4403 = vmatmul.bf16.vlgmr.msrb.gmra.mxu0 %v8344_v3 }
 0x1f0   :  { %4447 = vmatpush.bf16.msra.mxu0 %v6986_v16  ;;  %4428 = vmatpush.bf16.msrb.mxu2 %v6618_v28  ;;  %v4209_v16 = vpop.f32.mrf.mxu1  ;;  %v7392_v28 = vld [vmem:[#allocation2 + $0x8c] sm:$0xf] }
 0x1f1   :  { %4416 = vmatmul.bf16.vlgmr.msrb.gmra.mxu1 %v8347_v54  ;;  %v4210_v45 = vadd.f32 %v4209_v16, %v4197_v2  ;;  %v7017_v2 = vld [vmem:[#allocation2 + $0xf28] sm:$0xf]  ;;  %v5118_v16 = vor.u32 %v7384_v60, %v5115_v61  ;;  %v5563_v60 = vld [vmem:[#allocation2 + $0x3d8] sm:$0xf0] }
 0x1f2   :  { %4460 = vmatpush.bf16.msra.mxu1 %v7114_v31  ;;  %4441 = vmatpush.bf16.msrb.mxu3 %v6746_v37  ;;  %v7870_v31 = vld [vmem:[#allocation2 + $0xf74] sm:$0xf0]  ;;  %v5150_v37 = vor.u32 %v7392_v28, %v5147_v26 }
 0x1f3   :  { %4429 = vmatmul.bf16.vlgmr.msrb.gmra.mxu2 %v8391_v57 }
 0x1f4   :  { %4473 = vmatpush.bf16.msra.mxu2 %v7242_v33  ;;  %4448 = vmatpush.bf16.msra.mxu0 %v6970_v39  ;;  %v6922_v33 = vor.u32 %v7838_v1, %v6921_v15  ;;  %v7050_v39 = vor.u32 %v7870_v31, %v7049_v40  ;;  %v4198_v42 = vpop.f32.mrf.mxu0  ;;  %v5099_v15 = vld [vmem:[#allocation2 + $0x38] sm:$0xf0]  ;;  %v7436_v1 = vld [vmem:[#allocation2 + $0x1ec] sm:$0xf]  ;;  %v7858_v40 = vld [vmem:[#allocation2 + $0xf14] sm:$0xf0]  ;;  %v6874_v31 = vor.u32 %v7826_v23, %v6873_v21 }
 0x1f5   :  { %4442 = vmatmul.bf16.vlgmr.msrb.gmra.mxu3 %v8405_v32  ;;  %v7500_v42 = vld [vmem:[#allocation2 + $0x3ec] sm:$0xf]  ;;  %v5419_v21 = vld [vmem:[#allocation2 + $0x2b8] sm:$0xf0] }
 0x1f6   :  { %4486 = vmatpush.bf16.msra.mxu3 %v5198_v44  ;;  %4461 = vmatpush.bf16.msra.mxu1 %v7098_v63  ;;  %v5131_v44 = vld [vmem:[#allocation2 + $0x78] sm:$0xf0]  ;;  %v4222_v5 = vpop.f32.mrf.mxu2  ;;  %v7033_v63 = vld [vmem:[#allocation2 + $0xf48] sm:$0xf] }
 0x1f7   :  { %v4223_v6 = vadd.f32 %v4222_v5, %v4210_v45  ;;  %v5134_v9 = vor.u32 %v7388_v43, %v5131_v44  ;;  %v7380_v45 = vld [vmem:[#allocation2 + $0x2c] sm:$0xf]  ;;  %v5579_v43 = vld [vmem:[#allocation2 + $0x3f8] sm:$0xf0] }
 0x1f8   :  { %4474 = vmatpush.bf16.msra.mxu2 %v7226_v10  ;;  %4449 = vmatpush.bf16.msra.mxu0 %v6954_v49  ;;  %v6906_v10 = vor.u32 %v7834_v27, %v6905_v62  ;;  %v4211_v48 = vpop.f32.mrf.mxu1  ;;  %v7898_v49 = vld [vmem:[#allocation2 + $0x1054] sm:$0xf0]  ;;  %v4235_v53 = vpop.f32.mrf.mxu3  ;;  %v5083_v5 = vld [vmem:[#allocation2 + $0x18] sm:$0xf0] }
 0x1f9   :  { %v8501_v58 = vadd.f32 %v4235_v53, %v4223_v6  ;;  %v7162_v14 = vor.u32 %v7898_v49, %v7161_v55  ;;  %v5307_v6 = vld [vmem:[#allocation2 + $0x1d8] sm:$0xf0]  ;;  %v5582_v48 = vor.u32 %v7500_v42, %v5579_v43  ;;  %v7532_v55 = vld [vmem:[#allocation2 + $0x4ec] sm:$0xf] }
 0x1fa   :  { %4487 = vmatpush.bf16.msra.mxu3 %v5182_v51  ;;  %4462 = vmatpush.bf16.msra.mxu1 %v7082_v59  ;;  %v6889_v51 = vld [vmem:[#allocation2 + $0xe28] sm:$0xf]  ;;  %v7034_v59 = vor.u32 %v7866_v46, %v7033_v63  ;;  %v7432_v46 = vld [vmem:[#allocation2 + $0x1cc] sm:$0xf]  ;;  %v5707_v49 = vld [vmem:[#allocation2 + $0x4f8] sm:$0xf0] }
 0x1fb   :  { %v6890_v11 = vor.u32 %v7830_v20, %v6889_v51  ;;  %v7464_v53 = vld [vmem:[#allocation2 + $0x2cc] sm:$0xf]  ;;  %v5435_v51 = vld [vmem:[#allocation2 + $0x2d8] sm:$0xf0]  ;;  %v5310_v20 = vor.u32 %v7432_v46, %v5307_v6  ;;  %v5710_v61 = vor.u32 %v7532_v55, %v5707_v49  ;;  %v7973_v49 = vld [vmem:[#allocation5] sm:$0xf] }
 0x1fc   :  { %4475 = vmatpush.bf16.msra.mxu2 %v7210_v4  ;;  %4450 = vmatpush.bf16.msra.mxu0 %v6938_v24  ;;  %v7862_v4 = vld [vmem:[#allocation2 + $0xf34] sm:$0xf0]  ;;  %v7452_v46 = vld [vmem:[#allocation2 + $0x26c] sm:$0xf]  ;;  %v5387_v6 = vld [vmem:[#allocation2 + $0x278] sm:$0xf0] }
 0x1fd   :  { %v7894_v24 = vld [vmem:[#allocation2 + $0x1034] sm:$0xf0]  ;;  %v5515_v55 = vld [vmem:[#allocation2 + $0x378] sm:$0xf0] }
 0x1fe   :  { %4488 = vmatpush.bf16.msra.mxu3 %v5166_v34  ;;  %4463 = vmatpush.bf16.msra.mxu1 %v7066_v19  ;;  %v7018_v34 = vor.u32 %v7862_v4, %v7017_v2  ;;  %v5323_v19 = vld [vmem:[#allocation2 + $0x1f8] sm:$0xf0]  ;;  %v7146_v28 = vor.u32 %v7894_v24, %v7145_v12  ;;  %v4224_v26 = vpop.f32.mrf.mxu2  ;;  %v5438_v4 = vor.u32 %v7464_v53, %v5435_v51  ;;  %v7416_v51 = vld [vmem:[#allocation2 + $0x14c] sm:$0xf] }
 0x1ff   :  { %v5326_v62 = vor.u32 %v7436_v1, %v5323_v19  ;;  %v5291_v2 = vld [vmem:[#allocation2 + $0x1b8] sm:$0xf0]  ;;  %v7424_v1 = vld [vmem:[#allocation2 + $0x18c] sm:$0xf] }
 0x200   :  { %4476 = vmatpush.bf16.msra.mxu2 %v7194_v0  ;;  %4451 = vmatpush.bf16.msra.mxu0 %v6922_v33  ;;  %v7001_v0 = vld [vmem:[#allocation2 + $0xf08] sm:$0xf]  ;;  %v4237_v27 = vpop.f32.mrf.mxu3  ;;  %v5691_v12 = vld [vmem:[#allocation2 + $0x4d8] sm:$0xf0] }
 0x201   :  { %v7129_v33 = vld [vmem:[#allocation2 + $0x1008] sm:$0xf]  ;;  %v7002_v44 = vor.u32 %v7858_v40, %v7001_v0  ;;  %v5275_v19 = vld [vmem:[#allocation2 + $0x198] sm:$0xf0]  ;;  %v7524_v0 = vld [vmem:[#allocation2 + $0x4ac] sm:$0xf] }
 0x202   :  { %4489 = vmatpush.bf16.msra.mxu3 %v5150_v37  ;;  %4464 = vmatpush.bf16.msra.mxu1 %v7050_v39  ;;  %v5102_v37 = vor.u32 %v7380_v45, %v5099_v15  ;;  %v5451_v39 = vld [vmem:[#allocation2 + $0x2f8] sm:$0xf0]  ;;  %v7130_v63 = vor.u32 %v7890_v18, %v7129_v33  ;;  %v7492_v45 = vld [vmem:[#allocation2 + $0x3ac] sm:$0xf] }
 0x203   :  { %v5675_v40 = vld [vmem:[#allocation2 + $0x4b8] sm:$0xf0]  ;;  %v7456_v18 = vld [vmem:[#allocation2 + $0x28c] sm:$0xf] }
 0x204   :  { %4477 = vmatpush.bf16.msra.mxu2 %v7178_v50  ;;  %4452 = vmatpush.bf16.msra.mxu0 %v6906_v10  ;;  %v7376_v50 = vld [vmem:[#allocation2 + $0xc] sm:$0xf]  ;;  %v5454_v10 = vor.u32 %v7468_v36, %v5451_v39  ;;  %v5403_v36 = vld [vmem:[#allocation2 + $0x298] sm:$0xf0]  ;;  %v5678_v43 = vor.u32 %v7524_v0, %v5675_v40 }
 0x205   :  { %v7488_v27 = vld [vmem:[#allocation2 + $0x38c] sm:$0xf]  ;;  %v5531_v39 = vld [vmem:[#allocation2 + $0x398] sm:$0xf0] }
 0x206   :  { %4490 = vmatpush.bf16.msra.mxu3 %v5134_v9  ;;  %4465 = vmatpush.bf16.msra.mxu1 %v7034_v59  ;;  %v5086_v9 = vor.u32 %v7376_v50, %v5083_v5  ;;  %v7496_v59 = vld [vmem:[#allocation2 + $0x3cc] sm:$0xf]  ;;  %v5406_v50 = vor.u32 %v7456_v18, %v5403_v36  ;;  %v5627_v40 = vld [vmem:[#allocation2 + $0x458] sm:$0xf0] }
 0x207   :  { %v5566_v24 = vor.u32 %v7496_v59, %v5563_v60  ;;  %v7520_v5 = vld [vmem:[#allocation2 + $0x48c] sm:$0xf]  ;;  %v5390_v59 = vor.u32 %v7452_v46, %v5387_v6  ;;  %v5355_v18 = vld [vmem:[#allocation2 + $0x238] sm:$0xf0] }
 0x208   :  { %4478 = vmatpush.bf16.msra.mxu2 %v7162_v14  ;;  %4453 = vmatpush.bf16.msra.mxu0 %v6890_v11  ;;  %v7428_v14 = vld [vmem:[#allocation2 + $0x1ac] sm:$0xf] }
 0x209   :  { %v7528_v11 = vld [vmem:[#allocation2 + $0x4cc] sm:$0xf]  ;;  %v5294_v23 = vor.u32 %v7428_v14, %v5291_v2  ;;  %v5643_v14 = vld [vmem:[#allocation2 + $0x478] sm:$0xf0] }
 0x20a   :  { %4491 = vmatpush.bf16.msra.mxu3 %v5118_v16  ;;  %4466 = vmatpush.bf16.msra.mxu1 %v7018_v34  ;;  %v7460_v16 = vld [vmem:[#allocation2 + $0x2ac] sm:$0xf]  ;;  %v5547_v34 = vld [vmem:[#allocation2 + $0x3b8] sm:$0xf0]  ;;  %v5694_v15 = vor.u32 %v7528_v11, %v5691_v12 }
 0x20b   :  { %v5550_v33 = vor.u32 %v7492_v45, %v5547_v34  ;;  %v7448_v11 = vld [vmem:[#allocation2 + $0x24c] sm:$0xf]  ;;  %v5371_v12 = vld [vmem:[#allocation2 + $0x258] sm:$0xf0] }
 0x20c   :  { %4479 = vmatpush.bf16.msra.mxu2 %v7146_v28  ;;  %4454 = vmatpush.bf16.msra.mxu0 %v6874_v31  ;;  %v5422_v28 = vor.u32 %v7460_v16, %v5419_v21  ;;  %v4248_v26 = vpop.f32.mrf.mxu0  ;;  %v5499_v45 = vld [vmem:[#allocation2 + $0x358] sm:$0xf0]  ;;  %v7512_v0 = vld [vmem:[#allocation2 + $0x44c] sm:$0xf] }
 0x20d   :  { %v4249_v31 = vadd.f32 %v4248_v26, %v8501_v58  ;;  %v5534_v58 = vor.u32 %v7488_v27, %v5531_v39  ;;  %v5374_v26 = vor.u32 %v7448_v11, %v5371_v12  ;;  %v5630_v27 = vor.u32 %v7512_v0, %v5627_v40  ;;  %v7408_v39 = vld [vmem:[#allocation2 + $0x10c] sm:$0xf]  ;;  %v6075_v0 = vld [vmem:[#allocation2 + $0x7d8] sm:$0xf0] }
 0x20e   :  { %4492 = vmatpush.bf16.msra.mxu3 %v5102_v37  ;;  %4467 = vmatpush.bf16.msra.mxu1 %v7002_v44  ;;  %v5278_v37 = vor.u32 %v7424_v1, %v5275_v19  ;;  %v5259_v44 = vld [vmem:[#allocation2 + $0x178] sm:$0xf0]  ;;  %v7412_v1 = vld [vmem:[#allocation2 + $0x12c] sm:$0xf] }
 0x20f   :  { %4455 = vmatmul.bf16.vlgmr.msra.gmra.mxu0 %v8411_v38  ;;  %v5227_v19 = vld [vmem:[#allocation2 + $0x138] sm:$0xf0]  ;;  %v7440_v6 = vld [vmem:[#allocation2 + $0x20c] sm:$0xf] }
 0x210   :  { %4499 = vmatpush.bf16.msrb.mxu0 %v5326_v62  ;;  %4480 = vmatpush.bf16.msra.mxu2 %v7130_v63  ;;  %v4261_v62 = vpop.f32.mrf.mxu1  ;;  %v5659_v63 = vld [vmem:[#allocation2 + $0x498] sm:$0xf0]  ;;  %v5230_v36 = vor.u32 %v7412_v1, %v5227_v19  ;;  %v7560_v12 = vld [vmem:[#allocation2 + $0x5cc] sm:$0xf] }
 0x211   :  { %4468 = vmatmul.bf16.vlgmr.msra.gmra.mxu1 %v8424_v22  ;;  %v8508_v42 = vadd.f32 %v4261_v62, %v4249_v31  ;;  %v5662_v53 = vor.u32 %v7520_v5, %v5659_v63  ;;  %v5483_v62 = vld [vmem:[#allocation2 + $0x338] sm:$0xf0]  ;;  %v7564_v5 = vld [vmem:[#allocation2 + $0x5ec] sm:$0xf] }
 0x212   :  { %4512 = vmatpush.bf16.msrb.mxu1 %v5454_v10  ;;  %4493 = vmatpush.bf16.msra.mxu3 %v5086_v9  ;;  %v1097_v9 = vperm.slane %v7973_v49, 2  ;;  %v5835_v63 = vld [vmem:[#allocation2 + $0x5f8] sm:$0xf0] }
 0x213   :  { %4481 = vmatmul.bf16.vlgmr.msra.gmra.mxu2 %v8446_v13  ;;  %v5467_v49 = vld [vmem:[#allocation2 + $0x318] sm:$0xf0] }
 0x214   :  { %4525 = vmatpush.bf16.msrb.mxu2 %v5582_v48  ;;  %4500 = vmatpush.bf16.msrb.mxu0 %v5310_v20  ;;  %v7484_v48 = vld [vmem:[#allocation2 + $0x36c] sm:$0xf]  ;;  %v5243_v20 = vld [vmem:[#allocation2 + $0x158] sm:$0xf0]  ;;  %v4250_v60 = vpop.f32.mrf.mxu0 }
 0x215   :  { %4494 = vmatmul.bf16.vlgmr.msra.gmra.mxu3 %v8246_v25  ;;  %v7420_v25 = vld [vmem:[#allocation2 + $0x16c] sm:$0xf]  ;;  %v5518_v2 = vor.u32 %v7484_v48, %v5515_v55  ;;  %v5246_v16 = vor.u32 %v7416_v51, %v5243_v20  ;;  %v5838_v51 = vor.u32 %v7564_v5, %v5835_v63  ;;  %v5947_v1 = vld [vmem:[#allocation2 + $0x6d8] sm:$0xf0] }
 0x216   :  { %4538 = vmatpush.bf16.msrb.mxu3 %v5710_v61  ;;  %4513 = vmatpush.bf16.msrb.mxu1 %v5438_v4  ;;  %v5262_v10 = vor.u32 %v7420_v25, %v5259_v44  ;;  %v7516_v61 = vld [vmem:[#allocation2 + $0x46c] sm:$0xf]  ;;  %v4274_v4 = vpop.f32.mrf.mxu2  ;;  %v5787_v5 = vld [vmem:[#allocation2 + $0x598] sm:$0xf0] }
 0x217   :  { %v5646_v34 = vor.u32 %v7516_v61, %v5643_v14  ;;  %v7508_v25 = vld [vmem:[#allocation2 + $0x42c] sm:$0xf]  ;;  %v6091_v61 = vld [vmem:[#allocation2 + $0x7f8] sm:$0xf0] }
 0x218   :  { %4526 = vmatpush.bf16.msrb.mxu2 %v5566_v24  ;;  %4501 = vmatpush.bf16.msrb.mxu0 %v5294_v23  ;;  %v4275_v24 = vadd.f32 %v4274_v4, %v1097_v9  ;;  %v4263_v21 = vpop.f32.mrf.mxu1  ;;  %v7480_v23 = vld [vmem:[#allocation2 + $0x34c] sm:$0xf]  ;;  %v5595_v4 = vld [vmem:[#allocation2 + $0x418] sm:$0xf0] }
 0x219   :  { %v5502_v31 = vor.u32 %v7480_v23, %v5499_v45  ;;  %v7472_v55 = vld [vmem:[#allocation2 + $0x30c] sm:$0xf]  ;;  %v6219_v45 = vld [vmem:[#allocation2 + $0x8f8] sm:$0xf0] }
 0x21a   :  { %4539 = vmatpush.bf16.msrb.mxu3 %v5694_v15  ;;  %4514 = vmatpush.bf16.msrb.mxu1 %v5422_v28  ;;  %v4287_v15 = vpop.f32.mrf.mxu3  ;;  %v7596_v9 = vld [vmem:[#allocation2 + $0x6ec] sm:$0xf]  ;;  %v5470_v11 = vor.u32 %v7472_v55, %v5467_v49 }
 0x21b   :  { %v8510_v28 = vadd.f32 %v4287_v15, %v4275_v24  ;;  %v7628_v60 = vld [vmem:[#allocation2 + $0x7ec] sm:$0xf]  ;;  %v5819_v24 = vld [vmem:[#allocation2 + $0x5d8] sm:$0xf0] }
 0x21c   :  { %4527 = vmatpush.bf16.msrb.mxu2 %v5550_v33  ;;  %4502 = vmatpush.bf16.msrb.mxu0 %v5278_v37  ;;  %v7444_v33 = vld [vmem:[#allocation2 + $0x22c] sm:$0xf]  ;;  %v6094_v21 = vor.u32 %v7628_v60, %v6091_v61  ;;  %v5822_v19 = vor.u32 %v7560_v12, %v5819_v24  ;;  %v6027_v24 = vld [vmem:[#allocation2 + $0x778] sm:$0xf0] }
 0x21d   :  { %v7476_v37 = vld [vmem:[#allocation2 + $0x32c] sm:$0xf]  ;;  %v5358_v44 = vor.u32 %v7444_v33, %v5355_v18  ;;  %v5803_v33 = vld [vmem:[#allocation2 + $0x5b8] sm:$0xf0] }
 0x21e   :  { %4540 = vmatpush.bf16.msrb.mxu3 %v5678_v43  ;;  %4515 = vmatpush.bf16.msrb.mxu1 %v5406_v50  ;;  %v5211_v43 = vld [vmem:[#allocation2 + $0x118] sm:$0xf0]  ;;  %v4276_v46 = vpop.f32.mrf.mxu2  ;;  %v7660_v23 = vld [vmem:[#allocation2 + $0x8ec] sm:$0xf] }
 0x21f   :  { %v5611_v50 = vld [vmem:[#allocation2 + $0x438] sm:$0xf0]  ;;  %v5214_v48 = vor.u32 %v7408_v39, %v5211_v43  ;;  %v7592_v15 = vld [vmem:[#allocation2 + $0x6cc] sm:$0xf]  ;;  %v6222_v40 = vor.u32 %v7660_v23, %v6219_v45 }
 0x220   :  { %4528 = vmatpush.bf16.msrb.mxu2 %v5534_v58  ;;  %4503 = vmatpush.bf16.msrb.mxu0 %v5262_v10  ;;  %v5486_v58 = vor.u32 %v7476_v37, %v5483_v62  ;;  %v5339_v10 = vld [vmem:[#allocation2 + $0x218] sm:$0xf0]  ;;  %v5950_v18 = vor.u32 %v7592_v15, %v5947_v1  ;;  %v7648_v61 = vld [vmem:[#allocation2 + $0x88c] sm:$0xf] }
 0x221   :  { %v5342_v14 = vor.u32 %v7440_v6, %v5339_v10  ;;  %v6203_v37 = vld [vmem:[#allocation2 + $0x8d8] sm:$0xf0]  ;;  %v7612_v12 = vld [vmem:[#allocation2 + $0x76c] sm:$0xf] }
 0x222   :  { %4541 = vmatpush.bf16.msrb.mxu3 %v5662_v53  ;;  %4516 = vmatpush.bf16.msrb.mxu1 %v5390_v59  ;;  %v5614_v53 = vor.u32 %v7508_v25, %v5611_v50  ;;  %v4289_v20 = vpop.f32.mrf.mxu3  ;;  %v5963_v59 = vld [vmem:[#allocation2 + $0x6f8] sm:$0xf0]  ;;  %v7552_v50 = vld [vmem:[#allocation2 + $0x58c] sm:$0xf] }
 0x223   :  { %v5931_v39 = vld [vmem:[#allocation2 + $0x6b8] sm:$0xf0]  ;;  %v5790_v55 = vor.u32 %v7552_v50, %v5787_v5  ;;  %v7644_v15 = vld [vmem:[#allocation2 + $0x86c] sm:$0xf] }
 0x224   :  { %4529 = vmatpush.bf16.msrb.mxu2 %v5518_v2  ;;  %4504 = vmatpush.bf16.msrb.mxu0 %v5246_v16  ;;  %v7504_v2 = vld [vmem:[#allocation2 + $0x40c] sm:$0xf]  ;;  %v5966_v16 = vor.u32 %v7596_v9, %v5963_v59  ;;  %v6059_v25 = vld [vmem:[#allocation2 + $0x7b8] sm:$0xf0] }
 0x225   :  { %v6187_v46 = vld [vmem:[#allocation2 + $0x8b8] sm:$0xf0]  ;;  %v7616_v9 = vld [vmem:[#allocation2 + $0x78c] sm:$0xf] }
 0x226   :  { %4542 = vmatpush.bf16.msrb.mxu3 %v5646_v34  ;;  %4517 = vmatpush.bf16.msrb.mxu1 %v5374_v26  ;;  %v5598_v34 = vor.u32 %v7504_v2, %v5595_v4  ;;  %v7624_v26 = vld [vmem:[#allocation2 + $0x7cc] sm:$0xf]  ;;  %v5899_v4 = vld [vmem:[#allocation2 + $0x678] sm:$0xf0] }
 0x227   :  { %v6078_v62 = vor.u32 %v7624_v26, %v6075_v0  ;;  %v7548_v59 = vld [vmem:[#allocation2 + $0x56c] sm:$0xf]  ;;  %v5755_v23 = vld [vmem:[#allocation2 + $0x558] sm:$0xf0] }
 0x228   :  { %4530 = vmatpush.bf16.msrb.mxu2 %v5502_v31  ;;  %4505 = vmatpush.bf16.msrb.mxu0 %v5230_v36  ;;  %v7556_v31 = vld [vmem:[#allocation2 + $0x5ac] sm:$0xf]  ;;  %v6155_v1 = vld [vmem:[#allocation2 + $0x878] sm:$0xf0] }
 0x229   :  { %v7656_v36 = vld [vmem:[#allocation2 + $0x8cc] sm:$0xf]  ;;  %v5806_v43 = vor.u32 %v7556_v31, %v5803_v33  ;;  %v6139_v50 = vld [vmem:[#allocation2 + $0x858] sm:$0xf0] }
 0x22a   :  { %4543 = vmatpush.bf16.msrb.mxu3 %v5630_v27  ;;  %4518 = vmatpush.bf16.msrb.mxu1 %v5358_v44  ;;  %v7588_v27 = vld [vmem:[#allocation2 + $0x6ac] sm:$0xf]  ;;  %v6206_v44 = vor.u32 %v7656_v36, %v6203_v37  ;;  %v6011_v37 = vld [vmem:[#allocation2 + $0x758] sm:$0xf0] }
 0x22b   :  { %v5934_v63 = vor.u32 %v7588_v27, %v5931_v39  ;;  %v7576_v0 = vld [vmem:[#allocation2 + $0x64c] sm:$0xf] }
 0x22c   :  { %4531 = vmatpush.bf16.msrb.mxu2 %v5486_v58  ;;  %4506 = vmatpush.bf16.msrb.mxu0 %v5214_v48  ;;  %v4300_v58 = vpop.f32.mrf.mxu0  ;;  %v7584_v48 = vld [vmem:[#allocation2 + $0x68c] sm:$0xf] }
 0x22d   :  { %v4301_v6 = vadd.f32 %v4300_v58, %v8510_v28  ;;  %v7580_v28 = vld [vmem:[#allocation2 + $0x66c] sm:$0xf]  ;;  %v5867_v58 = vld [vmem:[#allocation2 + $0x638] sm:$0xf0] }
 0x22e   :  { %4544 = vmatpush.bf16.msrb.mxu3 %v5614_v53  ;;  %4519 = vmatpush.bf16.msrb.mxu1 %v5342_v14  ;;  %v4313_v49 = vpop.f32.mrf.mxu1  ;;  %v6043_v53 = vld [vmem:[#allocation2 + $0x798] sm:$0xf0]  ;;  %v5902_v45 = vor.u32 %v7580_v28, %v5899_v4  ;;  %v7608_v36 = vld [vmem:[#allocation2 + $0x74c] sm:$0xf] }
 0x22f   :  { %4507 = vmatmul.bf16.vlgmr.msrb.gmra.mxu0 %v8250_v35  ;;  %v7620_v35 = vld [vmem:[#allocation2 + $0x7ac] sm:$0xf]  ;;  %v6171_v14 = vld [vmem:[#allocation2 + $0x898] sm:$0xf0]  ;;  %v6046_v2 = vor.u32 %v7616_v9, %v6043_v53  ;;  %v6014_v5 = vor.u32 %v7608_v36, %v6011_v37 }
 0x230   :  { %4551 = vmatpush.bf16.msra.mxu0 %v5838_v51  ;;  %4532 = vmatpush.bf16.msrb.mxu2 %v5470_v11  ;;  %v6062_v10 = vor.u32 %v7620_v35, %v6059_v25  ;;  %v4314_v51 = vadd.f32 %v4313_v49, %v4301_v6  ;;  %v7540_v39 = vld [vmem:[#allocation2 + $0x52c] sm:$0xf]  ;;  %v5995_v6 = vld [vmem:[#allocation2 + $0x738] sm:$0xf0] }
 0x231   :  { %4520 = vmatmul.bf16.vlgmr.msrb.gmra.mxu1 %v8256_v47  ;;  %v7652_v47 = vld [vmem:[#allocation2 + $0x8ac] sm:$0xf]  ;;  %v6123_v9 = vld [vmem:[#allocation2 + $0x838] sm:$0xf0] }
 0x232   :  { %4564 = vmatpush.bf16.msra.mxu1 %v5966_v16  ;;  %4545 = vmatpush.bf16.msrb.mxu3 %v5598_v34  ;;  %v6190_v20 = vor.u32 %v7652_v47, %v6187_v46  ;;  %v6174_v16 = vor.u32 %v7648_v61, %v6171_v14  ;;  %v7604_v46 = vld [vmem:[#allocation2 + $0x72c] sm:$0xf]  ;;  %v6459_v36 = vld [vmem:[#allocation2 + $0xad8] sm:$0xf0] }
 0x233   :  { %4533 = vmatmul.bf16.vlgmr.msrb.gmra.mxu2 %v8263_v56  ;;  %v5915_v56 = vld [vmem:[#allocation2 + $0x698] sm:$0xf0]  ;;  %v7692_v53 = vld [vmem:[#allocation2 + $0x9ec] sm:$0xf] }
 0x234   :  { %4577 = vmatpush.bf16.msra.mxu2 %v6094_v21  ;;  %4552 = vmatpush.bf16.msra.mxu0 %v5822_v19  ;;  %v5918_v60 = vor.u32 %v7584_v48, %v5915_v56  ;;  %v7544_v21 = vld [vmem:[#allocation2 + $0x54c] sm:$0xf]  ;;  %v4302_v34 = vpop.f32.mrf.mxu0  ;;  %v6030_v19 = vor.u32 %v7612_v12, %v6027_v24  ;;  %v5723_v56 = vld [vmem:[#allocation2 + $0x518] sm:$0xf0] }
 0x235   :  { %4546 = vmatmul.bf16.vlgmr.msrb.gmra.mxu3 %v8303_v52  ;;  %v5771_v52 = vld [vmem:[#allocation2 + $0x578] sm:$0xf0]  ;;  %v5758_v33 = vor.u32 %v7544_v21, %v5755_v23  ;;  %v7536_v48 = vld [vmem:[#allocation2 + $0x50c] sm:$0xf] }
 0x236   :  { %4590 = vmatpush.bf16.msra.mxu3 %v6222_v40  ;;  %4565 = vmatpush.bf16.msra.mxu1 %v5950_v18  ;;  %v5774_v11 = vor.u32 %v7548_v59, %v5771_v52  ;;  %v4326_v26 = vpop.f32.mrf.mxu2  ;;  %v5883_v40 = vld [vmem:[#allocation2 + $0x658] sm:$0xf0]  ;;  %v4315_v18 = vpop.f32.mrf.mxu1  ;;  %v7568_v52 = vld [vmem:[#allocation2 + $0x60c] sm:$0xf]  ;;  %v5726_v61 = vor.u32 %v7536_v48, %v5723_v56 }
 0x237   :  { %v4327_v31 = vadd.f32 %v4326_v26, %v4314_v51  ;;  %v5886_v25 = vor.u32 %v7576_v0, %v5883_v40  ;;  %v6347_v51 = vld [vmem:[#allocation2 + $0x9f8] sm:$0xf0]  ;;  %v7600_v14 = vld [vmem:[#allocation2 + $0x70c] sm:$0xf] }
 0x238   :  { %4578 = vmatpush.bf16.msra.mxu2 %v6078_v62  ;;  %4553 = vmatpush.bf16.msra.mxu0 %v5806_v43  ;;  %v6158_v62 = vor.u32 %v7644_v15, %v6155_v1  ;;  %v4339_v27 = vpop.f32.mrf.mxu3  ;;  %v5739_v43 = vld [vmem:[#allocation2 + $0x538] sm:$0xf0]  ;;  %v7724_v28 = vld [vmem:[#allocation2 + $0xaec] sm:$0xf] }
 0x239   :  { %v8517_v35 = vadd.f32 %v4339_v27, %v4327_v31  ;;  %v5742_v47 = vor.u32 %v7540_v39, %v5739_v43  ;;  %v6475_v24 = vld [vmem:[#allocation2 + $0xaf8] sm:$0xf0]  ;;  %v7688_v1 = vld [vmem:[#allocation2 + $0x9cc] sm:$0xf] }
 0x23a   :  { %4591 = vmatpush.bf16.msra.mxu3 %v6206_v44  ;;  %4566 = vmatpush.bf16.msra.mxu1 %v5934_v63  ;;  %v7640_v44 = vld [vmem:[#allocation2 + $0x84c] sm:$0xf]  ;;  %v6603_v21 = vld [vmem:[#allocation2 + $0xbf8] sm:$0xf0]  ;;  %v6478_v26 = vor.u32 %v7724_v28, %v6475_v24 }
 0x23b   :  { %v7572_v63 = vld [vmem:[#allocation2 + $0x62c] sm:$0xf]  ;;  %v6107_v34 = vld [vmem:[#allocation2 + $0x818] sm:$0xf0] }
 0x23c   :  { %4579 = vmatpush.bf16.msra.mxu2 %v6062_v10  ;;  %4554 = vmatpush.bf16.msra.mxu0 %v5790_v55  ;;  %v6142_v10 = vor.u32 %v7640_v44, %v6139_v50  ;;  %v7636_v55 = vld [vmem:[#allocation2 + $0x82c] sm:$0xf]  ;;  %v5870_v49 = vor.u32 %v7572_v63, %v5867_v58  ;;  %v6731_v31 = vld [vmem:[#allocation2 + $0xcf8] sm:$0xf0] }
 0x23d   :  { %v6126_v4 = vor.u32 %v7636_v55, %v6123_v9  ;;  %v7788_v40 = vld [vmem:[#allocation2 + $0xcec] sm:$0xf]  ;;  %v6587_v27 = vld [vmem:[#allocation2 + $0xbd8] sm:$0xf0] }
 0x23e   :  { %4592 = vmatpush.bf16.msra.mxu3 %v6190_v20  ;;  %4567 = vmatpush.bf16.msra.mxu1 %v5918_v60  ;;  %v5998_v20 = vor.u32 %v7604_v46, %v5995_v6  ;;  %v4328_v59 = vpop.f32.mrf.mxu2  ;;  %v5851_v60 = vld [vmem:[#allocation2 + $0x618] sm:$0xf0]  ;;  %v7720_v18 = vld [vmem:[#allocation2 + $0xacc] sm:$0xf]  ;;  %v6734_v39 = vor.u32 %v7788_v40, %v6731_v31 }
 0x23f   :  { %v5854_v23 = vor.u32 %v7568_v52, %v5851_v60  ;;  %v7684_v43 = vld [vmem:[#allocation2 + $0x9ac] sm:$0xf]  ;;  %v6462_v44 = vor.u32 %v7720_v18, %v6459_v36  ;;  %v6571_v6 = vld [vmem:[#allocation2 + $0xbb8] sm:$0xf0] }
 0x240   :  { %4580 = vmatpush.bf16.msra.mxu2 %v6046_v2  ;;  %4555 = vmatpush.bf16.msra.mxu0 %v5774_v11  ;;  %v5979_v2 = vld [vmem:[#allocation2 + $0x718] sm:$0xf0]  ;;  %v6350_v11 = vor.u32 %v7692_v53, %v6347_v51  ;;  %v4341_v12 = vpop.f32.mrf.mxu3  ;;  %v7784_v50 = vld [vmem:[#allocation2 + $0xccc] sm:$0xf] }
 0x241   :  { %v5982_v15 = vor.u32 %v7600_v14, %v5979_v2  ;;  %v7716_v58 = vld [vmem:[#allocation2 + $0xaac] sm:$0xf]  ;;  %v6299_v56 = vld [vmem:[#allocation2 + $0x998] sm:$0xf0] }
 0x242   :  { %4593 = vmatpush.bf16.msra.mxu3 %v6174_v16  ;;  %4568 = vmatpush.bf16.msra.mxu1 %v5902_v45  ;;  %v7756_v16 = vld [vmem:[#allocation2 + $0xbec] sm:$0xf]  ;;  %v6699_v9 = vld [vmem:[#allocation2 + $0xcb8] sm:$0xf0] }
 0x243   :  { %v7632_v45 = vld [vmem:[#allocation2 + $0x80c] sm:$0xf]  ;;  %v6606_v0 = vor.u32 %v7756_v16, %v6603_v21  ;;  %v6555_v60 = vld [vmem:[#allocation2 + $0xb98] sm:$0xf0] }
 0x244   :  { %4581 = vmatpush.bf16.msra.mxu2 %v6030_v19  ;;  %4556 = vmatpush.bf16.msra.mxu0 %v5758_v33  ;;  %v6331_v19 = vld [vmem:[#allocation2 + $0x9d8] sm:$0xf0]  ;;  %v6110_v33 = vor.u32 %v7632_v45, %v6107_v34  ;;  %v7680_v48 = vld [vmem:[#allocation2 + $0x98c] sm:$0xf] }
 0x245   :  { %v6334_v37 = vor.u32 %v7688_v1, %v6331_v19  ;;  %v7712_v51 = vld [vmem:[#allocation2 + $0xa8c] sm:$0xf]  ;;  %v6283_v2 = vld [vmem:[#allocation2 + $0x978] sm:$0xf0] }
 0x246   :  { %4594 = vmatpush.bf16.msra.mxu3 %v6158_v62  ;;  %4569 = vmatpush.bf16.msra.mxu1 %v5886_v25  ;;  %v7752_v62 = vld [vmem:[#allocation2 + $0xbcc] sm:$0xf]  ;;  %v6315_v25 = vld [vmem:[#allocation2 + $0x9b8] sm:$0xf0] }
 0x247   :  { %v6590_v63 = vor.u32 %v7752_v62, %v6587_v27  ;;  %v6318_v46 = vor.u32 %v7684_v43, %v6315_v25  ;;  %v7744_v52 = vld [vmem:[#allocation2 + $0xb8c] sm:$0xf]  ;;  %v6411_v24 = vld [vmem:[#allocation2 + $0xa78] sm:$0xf0] }
 0x248   :  { %4582 = vmatpush.bf16.msra.mxu2 %v6014_v5  ;;  %4557 = vmatpush.bf16.msra.mxu0 %v5742_v47  ;;  %v6715_v5 = vld [vmem:[#allocation2 + $0xcd8] sm:$0xf0]  ;;  %v7676_v14 = vld [vmem:[#allocation2 + $0x96c] sm:$0xf] }
 0x249   :  { %v6443_v47 = vld [vmem:[#allocation2 + $0xab8] sm:$0xf0]  ;;  %v7776_v28 = vld [vmem:[#allocation2 + $0xc8c] sm:$0xf]  ;;  %v6286_v16 = vor.u32 %v7676_v14, %v6283_v2 }
 0x24a   :  { %4595 = vmatpush.bf16.msra.mxu3 %v6142_v10  ;;  %4570 = vmatpush.bf16.msra.mxu1 %v5870_v49  ;;  %v6718_v10 = vor.u32 %v7784_v50, %v6715_v5  ;;  %v6446_v55 = vor.u32 %v7716_v58, %v6443_v47  ;;  %v7708_v12 = vld [vmem:[#allocation2 + $0xa6c] sm:$0xf]  ;;  %v6395_v18 = vld [vmem:[#allocation2 + $0xa58] sm:$0xf0] }
 0x24b   :  { %v7740_v21 = vld [vmem:[#allocation2 + $0xb6c] sm:$0xf]  ;;  %v6414_v1 = vor.u32 %v7708_v12, %v6411_v24  ;;  %v6523_v27 = vld [vmem:[#allocation2 + $0xb58] sm:$0xf0] }
 0x24c   :  { %4583 = vmatpush.bf16.msra.mxu2 %v5998_v20  ;;  %4558 = vmatpush.bf16.msra.mxu0 %v5726_v61  ;;  %v8523_v49 = vpop.f32.mrf.mxu0  ;;  %v6427_v20 = vld [vmem:[#allocation2 + $0xa98] sm:$0xf0]  ;;  %v7672_v34 = vld [vmem:[#allocation2 + $0x94c] sm:$0xf] }
 0x24d   :  { %v7736_v62 = vld [vmem:[#allocation2 + $0xb4c] sm:$0xf]  ;;  %v6987_v24 = vld [vmem:[#allocation2 + $0xef8] sm:$0xf0] }
 0x24e   :  { %4596 = vmatpush.bf16.msra.mxu3 %v6126_v4  ;;  %4571 = vmatpush.bf16.msra.mxu1 %v5854_v23  ;;  %v8525_v59 = vpop.f32.mrf.mxu1  ;;  %v6683_v4 = vld [vmem:[#allocation2 + $0xc98] sm:$0xf0]  ;;  %v7668_v25 = vld [vmem:[#allocation2 + $0x92c] sm:$0xf]  ;;  %v6526_v58 = vor.u32 %v7736_v62, %v6523_v27 }
 0x24f   :  { %4559 = vmatmul.bf16.vlgmr.msra.gmra.mxu0 %v8305_v8  ;;  %v7748_v8 = vld [vmem:[#allocation2 + $0xbac] sm:$0xf]  ;;  %v6539_v23 = vld [vmem:[#allocation2 + $0xb78] sm:$0xf0]  ;;  %v6686_v45 = vor.u32 %v7776_v28, %v6683_v4 }
 0x250   :  { %4603 = vmatpush.bf16.msrb.mxu0 %v6350_v11  ;;  %4584 = vmatpush.bf16.msra.mxu2 %v5982_v15  ;;  %v6574_v53 = vor.u32 %v7748_v8, %v6571_v6  ;;  %v6558_v11 = vor.u32 %v7744_v52, %v6555_v60  ;;  %v6267_v15 = vld [vmem:[#allocation2 + $0x958] sm:$0xf0]  ;;  %v6542_v40 = vor.u32 %v7740_v21, %v6539_v23  ;;  %v7768_v5 = vld [vmem:[#allocation2 + $0xc4c] sm:$0xf] }
 0x251   :  { %4572 = vmatmul.bf16.vlgmr.msra.gmra.mxu1 %v8311_v17  ;;  %v7780_v17 = vld [vmem:[#allocation2 + $0xcac] sm:$0xf]  ;;  %v6270_v36 = vor.u32 %v7672_v34, %v6267_v15  ;;  %v7115_v21 = vld [vmem:[#allocation2 + $0xff8] sm:$0xf0] }
 0x252   :  { %4616 = vmatpush.bf16.msrb.mxu1 %v6478_v26  ;;  %4597 = vmatpush.bf16.msra.mxu3 %v6110_v33  ;;  %v6702_v61 = vor.u32 %v7780_v17, %v6699_v9  ;;  %v7772_v26 = vld [vmem:[#allocation2 + $0xc6c] sm:$0xf]  ;;  %v6619_v34 = vld [vmem:[#allocation2 + $0xc18] sm:$0xf0] }
 0x253   :  { %4585 = vmatmul.bf16.vlgmr.msra.gmra.mxu2 %v8322_v30  ;;  %v6302_v30 = vor.u32 %v7680_v48, %v6299_v56  ;;  %v7704_v33 = vld [vmem:[#allocation2 + $0xa4c] sm:$0xf] }
 0x254   :  { %4629 = vmatpush.bf16.msrb.mxu2 %v6606_v0  ;;  %4604 = vmatpush.bf16.msrb.mxu0 %v6334_v37  ;;  %v4354_v19 = vpop.f32.mrf.mxu0  ;;  %v6667_v0 = vld [vmem:[#allocation2 + $0xc78] sm:$0xf0]  ;;  %v6398_v50 = vor.u32 %v7704_v33, %v6395_v18  ;;  %v7700_v47 = vld [vmem:[#allocation2 + $0xa2c] sm:$0xf] }
 0x255   :  { %4598 = vmatmul.bf16.vlgmr.msra.gmra.mxu3 %v8338_v29  ;;  %v6430_v29 = vor.u32 %v7712_v51, %v6427_v20  ;;  %v7732_v6 = vld [vmem:[#allocation2 + $0xb2c] sm:$0xf]  ;;  %v6859_v20 = vld [vmem:[#allocation2 + $0xdf8] sm:$0xf0] }
 0x256   :  { %4642 = vmatpush.bf16.msrb.mxu3 %v6734_v39  ;;  %4617 = vmatpush.bf16.msrb.mxu1 %v6462_v44  ;;  %v8527_v31 = vpop.f32.mrf.mxu2  ;;  %v4367_v37 = vpop.f32.mrf.mxu1  ;;  %v6670_v39 = vor.u32 %v7772_v26, %v6667_v0  ;;  %v6251_v44 = vld [vmem:[#allocation2 + $0x938] sm:$0xf0]  ;;  %v7664_v56 = vld [vmem:[#allocation2 + $0x90c] sm:$0xf] }
 0x257   :  { %v6254_v8 = vor.u32 %v7668_v25, %v6251_v44  ;;  %v7764_v17 = vld [vmem:[#allocation2 + $0xc2c] sm:$0xf]  ;;  %v6843_v19 = vld [vmem:[#allocation2 + $0xdd8] sm:$0xf0] }
 0x258   :  { %4630 = vmatpush.bf16.msrb.mxu2 %v6590_v63  ;;  %4605 = vmatpush.bf16.msrb.mxu0 %v6318_v46  ;;  %v8529_v43 = vpop.f32.mrf.mxu3  ;;  %v6651_v63 = vld [vmem:[#allocation2 + $0xc58] sm:$0xf0]  ;;  %v7820_v51 = vld [vmem:[#allocation2 + $0xdec] sm:$0xf] }
 0x259   :  { %v6379_v46 = vld [vmem:[#allocation2 + $0xa38] sm:$0xf0]  ;;  %v6654_v48 = vor.u32 %v7768_v5, %v6651_v63  ;;  %v7696_v60 = vld [vmem:[#allocation2 + $0xa0c] sm:$0xf] }
 0x25a   :  { %4643 = vmatpush.bf16.msrb.mxu3 %v6718_v10  ;;  %4618 = vmatpush.bf16.msrb.mxu1 %v6446_v55  ;;  %v6507_v10 = vld [vmem:[#allocation2 + $0xb38] sm:$0xf0]  ;;  %v6382_v9 = vor.u32 %v7700_v47, %v6379_v46  ;;  %v7728_v2 = vld [vmem:[#allocation2 + $0xb0c] sm:$0xf] }
 0x25b   :  { %v6235_v55 = vld [vmem:[#allocation2 + $0x918] sm:$0xf0]  ;;  %v7852_v28 = vld [vmem:[#allocation2 + $0xeec] sm:$0xf] }
 0x25c   :  { %4631 = vmatpush.bf16.msrb.mxu2 %v6574_v53  ;;  %4606 = vmatpush.bf16.msrb.mxu0 %v6302_v30  ;;  %v6635_v53 = vld [vmem:[#allocation2 + $0xc38] sm:$0xf0]  ;;  %v6510_v30 = vor.u32 %v7732_v6, %v6507_v10  ;;  %v6238_v14 = vor.u32 %v7664_v56, %v6235_v55  ;;  %v6990_v26 = vor.u32 %v7852_v28, %v6987_v24  ;;  %v7880_v27 = vld [vmem:[#allocation2 + $0xfcc] sm:$0xf] }
 0x25d   :  { %v6638_v4 = vor.u32 %v7764_v17, %v6635_v53  ;;  %v7243_v33 = vld [vmem:[#allocation2 + $0x10f8] sm:$0xf0]  ;;  %v7812_v44 = vld [vmem:[#allocation2 + $0xdac] sm:$0xf] }
 0x25e   :  { %4644 = vmatpush.bf16.msrb.mxu3 %v6702_v61  ;;  %4619 = vmatpush.bf16.msrb.mxu1 %v6430_v29  ;;  %v4380_v52 = vpop.f32.mrf.mxu2  ;;  %v6363_v61 = vld [vmem:[#allocation2 + $0xa18] sm:$0xf0]  ;;  %v7912_v63 = vld [vmem:[#allocation2 + $0x10cc] sm:$0xf] }
 0x25f   :  { %v6491_v29 = vld [vmem:[#allocation2 + $0xb18] sm:$0xf0]  ;;  %v6366_v23 = vor.u32 %v7696_v60, %v6363_v61  ;;  %v7844_v46 = vld [vmem:[#allocation2 + $0xeac] sm:$0xf] }
 0x260   :  { %4632 = vmatpush.bf16.msrb.mxu2 %v6558_v11  ;;  %4607 = vmatpush.bf16.msrb.mxu0 %v6286_v16  ;;  %v6862_v11 = vor.u32 %v7820_v51, %v6859_v20  ;;  %v4393_v12 = vpop.f32.mrf.mxu3  ;;  %v7884_v16 = vld [vmem:[#allocation2 + $0xfec] sm:$0xf]  ;;  %v6494_v15 = vor.u32 %v7728_v2, %v6491_v29  ;;  %v6971_v37 = vld [vmem:[#allocation2 + $0xed8] sm:$0xf0] }
 0x261   :  { %v7118_v0 = vor.u32 %v7884_v16, %v7115_v21  ;;  %v7083_v10 = vld [vmem:[#allocation2 + $0xfb8] sm:$0xf0]  ;;  %v7808_v56 = vld [vmem:[#allocation2 + $0xd8c] sm:$0xf] }
 0x262   :  { %4645 = vmatpush.bf16.msrb.mxu3 %v6686_v45  ;;  %4620 = vmatpush.bf16.msrb.mxu1 %v6414_v1  ;;  %v7760_v45 = vld [vmem:[#allocation2 + $0xc0c] sm:$0xf]  ;;  %v6811_v55 = vld [vmem:[#allocation2 + $0xd98] sm:$0xf0] }
 0x263   :  { %v7816_v1 = vld [vmem:[#allocation2 + $0xdcc] sm:$0xf]  ;;  %v6622_v18 = vor.u32 %v7760_v45, %v6619_v34  ;;  %v7211_v53 = vld [vmem:[#allocation2 + $0x10b8] sm:$0xf0] }
 0x264   :  { %4633 = vmatpush.bf16.msrb.mxu2 %v6542_v40  ;;  %4608 = vmatpush.bf16.msrb.mxu0 %v6270_v36  ;;  %v7916_v40 = vld [vmem:[#allocation2 + $0x10ec] sm:$0xf]  ;;  %v6846_v62 = vor.u32 %v7816_v1, %v6843_v19  ;;  %v7067_v61 = vld [vmem:[#allocation2 + $0xf98] sm:$0xf0] }
 0x265   :  { %v7848_v36 = vld [vmem:[#allocation2 + $0xecc] sm:$0xf]  ;;  %v7246_v25 = vor.u32 %v7916_v40, %v7243_v33  ;;  %v6795_v29 = vld [vmem:[#allocation2 + $0xd78] sm:$0xf0] }
 0x266   :  { %4646 = vmatpush.bf16.msrb.mxu3 %v6670_v39  ;;  %4621 = vmatpush.bf16.msrb.mxu1 %v6398_v50  ;;  %v7099_v39 = vld [vmem:[#allocation2 + $0xfd8] sm:$0xf0]  ;;  %v6974_v5 = vor.u32 %v7848_v36, %v6971_v37  ;;  %v7840_v20 = vld [vmem:[#allocation2 + $0xe8c] sm:$0xf] }
 0x267   :  { %v6827_v50 = vld [vmem:[#allocation2 + $0xdb8] sm:$0xf0]  ;;  %v7102_v47 = vor.u32 %v7880_v27, %v7099_v39  ;;  %v7872_v60 = vld [vmem:[#allocation2 + $0xf8c] sm:$0xf] }
 0x268   :  { %4634 = vmatpush.bf16.msrb.mxu2 %v6526_v58  ;;  %4609 = vmatpush.bf16.msrb.mxu0 %v6254_v8  ;;  %v7227_v58 = vld [vmem:[#allocation2 + $0x10d8] sm:$0xf0]  ;;  %v6830_v6 = vor.u32 %v7812_v44, %v6827_v50  ;;  %v7804_v2 = vld [vmem:[#allocation2 + $0xd6c] sm:$0xf] }
 0x269   :  { %v6955_v8 = vld [vmem:[#allocation2 + $0xeb8] sm:$0xf0]  ;;  %v7904_v28 = vld [vmem:[#allocation2 + $0x108c] sm:$0xf]  ;;  %v6798_v16 = vor.u32 %v7804_v2, %v6795_v29 }
 0x26a   :  { %4647 = vmatpush.bf16.msrb.mxu3 %v6654_v48  ;;  %4622 = vmatpush.bf16.msrb.mxu1 %v6382_v9  ;;  %v7230_v48 = vor.u32 %v7912_v63, %v7227_v58  ;;  %v6958_v17 = vor.u32 %v7844_v46, %v6955_v8  ;;  %v7836_v12 = vld [vmem:[#allocation2 + $0xe6c] sm:$0xf]  ;;  %v6923_v24 = vld [vmem:[#allocation2 + $0xe78] sm:$0xf0] }
 0x26b   :  { %v7868_v21 = vld [vmem:[#allocation2 + $0xf6c] sm:$0xf]  ;;  %v6926_v1 = vor.u32 %v7836_v12, %v6923_v24  ;;  %v6907_v36 = vld [vmem:[#allocation2 + $0xe58] sm:$0xf0] }
 0x26c   :  { %4635 = vmatpush.bf16.msrb.mxu2 %v6510_v30  ;;  %4610 = vmatpush.bf16.msrb.mxu0 %v6238_v14  ;;  %v8535_v9 = vpop.f32.mrf.mxu0  ;;  %v6939_v30 = vld [vmem:[#allocation2 + $0xe98] sm:$0xf0]  ;;  %v7800_v34 = vld [vmem:[#allocation2 + $0xd4c] sm:$0xf] }
 0x26d   :  { %v7864_v27 = vld [vmem:[#allocation2 + $0xf4c] sm:$0xf]  ;;  %v7035_v39 = vld [vmem:[#allocation2 + $0xf58] sm:$0xf0] }
 0x26e   :  { %4648 = vmatpush.bf16.msrb.mxu3 %v6638_v4  ;;  %4623 = vmatpush.bf16.msrb.mxu1 %v6366_v23  ;;  %v8537_v52 = vpop.f32.mrf.mxu1  ;;  %v7195_v4 = vld [vmem:[#allocation2 + $0x1098] sm:$0xf0]  ;;  %v7796_v50 = vld [vmem:[#allocation2 + $0xd2c] sm:$0xf]  ;;  %v7038_v46 = vor.u32 %v7864_v27, %v7035_v39 }
 0x26f   :  { %4611 = vmatmul.bf16.vlgmr.msrb.gmra.mxu0 %v8341_v41  ;;  %v7876_v41 = vld [vmem:[#allocation2 + $0xfac] sm:$0xf]  ;;  %v7051_v23 = vld [vmem:[#allocation2 + $0xf78] sm:$0xf0]  ;;  %v7198_v45 = vor.u32 %v7904_v28, %v7195_v4 }
 0x270   :  { %4655 = vmatpush.bf16.msra.mxu0 %v6862_v11  ;;  %4636 = vmatpush.bf16.msrb.mxu2 %v6494_v15  ;;  %v7086_v51 = vor.u32 %v7876_v41, %v7083_v10  ;;  %v7070_v11 = vor.u32 %v7872_v60, %v7067_v61  ;;  %v6779_v15 = vld [vmem:[#allocation2 + $0xd58] sm:$0xf0]  ;;  %v7054_v40 = vor.u32 %v7868_v21, %v7051_v23  ;;  %v7896_v58 = vld [vmem:[#allocation2 + $0x104c] sm:$0xf] }
 0x271   :  { %4624 = vmatmul.bf16.vlgmr.msrb.gmra.mxu1 %v8344_v3  ;;  %v7908_v3 = vld [vmem:[#allocation2 + $0x10ac] sm:$0xf]  ;;  %v6782_v37 = vor.u32 %v7800_v34, %v6779_v15  ;;  %v6875_v60 = vld [vmem:[#allocation2 + $0xe18] sm:$0xf0]  ;;  %v4353_v61 = vadd.f32 %v8523_v49, %v8517_v35  ;;  %v7925_v34 = vld [vmem:[#allocation7 + $0x30] sm:$0xff] }
 0x272   :  { %4668 = vmatpush.bf16.msra.mxu1 %v6990_v26  ;;  %4649 = vmatpush.bf16.msrb.mxu3 %v6622_v18  ;;  %v7214_v14 = vor.u32 %v7908_v3, %v7211_v53  ;;  %v7900_v26 = vld [vmem:[#allocation2 + $0x106c] sm:$0xf]  ;;  %v7003_v29 = vld [vmem:[#allocation2 + $0xf18] sm:$0xf0]  ;;  %v7933_v15 = vld [vmem:[#allocation7 + $0x70] sm:$0xff] }
 0x273   :  { %4637 = vmatmul.bf16.vlgmr.msrb.gmra.mxu2 %v8347_v54  ;;  %v6814_v54 = vor.u32 %v7808_v56, %v6811_v55  ;;  %v7832_v18 = vld [vmem:[#allocation2 + $0xe4c] sm:$0xf]  ;;  %v7926_v28 = vld [vmem:[#allocation7 + $0x38] sm:$0xff]  ;;  %v4366_v21 = vadd.f32 %v8525_v59, %v4353_v61  ;;  %v7941_v59 = vld [vmem:[#allocation7 + $0xb0] sm:$0xff] }
 0x274   :  { %4681 = vmatpush.bf16.msra.mxu2 %v7118_v0  ;;  %4656 = vmatpush.bf16.msra.mxu0 %v6846_v62  ;;  %v4406_v19 = vpop.f32.mrf.mxu0  ;;  %v7179_v0 = vld [vmem:[#allocation2 + $0x1078] sm:$0xf0]  ;;  %v6910_v63 = vor.u32 %v7832_v18, %v6907_v36  ;;  %v7828_v8 = vld [vmem:[#allocation2 + $0xe2c] sm:$0xf]  ;;  %v7939_v36 = vld [vmem:[#allocation7 + $0xa0] sm:$0xff] }
 0x275   :  { %4650 = vmatmul.bf16.vlgmr.msrb.gmra.mxu3 %v8391_v57  ;;  %v6942_v57 = vor.u32 %v7840_v20, %v6939_v30  ;;  %v7860_v10 = vld [vmem:[#allocation2 + $0xf2c] sm:$0xf]  ;;  %v7131_v24 = vld [vmem:[#allocation2 + $0x1018] sm:$0xf0]  ;;  %v4379_v49 = vadd.f32 %v8527_v31, %v4366_v21 }
 0x276   :  { %4694 = vmatpush.bf16.msra.mxu3 %v7246_v25  ;;  %4669 = vmatpush.bf16.msra.mxu1 %v6974_v5  ;;  %v8539_v33 = vpop.f32.mrf.mxu2  ;;  %v4419_v62 = vpop.f32.mrf.mxu1  ;;  %v7182_v25 = vor.u32 %v7900_v26, %v7179_v0  ;;  %v6763_v5 = vld [vmem:[#allocation2 + $0xd38] sm:$0xf0]  ;;  %v7792_v55 = vld [vmem:[#allocation2 + $0xd0c] sm:$0xf] }
 0x277   :  { %v6766_v41 = vor.u32 %v7796_v50, %v6763_v5  ;;  %v7892_v53 = vld [vmem:[#allocation2 + $0x102c] sm:$0xf]  ;;  %v7934_v23 = vld [vmem:[#allocation7 + $0x78] sm:$0xff] }
 0x278   :  { %4682 = vmatpush.bf16.msra.mxu2 %v7102_v47  ;;  %4657 = vmatpush.bf16.msra.mxu0 %v6830_v6  ;;  %v8541_v44 = vpop.f32.mrf.mxu3  ;;  %v7163_v47 = vld [vmem:[#allocation2 + $0x1058] sm:$0xf0]  ;;  %v7856_v2 = vld [vmem:[#allocation2 + $0xf0c] sm:$0xf] }
 0x279   :  { %v6891_v6 = vld [vmem:[#allocation2 + $0xe38] sm:$0xf0]  ;;  %v7166_v56 = vor.u32 %v7896_v58, %v7163_v47  ;;  %v7888_v12 = vld [vmem:[#allocation2 + $0x100c] sm:$0xf]  ;;  %v7937_v58 = vld [vmem:[#allocation7 + $0x90] sm:$0xff] }
 0x27a   :  { %4695 = vmatpush.bf16.msra.mxu3 %v7230_v48  ;;  %4670 = vmatpush.bf16.msra.mxu1 %v6958_v17  ;;  %v7019_v48 = vld [vmem:[#allocation2 + $0xf38] sm:$0xf0]  ;;  %v6894_v3 = vor.u32 %v7828_v8, %v6891_v6  ;;  %v7134_v35 = vor.u32 %v7888_v12, %v7131_v24  ;;  %v7924_v19 = vld [vmem:[#allocation7 + $0x28] sm:$0xff] }
 0x27b   :  { %v6747_v17 = vld [vmem:[#allocation2 + $0xd18] sm:$0xf0]  ;;  %v7022_v20 = vor.u32 %v7860_v10, %v7019_v48  ;;  %v7940_v0 = vld [vmem:[#allocation7 + $0xa8] sm:$0xff]  ;;  %v4707_v10 = vmax.f32 %v8477_v7, 0.0 }
 0x27c   :  { %4683 = vmatpush.bf16.msra.mxu2 %v7086_v51  ;;  %4658 = vmatpush.bf16.msra.mxu0 %v6814_v54  ;;  %v7147_v51 = vld [vmem:[#allocation2 + $0x1038] sm:$0xf0]  ;;  %v7824_v54 = vld [vmem:[#allocation2 + $0xe0c] sm:$0xf] }
 0x27d   :  { %v7938_v62 = vld [vmem:[#allocation7 + $0x98] sm:$0xff]  ;;  %v7936_v8 = vld [vmem:[#allocation7 + $0x88] sm:$0xff] }
 0x27e   :  { %4696 = vmatpush.bf16.msra.mxu3 %v7214_v14  ;;  %4671 = vmatpush.bf16.msra.mxu1 %v6942_v57  ;;  %v4432_v30 = vpop.f32.mrf.mxu2  ;;  %v6750_v14 = vor.u32 %v7792_v55, %v6747_v17  ;;  %v7150_v57 = vor.u32 %v7892_v53, %v7147_v51  ;;  %v4708_v55 = vmax.f32 %v8508_v42, 0.0  ;;  %v7935_v17 = vld [vmem:[#allocation7 + $0x80] sm:$0xff]  ;;  %v4711_v53 = vpack.c.bf16 %v4707_v10, %v4707_v10 }
 0x280   :  { %4684 = vmatpush.bf16.msra.mxu2 %v7070_v11  ;;  %4659 = vmatpush.bf16.msra.mxu0 %v6798_v16  ;;  %v4445_v4 = vpop.f32.mrf.mxu3  ;;  %v6878_v11 = vor.u32 %v7824_v54, %v6875_v60  ;;  %v7006_v16 = vor.u32 %v7856_v2, %v7003_v29  ;;  %v4712_v51 = vpack.c.bf16 %v4708_v55, %v4708_v55 }
 0x282   :  { %4697 = vmatpush.bf16.msra.mxu3 %v7198_v45  ;;  %4672 = vmatpush.bf16.msra.mxu1 %v6926_v1  ;;  %v7942_v45 = vld [vmem:[#allocation7 + $0xb8] sm:$0xff]  ;;  %v4392_v1 = vadd.f32 %v8529_v43, %v4379_v49  ;;  %v7931_v43 = vld [vmem:[#allocation7 + $0x60] sm:$0xff] }
 0x283   :  { %v7950_v49 = vld [vmem:[#allocation7 + $0xf8] sm:$0xff] }
 0x284   :  { %4685 = vmatpush.bf16.msra.mxu2 %v7054_v40  ;;  %4660 = vmatpush.bf16.msra.mxu0 %v6782_v37  ;;  %v4405_v31 = vadd.f32 %v8535_v9, %v4392_v1  ;;  %v7923_v40 = vld [vmem:[#allocation7 + $0x20] sm:$0xff]  ;;  %v7922_v9 = vld [vmem:[#allocation7 + $0x18] sm:$0xff] }
 0x285   :  { %v7930_v37 = vld [vmem:[#allocation7 + $0x58] sm:$0xff] }
 0x286   :  { %4698 = vmatpush.bf16.msra.mxu3 %v7182_v25  ;;  %4673 = vmatpush.bf16.msra.mxu1 %v6910_v63  ;;  %v4418_v18 = vadd.f32 %v8537_v52, %v4405_v31  ;;  %v7921_v25 = vld [vmem:[#allocation7 + $0x10] sm:$0xff]  ;;  %v7947_v31 = vld [vmem:[#allocation7 + $0xe0] sm:$0xff] }
 0x287   :  { %v7929_v63 = vld [vmem:[#allocation7 + $0x50] sm:$0xff] }
 0x288   :  { %4686 = vmatpush.bf16.msra.mxu2 %v7038_v46  ;;  %4661 = vmatpush.bf16.msra.mxu0 %v6766_v41  ;;  %v7928_v46 = vld [vmem:[#allocation7 + $0x48] sm:$0xff] }
 0x28a   :  { %4699 = vmatpush.bf16.msra.mxu3 %v7166_v56  ;;  %4674 = vmatpush.bf16.msra.mxu1 %v6894_v3  ;;  %v7927_v56 = vld [vmem:[#allocation7 + $0x40] sm:$0xff] }
 0x28c   :  { %4687 = vmatpush.bf16.msra.mxu2 %v7022_v20  ;;  %4662 = vmatpush.bf16.msra.mxu0 %v6750_v14  ;;  %v4456_v26 = vpop.f32.mrf.mxu0  ;;  %v7974_v20 = vld [vmem:[#allocation5] sm:$0xf] }
 0x28d   :  { %v1098_v30 = vperm.slane %v7974_v20, 3 }
 0x28e   :  { %4700 = vmatpush.bf16.msra.mxu3 %v7150_v57  ;;  %4675 = vmatpush.bf16.msra.mxu1 %v6878_v11 }
 0x28f   :  { %4663 = vmatmul.bf16.vlgmr.msra.gmra.mxu0 %v8405_v32  ;;  %v7932_v32 = vld [vmem:[#allocation7 + $0x68] sm:$0xff] }
 0x290   :  { %4975 = vmatpush.bf16.msrb.mxu0 %v7926_v28  ;;  %4688 = vmatpush.bf16.msra.mxu2 %v7006_v16 }
 0x291   :  { %4676 = vmatmul.bf16.vlgmr.msra.gmra.mxu1 %v8411_v38  ;;  %v4469_v38 = vpop.f32.mrf.mxu1 }
 0x292   :  { %4988 = vmatpush.bf16.msrb.mxu1 %v7934_v23  ;;  %4701 = vmatpush.bf16.msra.mxu3 %v7134_v35 }
 0x293   :  { %4689 = vmatmul.bf16.vlgmr.msra.gmra.mxu2 %v8424_v22  ;;  %v4431_v22 = vadd.f32 %v8539_v33, %v4418_v18  ;;  %v7920_v33 = vld [vmem:[#allocation7 + $0x8] sm:$0xff] }
 0x294   :  { %5001 = vmatpush.bf16.msrb.mxu2 %v7942_v45  ;;  %4976 = vmatpush.bf16.msrb.mxu0 %v7925_v34  ;;  %v7944_v18 = vld [vmem:[#allocation7 + $0xc8] sm:$0xff] }
 0x295   :  { %4702 = vmatmul.bf16.vlgmr.msra.gmra.mxu3 %v8446_v13  ;;  %v4458_v13 = vpop.f32.mrf.mxu0  ;;  %v4444_v39 = vadd.f32 %v8541_v44, %v4431_v22  ;;  %v7919_v44 = vld [vmem:[#allocation7] sm:$0xff] }
 0x296   :  { %4989 = vmatpush.bf16.msrb.mxu1 %v7933_v15  ;;  %v4482_v27 = vpop.f32.mrf.mxu2  ;;  %5014 = vmatpush.bf16.msrb.mxu3 %v7950_v49 }
 0x297   :  { %v4457_v5 = vadd.f32 %v4456_v26, %v4444_v39  ;;  %v7946_v26 = vld [vmem:[#allocation7 + $0xd8] sm:$0xff] }
 0x298   :  { %5002 = vmatpush.bf16.msrb.mxu2 %v7941_v59  ;;  %4977 = vmatpush.bf16.msrb.mxu0 %v7924_v19  ;;  %v4495_v52 = vpop.f32.mrf.mxu3  ;;  %v7949_v59 = vld [vmem:[#allocation7 + $0xf0] sm:$0xff]  ;;  %v7948_v19 = vld [vmem:[#allocation7 + $0xe8] sm:$0xff] }
 0x299   :  { %v4471_v50 = vpop.f32.mrf.mxu1  ;;  %v4470_v47 = vadd.f32 %v4469_v38, %v4457_v5  ;;  %v4496_v7 = vadd.f32 %v4495_v52, %v1098_v30 }
 0x29a   :  { %4990 = vmatpush.bf16.msrb.mxu1 %v7932_v32  ;;  %5015 = vmatpush.bf16.msrb.mxu3 %v7949_v59 }
 0x29b   :  { %v4483_v41 = vadd.f32 %v4482_v27, %v4470_v47 }
 0x29c   :  { %5003 = vmatpush.bf16.msrb.mxu2 %v7940_v0  ;;  %4978 = vmatpush.bf16.msrb.mxu0 %v7923_v40  ;;  %v7945_v40 = vld [vmem:[#allocation7 + $0xd0] sm:$0xff] }
 0x29d   :  { %v4709_v3 = vmax.f32 %v4483_v41, 0.0 }
 0x29e   :  { %4991 = vmatpush.bf16.msrb.mxu1 %v7931_v43  ;;  %v4484_v6 = vpop.f32.mrf.mxu2  ;;  %5016 = vmatpush.bf16.msrb.mxu3 %v7948_v19 }
 0x29f   :  { %v4713_v54 = vpack.c.bf16 %v4709_v3, %v4709_v3 }
 0x2a0   :  { %5004 = vmatpush.bf16.msrb.mxu2 %v7939_v36  ;;  %4979 = vmatpush.bf16.msrb.mxu0 %v7922_v9  ;;  %v4497_v48 = vpop.f32.mrf.mxu3 }
 0x2a2   :  { %4992 = vmatpush.bf16.msrb.mxu1 %v7930_v37  ;;  %5017 = vmatpush.bf16.msrb.mxu3 %v7947_v31  ;;  %v7943_v37 = vld [vmem:[#allocation7 + $0xc0] sm:$0xff] }
 0x2a4   :  { %5005 = vmatpush.bf16.msrb.mxu2 %v7938_v62  ;;  %4980 = vmatpush.bf16.msrb.mxu0 %v7921_v25 }
 0x2a6   :  { %4993 = vmatpush.bf16.msrb.mxu1 %v7929_v63  ;;  %5018 = vmatpush.bf16.msrb.mxu3 %v7946_v26 }
 0x2a8   :  { %5006 = vmatpush.bf16.msrb.mxu2 %v7937_v58  ;;  %4981 = vmatpush.bf16.msrb.mxu0 %v7920_v33 }
 0x2aa   :  { %4994 = vmatpush.bf16.msrb.mxu1 %v7928_v46  ;;  %5019 = vmatpush.bf16.msrb.mxu3 %v7945_v40 }
 0x2ac   :  { %5007 = vmatpush.bf16.msrb.mxu2 %v7936_v8  ;;  %4982 = vmatpush.bf16.msrb.mxu0 %v7919_v44  ;;  %v4508_v60 = vpop.f32.mrf.mxu0 }
 0x2ad   :  { %v4509_v61 = vadd.f32 %v4508_v60, %v4496_v7 }
 0x2ae   :  { %4995 = vmatpush.bf16.msrb.mxu1 %v7927_v56  ;;  %v4521_v14 = vpop.f32.mrf.mxu1  ;;  %5020 = vmatpush.bf16.msrb.mxu3 %v7944_v18 }
 0x2af   :  { %4983 = vmatmul.bf16.vlgmr.msrb.gmra.mxu0 %v4711_v53  ;;  %v4522_v2 = vadd.f32 %v4521_v14, %v4509_v61  ;;  %v7972_v53 = vld [vmem:[#allocation8] ss:$0 sm:$0xff] }
 0x2b0   :  { %5008 = vmatpush.bf16.msrb.mxu2 %v7935_v17 }
 0x2b1   :  { %4996 = vmatmul.bf16.vlgmr.msrb.gmra.mxu1 %v4712_v51 }
 0x2b2   :  { %5021 = vmatpush.bf16.msrb.mxu3 %v7943_v37 }
 0x2b3   :  { %5009 = vmatmul.bf16.vlgmr.msrb.gmra.mxu2 %v4713_v54 }
 0x2b4   :  { %v4510_v42 = vpop.f32.mrf.mxu0 }
 0x2b6   :  { %v4534_v29 = vpop.f32.mrf.mxu2  ;;  %v4523_v28 = vpop.f32.mrf.mxu1 }
 0x2b7   :  { %v4535_v57 = vadd.f32 %v4534_v29, %v4522_v2 }
 0x2b8   :  { %v4547_v4 = vpop.f32.mrf.mxu3 }
 0x2b9   :  { %v4548_v11 = vadd.f32 %v4547_v4, %v4535_v57 }
 0x2be   :  { %v4536_v12 = vpop.f32.mrf.mxu2 }
 0x2c0   :  { %v4549_v24 = vpop.f32.mrf.mxu3 }
 0x2cc   :  { %v4560_v16 = vpop.f32.mrf.mxu0 }
 0x2cd   :  { %v4561_v36 = vadd.f32 %v4560_v16, %v4548_v11 }
 0x2ce   :  { %v4573_v21 = vpop.f32.mrf.mxu1 }
 0x2cf   :  { %v4574_v13 = vadd.f32 %v4573_v21, %v4561_v36 }
 0x2d4   :  { %v4562_v23 = vpop.f32.mrf.mxu0 }
 0x2d6   :  { %v4586_v45 = vpop.f32.mrf.mxu2  ;;  %v4575_v35 = vpop.f32.mrf.mxu1 }
 0x2d7   :  { %v4587_v62 = vadd.f32 %v4586_v45, %v4574_v13 }
 0x2d8   :  { %v4599_v34 = vpop.f32.mrf.mxu3 }
 0x2d9   :  { %v4600_v25 = vadd.f32 %v4599_v34, %v4587_v62 }
 0x2de   :  { %v4588_v15 = vpop.f32.mrf.mxu2 }
 0x2e0   :  { %v4601_v1 = vpop.f32.mrf.mxu3 }
 0x2ec   :  { %v4612_v32 = vpop.f32.mrf.mxu0 }
 0x2ed   :  { %v4613_v50 = vadd.f32 %v4612_v32, %v4600_v25 }
 0x2ee   :  { %v4625_v0 = vpop.f32.mrf.mxu1 }
 0x2ef   :  { %v4626_v52 = vadd.f32 %v4625_v0, %v4613_v50 }
 0x2f4   :  { %v4614_v38 = vpop.f32.mrf.mxu0 }
 0x2f6   :  { %v4638_v43 = vpop.f32.mrf.mxu2  ;;  %v4627_v22 = vpop.f32.mrf.mxu1 }
 0x2f7   :  { %v4639_v5 = vadd.f32 %v4638_v43, %v4626_v52 }
 0x2f8   :  { %v4651_v9 = vpop.f32.mrf.mxu3 }
 0x2f9   :  { %v4652_v58 = vadd.f32 %v4651_v9, %v4639_v5 }
 0x2fe   :  { %v4640_v27 = vpop.f32.mrf.mxu2 }
 0x300   :  { %v4653_v39 = vpop.f32.mrf.mxu3 }
 0x30c   :  { %v4664_v63 = vpop.f32.mrf.mxu0 }
 0x30d   :  { %v4665_v47 = vadd.f32 %v4664_v63, %v4652_v58 }
 0x30e   :  { %v4677_v33 = vpop.f32.mrf.mxu1 }
 0x30f   :  { %v4678_v46 = vadd.f32 %v4677_v33, %v4665_v47 }
 0x314   :  { %v4666_v8 = vpop.f32.mrf.mxu0 }
 0x316   :  { %v4690_v6 = vpop.f32.mrf.mxu2  ;;  %v4679_v44 = vpop.f32.mrf.mxu1 }
 0x317   :  { %v4691_v41 = vadd.f32 %v4690_v6, %v4678_v46 }
 0x318   :  { %v4703_v10 = vpop.f32.mrf.mxu3 }
 0x319   :  { %v4704_v48 = vadd.f32 %v4703_v10, %v4691_v41 }
 0x31b   :  { %v4710_v56 = vmax.f32 %v4704_v48, 0.0 }
 0x31d   :  { %v4714_v55 = vpack.c.bf16 %v4710_v56, %v4710_v56 }
 0x31e   :  { %v4692_v17 = vpop.f32.mrf.mxu2 }
 0x31f   :  { %5022 = vmatmul.bf16.vlgmr.msrb.gmra.mxu3 %v4714_v55 }
 0x320   :  { %v4705_v3 = vpop.f32.mrf.mxu3 }
 0x32c   :  { %v4984_v51 = vpop.f32.mrf.mxu0 }
 0x32d   :  { %v4985_v20 = vadd.f32 %v7972_v53, %v4984_v51 }
 0x32e   :  { %v4997_v30 = vpop.f32.mrf.mxu1 }
 0x32f   :  { %v4998_v54 = vadd.f32 %v4997_v30, %v4985_v20 }
 0x334   :  { %v4986_v7 = vpop.f32.mrf.mxu0 }
 0x336   :  { %v5010_v60 = vpop.f32.mrf.mxu2  ;;  %v4999_v14 = vpop.f32.mrf.mxu1 }
 0x337   :  { %v5011_v61 = vadd.f32 %v5010_v60, %v4998_v54 }
 0x33e   :  { %v5012_v2 = vpop.f32.mrf.mxu2 }
 0x3a2   :  { %v5023_v42 = vpop.f32.mrf.mxu3 }
 0x3a3   :  { %v5024_v29 = vadd.f32 %v5023_v42, %v5011_v61 }
 0x3a5   :  { %5027 = vst [vmem:[#allocation10] sm:$0xff] %v5024_v29 }
 0x3a6   :  { %5038 = dma.vmem_to_hbm [thread:$0]  %s5034_s15, 128, %s5036_s18, [#allocation4]  }
 0x3aa   :  { %v5025_v57 = vpop.f32.mrf.mxu3 }
 0x3ab   :  { %8101 = dma.done.wait [#allocation4], 128  }
 0x3ac   :  { %8102 = vsyncadd [#allocation4], 4294967168 }
 0x3ad   :  { %5043 = vsyncpa [#allocation3], 1 }
 0x3ae   :  { %5044 = vsyncpa [#allocation6], 1 }
 0x3af   :  { %5045 = vsyncpa [#allocation9], 1 }
 0x3b0   :  { %5046 = vsyncpa [#allocation4], 1 }

</bundles_post_ra>
